<compile_context>
chip_gen: v7x
topology: tpu7x:2x2x1
jax: 0.10.0
libtpu: 0.0.40
codegen_flags: <defaults>
</compile_context>

<pallas_src>
import functools

import jax
import jax.numpy as jnp
from jax import lax
from jax.experimental import pallas as pl
from jax.experimental.pallas import tpu as pltpu

EPS = 1e-5  # nn.InstanceNorm2d default (affine=False, biased variance)


def _resnet_block_kernel(x_ref, w1_ref, w2_ref, o_ref, pad_sc, patch_sc, *,
                         H, W, C, pack):
    # x_ref    : (H, W, C)       bf16  unpadded input image (batch dim squeezed)
    # w*_ref   : (9*C, C)        bf16  conv weights, rows ordered (ky, kx, C_in)
    # o_ref    : (H*W//P, 128)   f32 if pack else (H, W, C) f32
    # pad_sc   : (H+2, W+2, C)   f32   reflection-pad scratch (reused by both convs)
    # patch_sc : (H*W, 9*C)      bf16  im2col patches (single fused MXU contraction)
    HW = H * W

    def reflect_pad1(src):
        # ReflectionPad2d(1): pad[0] = src[1], pad[H+1] = src[H-2]; same for cols.
        pad_sc[1:H + 1, 1:W + 1, :] = src
        pad_sc[0:1, 1:W + 1, :] = src[1:2, :, :]
        pad_sc[H + 1:H + 2, 1:W + 1, :] = src[H - 2:H - 1, :, :]
        pad_sc[:, 0:1, :] = pad_sc[:, 2:3, :]            # left col  <- col 1 of src
        pad_sc[:, W + 1:W + 2, :] = pad_sc[:, W - 1:W, :]  # right col <- col W-2

    def conv3x3(w_ref):
        # Fused im2col: build the (HW, 9C) bf16 patch matrix once, then a single
        # MXU dot with contraction K = 9C (no per-tap f32 accumulate adds, one
        # MXU result drain, one f32->bf16 cast per tap at store time).
        for k in range(9):
            dy, dx = divmod(k, 3)
            tap = pad_sc[dy:dy + H, dx:dx + W, :].reshape(HW, C)
            patch_sc[:, k * C:(k + 1) * C] = tap.astype(jnp.bfloat16)
        return jnp.dot(patch_sc[...], w_ref[...],
                       preferred_element_type=jnp.float32)       # (HW, C) f32

    def instance_norm(y):
        # Single-pass statistics: per-channel sum and sum-of-squares over spatial,
        # biased variance, f32 throughout (bias-free conv => no cancellation risk).
        inv_n = 1.0 / HW
        s = jnp.sum(y, axis=0, keepdims=True)
        ss = jnp.sum(y * y, axis=0, keepdims=True)
        mean = s * inv_n
        var = jnp.maximum(ss * inv_n - mean * mean, 0.0)
        return (y - mean) * lax.rsqrt(var + EPS)

    x = x_ref[...].astype(jnp.float32)                           # (H, W, C) f32

    # ---- ReflPad -> conv1 -> InstanceNorm -> ReLU (bias cancelled by IN) ----
    reflect_pad1(x)
    y1 = jnp.maximum(instance_norm(conv3x3(w1_ref)), 0.0)        # (HW, C) f32

    # ---- ReflPad of the intermediate -> conv2 -> InstanceNorm ----
    reflect_pad1(y1.reshape(H, W, C))                            # scratch reused
    y2 = instance_norm(conv3x3(w2_ref))                          # (HW, C) f32

    # ---- residual add (x was only bf16-rounded once, at the HBM boundary) ----
    out = x.reshape(HW, C) + y2                                  # (HW, C) f32

    if pack:
        # Lane-dense output: P = 128//C row-groups of the (HW, C) result are laid
        # side by side so the output block's last dim is 128 (dense DMA, no
        # 4-of-128-lane output block).  Unpacked by the wrapper.
        P = 128 // C
        rows = HW // P
        for j in range(P):
            o_ref[:, j * C:(j + 1) * C] = out[j * rows:(j + 1) * rows, :]
    else:
        o_ref[...] = out.reshape(H, W, C)


def _pack_info(H, W, C):
    """Lane-dense output packing parameters (only useful/valid when C < 128)."""
    if C < 128 and 128 % C == 0 and (H * W) % (128 // C) == 0:
        pieces = 128 // C
        return True, (H * W) // pieces, pieces
    return False, None, None


def _vmem_limit_bytes(H, W, C):
    """Scoped-VMEM budget from the real footprint: ~25% headroom (no 2x hedge),
    capped at 48 MiB so it stays inside v7x's 64 MiB/TC with room for compiler
    internals; v5e/v6e (128 MiB) are unaffected."""
    f32, bf16 = 4, 2
    HW = H * W
    est = 0
    est += 2 * HW * C * bf16              # input block, double-buffered
    est += 2 * HW * C * f32               # output block, double-buffered
    est += 2 * 2 * 9 * C * C * bf16       # both conv weights, double-buffered
    est += (H + 2) * (W + 2) * C * f32    # reflection-pad scratch
    est += HW * 9 * C * bf16              # im2col patch scratch
    est += 6 * HW * C * f32               # live f32 values (x, conv acc, IN, y2)
    est = est + est // 4 + (1 << 20)
    return int(min(max(est, 16 << 20), 48 << 20))


def resnet_block_nhwc(x_nhwc, w1, w2):
    """ResnetBlock forward on NHWC input; weights in PyTorch OIHW layout.

    Conv biases are intentionally not taken: InstanceNorm2d(affine=False) right
    after each conv cancels a per-channel bias exactly.  For a stack of blocks
    call this function directly (keeps NHWC between blocks; no per-block
    NCHW<->NHWC transposes)."""
    N, H, W, C = x_nhwc.shape
    assert H >= 2 and W >= 2, "ReflectionPad2d(1) needs H, W >= 2"
    pack, rows, pieces = _pack_info(H, W, C)

    # bf16 activations across the HBM boundary (halves input DMA; the matmul
    # operands are bf16 anyway).  Everything stateful inside the kernel is f32.
    x_bf16 = x_nhwc.astype(jnp.bfloat16)

    # (C_out, C_in, 3, 3) -> (ky, kx, C_in, C_out) -> (9*C_in, C_out), bf16 for MXU.
    w1p = jnp.transpose(w1, (2, 3, 1, 0)).reshape(9 * C, C).astype(jnp.bfloat16)
    w2p = jnp.transpose(w2, (2, 3, 1, 0)).reshape(9 * C, C).astype(jnp.bfloat16)

    if pack:
        out_shape = jax.ShapeDtypeStruct((N, rows, 128), jnp.float32)
        out_spec = pl.BlockSpec((None, rows, 128), lambda n: (n, 0, 0))
    else:
        out_shape = jax.ShapeDtypeStruct((N, H, W, C), jnp.float32)
        out_spec = pl.BlockSpec((None, H, W, C), lambda n: (n, 0, 0, 0))

    kernel = functools.partial(_resnet_block_kernel, H=H, W=W, C=C, pack=pack)

    # TODO(synk): at full UGATIT size (C=256, H=W>=64) add an H-tile grid axis with a
    # two-pass InstanceNorm (per-channel sum/sumsq accumulated across H tiles, then a
    # normalize pass) so per-step VMEM fits v7x's 64 MiB/TC and the H axis can be
    # marked "parallel" for megacore when N == 1.
    out = pl.pallas_call(
        kernel,
        out_shape=out_shape,
        grid_spec=pltpu.PrefetchScalarGridSpec(
            num_scalar_prefetch=0,
            grid=(N,),
            in_specs=[
                pl.BlockSpec((None, H, W, C), lambda n: (n, 0, 0, 0)),
                # Constant index_map -> fetched once and revisited across the grid.
                # At large C these can be single-buffered (pipeline_mode=
                # pl.Buffered(1)) to free ~half the weight VMEM; negligible here.
                pl.BlockSpec((9 * C, C), lambda n: (0, 0)),
                pl.BlockSpec((9 * C, C), lambda n: (0, 0)),
            ],
            out_specs=out_spec,
            scratch_shapes=[
                pltpu.VMEM((H + 2, W + 2, C), jnp.float32),   # reflection-pad scratch
                pltpu.VMEM((H * W, 9 * C), jnp.bfloat16),     # im2col patches
            ],
        ),
        compiler_params=pltpu.CompilerParams(
            dimension_semantics=("parallel",),
            vmem_limit_bytes=_vmem_limit_bytes(H, W, C)),
    )(x_bf16, w1p, w2p)

    if pack:
        # Undo the lane-dense packing: packed[n, r, j*C + c] == out[n, j*rows + r, c].
        out = (out.reshape(N, rows, pieces, C)
                  .transpose(0, 2, 1, 3)
                  .reshape(N, H, W, C))
    return out


@jax.jit
def resnet_block(x_nchw, w1, b1, w2, b2):
    """PyTorch-parity entry point (NCHW in / NCHW out).

    b1/b2 are accepted for API parity but unused: InstanceNorm (affine=False)
    cancels them exactly.  When stacking ResnetBlocks, hoist these transposes and
    call `resnet_block_nhwc` directly between blocks."""
    del b1, b2
    x_nhwc = jnp.transpose(x_nchw, (0, 2, 3, 1))
    out_nhwc = resnet_block_nhwc(x_nhwc, w1, w2)
    return jnp.transpose(out_nhwc, (0, 3, 1, 2))


def resnet_block_ref(x, w1, b1, w2, b2, *, match_kernel=False):
    """Pure-JAX reference, NCHW, mirroring the PyTorch module (biases included).

    match_kernel=True rounds the conv/residual inputs and weights to bf16
    (f32 accumulation), mirroring the kernel's MXU precision and bf16 HBM input,
    so the comparison can use a tight tolerance."""
    rnd = ((lambda a: a.astype(jnp.bfloat16).astype(jnp.float32))
           if match_kernel else (lambda a: a))
    x = rnd(x)

    def conv(h, w, b):
        hp = jnp.pad(h, ((0, 0), (0, 0), (1, 1), (1, 1)), mode="reflect")
        y = lax.conv_general_dilated(
            rnd(hp), rnd(w), window_strides=(1, 1), padding="VALID",
            dimension_numbers=("NCHW", "OIHW", "NCHW"),
            precision=lax.Precision.HIGHEST)
        return y + b.reshape(1, -1, 1, 1)

    def inorm(y):
        m = y.mean(axis=(2, 3), keepdims=True)
        v = ((y - m) ** 2).mean(axis=(2, 3), keepdims=True)
        return (y - m) * lax.rsqrt(v + EPS)

    h = jnp.maximum(inorm(conv(x, w1, b1)), 0.0)
    h = inorm(conv(h, w2, b2))
    return x + h


if __name__ == "__main__":
    N, C, H, W = 2, 4, 16, 16   # dim=4, use_bias=True
    key = jax.random.PRNGKey(0)
    kx, kw1, kb1, kw2, kb2 = jax.random.split(key, 5)

    x = jax.random.normal(kx, (N, C, H, W), jnp.float32)
    w1 = jax.random.normal(kw1, (C, C, 3, 3), jnp.float32) * 0.1
    b1 = jax.random.normal(kb1, (C,), jnp.float32) * 0.1
    w2 = jax.random.normal(kw2, (C, C, 3, 3), jnp.float32) * 0.1
    b2 = jax.random.normal(kb2, (C,), jnp.float32) * 0.1

    out = jax.block_until_ready(resnet_block(x, w1, b1, w2, b2))

    # Tight check against a reference mirroring the kernel's bf16 boundary/MXU
    # precision (also proves the bias cancellation), plus a looser sanity check
    # against the exact f32 reference.
    ref_match = jax.block_until_ready(
        resnet_block_ref(x, w1, b1, w2, b2, match_kernel=True))
    ref_exact = jax.block_until_ready(
        resnet_block_ref(x, w1, b1, w2, b2, match_kernel=False))

    assert out.shape == (N, C, H, W) and out.dtype == jnp.float32
    err_tight = float(jnp.max(jnp.abs(out - ref_match)))
    err_loose = float(jnp.max(jnp.abs(out - ref_exact)))
    assert jnp.allclose(out, ref_match, atol=2e-3, rtol=2e-3), err_tight
    assert jnp.allclose(out, ref_exact, atol=1e-1, rtol=1e-1), err_loose
    print("KERNEL_OK")
</pallas_src>

<mosaic_0001>
module attributes {stable_mosaic.version = 11 : i64} {
  func.func @_resnet_block_kernel(%arg0: i32, %arg1: memref<1x16x16x4xbf16, #tpu.memory_space<vmem>>, %arg2: memref<36x4xbf16, #tpu.memory_space<vmem>>, %arg3: memref<36x4xbf16, #tpu.memory_space<vmem>>, %arg4: memref<1x8x128xf32, #tpu.memory_space<vmem>>, %arg5: memref<18x18x4xf32, #tpu.memory_space<vmem>>, %arg6: memref<256x36xbf16, #tpu.memory_space<vmem>>) attributes {dimension_semantics = [#tpu.dimension_semantics<parallel>], iteration_bounds = array<i64: 2>, scalar_prefetch = 0 : i64, scratch_operands = 2 : i64, tpu.core_type = #tpu.core_type<tc>, window_params = [{transform_indices = @transform_0, window_bounds = array<i64: 1, 16, 16, 4>}, {pipeline_mode = #tpu.pipeline_mode<synchronous>, transform_indices = @transform_1, window_bounds = array<i64: 36, 4>}, {pipeline_mode = #tpu.pipeline_mode<synchronous>, transform_indices = @transform_2, window_bounds = array<i64: 36, 4>}, {transform_indices = @transform_3, window_bounds = array<i64: 1, 8, 128>}]} {
    %c0 = arith.constant 0 : index
    %c0_0 = arith.constant 0 : index
    %c0_1 = arith.constant 0 : index
    %c0_2 = arith.constant 0 : index
    %0 = vector.load %arg1[%c0, %c0_0, %c0_1, %c0_2] : memref<1x16x16x4xbf16, #tpu.memory_space<vmem>>, vector<1x16x16x4xbf16>
    %1 = vector.shape_cast %0 : vector<1x16x16x4xbf16> to vector<16x16x4xbf16>
    %2 = arith.extf %1 : vector<16x16x4xbf16> to vector<16x16x4xf32>
    %c1 = arith.constant 1 : index
    %c1_3 = arith.constant 1 : index
    %c0_4 = arith.constant 0 : index
    %3 = vector.load %arg5[%c1, %c1_3, %c0_4] : memref<18x18x4xf32, #tpu.memory_space<vmem>>, vector<16x16x4xf32>
    tpu.vector_store %arg5[%c1, %c1_3, %c0_4], %2 {strides = array<i32>} : memref<18x18x4xf32, #tpu.memory_space<vmem>>, vector<16x16x4xf32>,
    %4 = vector.extract_strided_slice %2 {offsets = [1, 0, 0], sizes = [1, 16, 4], strides = [1, 1, 1]} : vector<16x16x4xf32> to vector<1x16x4xf32>
    %c0_5 = arith.constant 0 : index
    %c1_6 = arith.constant 1 : index
    %c0_7 = arith.constant 0 : index
    %5 = vector.load %arg5[%c0_5, %c1_6, %c0_7] : memref<18x18x4xf32, #tpu.memory_space<vmem>>, vector<1x16x4xf32>
    tpu.vector_store %arg5[%c0_5, %c1_6, %c0_7], %4 {strides = array<i32>} : memref<18x18x4xf32, #tpu.memory_space<vmem>>, vector<1x16x4xf32>,
    %6 = vector.extract_strided_slice %2 {offsets = [14, 0, 0], sizes = [1, 16, 4], strides = [1, 1, 1]} : vector<16x16x4xf32> to vector<1x16x4xf32>
    %c17 = arith.constant 17 : index
    %c1_8 = arith.constant 1 : index
    %c0_9 = arith.constant 0 : index
    %7 = vector.load %arg5[%c17, %c1_8, %c0_9] : memref<18x18x4xf32, #tpu.memory_space<vmem>>, vector<1x16x4xf32>
    tpu.vector_store %arg5[%c17, %c1_8, %c0_9], %6 {strides = array<i32>} : memref<18x18x4xf32, #tpu.memory_space<vmem>>, vector<1x16x4xf32>,
    %c0_10 = arith.constant 0 : index
    %c2 = arith.constant 2 : index
    %c0_11 = arith.constant 0 : index
    %8 = vector.load %arg5[%c0_10, %c2, %c0_11] : memref<18x18x4xf32, #tpu.memory_space<vmem>>, vector<18x1x4xf32>
    %c0_12 = arith.constant 0 : index
    %c0_13 = arith.constant 0 : index
    %c0_14 = arith.constant 0 : index
    %9 = vector.load %arg5[%c0_12, %c0_13, %c0_14] : memref<18x18x4xf32, #tpu.memory_space<vmem>>, vector<18x1x4xf32>
    tpu.vector_store %arg5[%c0_12, %c0_13, %c0_14], %8 {strides = array<i32>} : memref<18x18x4xf32, #tpu.memory_space<vmem>>, vector<18x1x4xf32>,
    %c0_15 = arith.constant 0 : index
    %c15 = arith.constant 15 : index
    %c0_16 = arith.constant 0 : index
    %10 = vector.load %arg5[%c0_15, %c15, %c0_16] : memref<18x18x4xf32, #tpu.memory_space<vmem>>, vector<18x1x4xf32>
    %c0_17 = arith.constant 0 : index
    %c17_18 = arith.constant 17 : index
    %c0_19 = arith.constant 0 : index
    %11 = vector.load %arg5[%c0_17, %c17_18, %c0_19] : memref<18x18x4xf32, #tpu.memory_space<vmem>>, vector<18x1x4xf32>
    tpu.vector_store %arg5[%c0_17, %c17_18, %c0_19], %10 {strides = array<i32>} : memref<18x18x4xf32, #tpu.memory_space<vmem>>, vector<18x1x4xf32>,
    %c0_20 = arith.constant 0 : index
    %c0_21 = arith.constant 0 : index
    %c0_22 = arith.constant 0 : index
    %12 = vector.load %arg5[%c0_20, %c0_21, %c0_22] : memref<18x18x4xf32, #tpu.memory_space<vmem>>, vector<16x16x4xf32>
    %13 = vector.shape_cast %12 : vector<16x16x4xf32> to vector<256x4xf32>
    %14 = arith.truncf %13 : vector<256x4xf32> to vector<256x4xbf16>
    %c0_23 = arith.constant 0 : index
    %c0_24 = arith.constant 0 : index
    %15 = vector.load %arg6[%c0_23, %c0_24] : memref<256x36xbf16, #tpu.memory_space<vmem>>, vector<256x4xbf16>
    tpu.vector_store %arg6[%c0_23, %c0_24], %14 {strides = array<i32>} : memref<256x36xbf16, #tpu.memory_space<vmem>>, vector<256x4xbf16>,
    %c0_25 = arith.constant 0 : index
    %c1_26 = arith.constant 1 : index
    %c0_27 = arith.constant 0 : index
    %16 = vector.load %arg5[%c0_25, %c1_26, %c0_27] : memref<18x18x4xf32, #tpu.memory_space<vmem>>, vector<16x16x4xf32>
    %17 = vector.shape_cast %16 : vector<16x16x4xf32> to vector<256x4xf32>
    %18 = arith.truncf %17 : vector<256x4xf32> to vector<256x4xbf16>
    %c0_28 = arith.constant 0 : index
    %c4 = arith.constant 4 : index
    %19 = vector.load %arg6[%c0_28, %c4] : memref<256x36xbf16, #tpu.memory_space<vmem>>, vector<256x4xbf16>
    tpu.vector_store %arg6[%c0_28, %c4], %18 {strides = array<i32>} : memref<256x36xbf16, #tpu.memory_space<vmem>>, vector<256x4xbf16>,
    %c0_29 = arith.constant 0 : index
    %c2_30 = arith.constant 2 : index
    %c0_31 = arith.constant 0 : index
    %20 = vector.load %arg5[%c0_29, %c2_30, %c0_31] : memref<18x18x4xf32, #tpu.memory_space<vmem>>, vector<16x16x4xf32>
    %21 = vector.shape_cast %20 : vector<16x16x4xf32> to vector<256x4xf32>
    %22 = arith.truncf %21 : vector<256x4xf32> to vector<256x4xbf16>
    %c0_32 = arith.constant 0 : index
    %c8 = arith.constant 8 : index
    %23 = vector.load %arg6[%c0_32, %c8] : memref<256x36xbf16, #tpu.memory_space<vmem>>, vector<256x4xbf16>
    tpu.vector_store %arg6[%c0_32, %c8], %22 {strides = array<i32>} : memref<256x36xbf16, #tpu.memory_space<vmem>>, vector<256x4xbf16>,
    %c1_33 = arith.constant 1 : index
    %c0_34 = arith.constant 0 : index
    %c0_35 = arith.constant 0 : index
    %24 = vector.load %arg5[%c1_33, %c0_34, %c0_35] : memref<18x18x4xf32, #tpu.memory_space<vmem>>, vector<16x16x4xf32>
    %25 = vector.shape_cast %24 : vector<16x16x4xf32> to vector<256x4xf32>
    %26 = arith.truncf %25 : vector<256x4xf32> to vector<256x4xbf16>
    %c0_36 = arith.constant 0 : index
    %c12 = arith.constant 12 : index
    %27 = vector.load %arg6[%c0_36, %c12] : memref<256x36xbf16, #tpu.memory_space<vmem>>, vector<256x4xbf16>
    tpu.vector_store %arg6[%c0_36, %c12], %26 {strides = array<i32>} : memref<256x36xbf16, #tpu.memory_space<vmem>>, vector<256x4xbf16>,
    %c1_37 = arith.constant 1 : index
    %c1_38 = arith.constant 1 : index
    %c0_39 = arith.constant 0 : index
    %28 = vector.load %arg5[%c1_37, %c1_38, %c0_39] : memref<18x18x4xf32, #tpu.memory_space<vmem>>, vector<16x16x4xf32>
    %29 = vector.shape_cast %28 : vector<16x16x4xf32> to vector<256x4xf32>
    %30 = arith.truncf %29 : vector<256x4xf32> to vector<256x4xbf16>
    %c0_40 = arith.constant 0 : index
    %c16 = arith.constant 16 : index
    %31 = vector.load %arg6[%c0_40, %c16] : memref<256x36xbf16, #tpu.memory_space<vmem>>, vector<256x4xbf16>
    tpu.vector_store %arg6[%c0_40, %c16], %30 {strides = array<i32>} : memref<256x36xbf16, #tpu.memory_space<vmem>>, vector<256x4xbf16>,
    %c1_41 = arith.constant 1 : index
    %c2_42 = arith.constant 2 : index
    %c0_43 = arith.constant 0 : index
    %32 = vector.load %arg5[%c1_41, %c2_42, %c0_43] : memref<18x18x4xf32, #tpu.memory_space<vmem>>, vector<16x16x4xf32>
    %33 = vector.shape_cast %32 : vector<16x16x4xf32> to vector<256x4xf32>
    %34 = arith.truncf %33 : vector<256x4xf32> to vector<256x4xbf16>
    %c0_44 = arith.constant 0 : index
    %c20 = arith.constant 20 : index
    %35 = vector.load %arg6[%c0_44, %c20] : memref<256x36xbf16, #tpu.memory_space<vmem>>, vector<256x4xbf16>
    tpu.vector_store %arg6[%c0_44, %c20], %34 {strides = array<i32>} : memref<256x36xbf16, #tpu.memory_space<vmem>>, vector<256x4xbf16>,
    %c2_45 = arith.constant 2 : index
    %c0_46 = arith.constant 0 : index
    %c0_47 = arith.constant 0 : index
    %36 = vector.load %arg5[%c2_45, %c0_46, %c0_47] : memref<18x18x4xf32, #tpu.memory_space<vmem>>, vector<16x16x4xf32>
    %37 = vector.shape_cast %36 : vector<16x16x4xf32> to vector<256x4xf32>
    %38 = arith.truncf %37 : vector<256x4xf32> to vector<256x4xbf16>
    %c0_48 = arith.constant 0 : index
    %c24 = arith.constant 24 : index
    %39 = vector.load %arg6[%c0_48, %c24] : memref<256x36xbf16, #tpu.memory_space<vmem>>, vector<256x4xbf16>
    tpu.vector_store %arg6[%c0_48, %c24], %38 {strides = array<i32>} : memref<256x36xbf16, #tpu.memory_space<vmem>>, vector<256x4xbf16>,
    %c2_49 = arith.constant 2 : index
    %c1_50 = arith.constant 1 : index
    %c0_51 = arith.constant 0 : index
    %40 = vector.load %arg5[%c2_49, %c1_50, %c0_51] : memref<18x18x4xf32, #tpu.memory_space<vmem>>, vector<16x16x4xf32>
    %41 = vector.shape_cast %40 : vector<16x16x4xf32> to vector<256x4xf32>
    %42 = arith.truncf %41 : vector<256x4xf32> to vector<256x4xbf16>
    %c0_52 = arith.constant 0 : index
    %c28 = arith.constant 28 : index
    %43 = vector.load %arg6[%c0_52, %c28] : memref<256x36xbf16, #tpu.memory_space<vmem>>, vector<256x4xbf16>
    tpu.vector_store %arg6[%c0_52, %c28], %42 {strides = array<i32>} : memref<256x36xbf16, #tpu.memory_space<vmem>>, vector<256x4xbf16>,
    %c2_53 = arith.constant 2 : index
    %c2_54 = arith.constant 2 : index
    %c0_55 = arith.constant 0 : index
    %44 = vector.load %arg5[%c2_53, %c2_54, %c0_55] : memref<18x18x4xf32, #tpu.memory_space<vmem>>, vector<16x16x4xf32>
    %45 = vector.shape_cast %44 : vector<16x16x4xf32> to vector<256x4xf32>
    %46 = arith.truncf %45 : vector<256x4xf32> to vector<256x4xbf16>
    %c0_56 = arith.constant 0 : index
    %c32 = arith.constant 32 : index
    %47 = vector.load %arg6[%c0_56, %c32] : memref<256x36xbf16, #tpu.memory_space<vmem>>, vector<256x4xbf16>
    tpu.vector_store %arg6[%c0_56, %c32], %46 {strides = array<i32>} : memref<256x36xbf16, #tpu.memory_space<vmem>>, vector<256x4xbf16>,
    %c0_57 = arith.constant 0 : index
    %c0_58 = arith.constant 0 : index
    %48 = vector.load %arg6[%c0_57, %c0_58] : memref<256x36xbf16, #tpu.memory_space<vmem>>, vector<256x36xbf16>
    %c0_59 = arith.constant 0 : index
    %c0_60 = arith.constant 0 : index
    %49 = vector.load %arg2[%c0_59, %c0_60] : memref<36x4xbf16, #tpu.memory_space<vmem>>, vector<36x4xbf16>
    %cst = arith.constant dense<0.000000e+00> : vector<256x4xf32>
    %50 = tpu.matmul %48, %49, %cst {dimension_numbers = #tpu.dot_dimension_numbers<[1], [0], [0], [1], [0, 0, 1, 1], [], []>} : vector<256x36xbf16>, vector<36x4xbf16>, vector<256x4xf32> -> vector<256x4xf32>
    %cst_61 = arith.constant dense<0.000000e+00> : vector<4xf32>
    %51 = vector.multi_reduction <add>, %50, %cst_61 [0] : vector<256x4xf32> to vector<4xf32>
    %52 = vector.shape_cast %51 : vector<4xf32> to vector<1x4xf32>
    %53 = arith.mulf %50, %50 : vector<256x4xf32>
    %cst_62 = arith.constant dense<0.000000e+00> : vector<4xf32>
    %54 = vector.multi_reduction <add>, %53, %cst_62 [0] : vector<256x4xf32> to vector<4xf32>
    %55 = vector.shape_cast %54 : vector<4xf32> to vector<1x4xf32>
    %cst_63 = arith.constant 3.906250e-03 : f32
    %56 = vector.broadcast %cst_63 : f32 to vector<1x4xf32>
    %57 = arith.mulf %52, %56 : vector<1x4xf32>
    %cst_64 = arith.constant 3.906250e-03 : f32
    %58 = vector.broadcast %cst_64 : f32 to vector<1x4xf32>
    %59 = arith.mulf %55, %58 : vector<1x4xf32>
    %60 = arith.mulf %57, %57 : vector<1x4xf32>
    %61 = arith.subf %59, %60 : vector<1x4xf32>
    %cst_65 = arith.constant 0.000000e+00 : f32
    %62 = vector.broadcast %cst_65 : f32 to vector<1x4xf32>
    %63 = arith.maximumf %61, %62 : vector<1x4xf32>
    %64 = vector.broadcast %57 : vector<1x4xf32> to vector<256x4xf32>
    %65 = arith.subf %50, %64 : vector<256x4xf32>
    %cst_66 = arith.constant 9.99999974E-6 : f32
    %66 = vector.broadcast %cst_66 : f32 to vector<1x4xf32>
    %67 = arith.addf %63, %66 : vector<1x4xf32>
    %68 = math.rsqrt %67 : vector<1x4xf32>
    %69 = vector.broadcast %68 : vector<1x4xf32> to vector<256x4xf32>
    %70 = arith.mulf %65, %69 : vector<256x4xf32>
    %cst_67 = arith.constant 0.000000e+00 : f32
    %71 = vector.broadcast %cst_67 : f32 to vector<256x4xf32>
    %72 = arith.maximumf %70, %71 : vector<256x4xf32>
    %73 = vector.shape_cast %72 : vector<256x4xf32> to vector<16x16x4xf32>
    %c1_68 = arith.constant 1 : index
    %c1_69 = arith.constant 1 : index
    %c0_70 = arith.constant 0 : index
    %74 = vector.load %arg5[%c1_68, %c1_69, %c0_70] : memref<18x18x4xf32, #tpu.memory_space<vmem>>, vector<16x16x4xf32>
    tpu.vector_store %arg5[%c1_68, %c1_69, %c0_70], %73 {strides = array<i32>} : memref<18x18x4xf32, #tpu.memory_space<vmem>>, vector<16x16x4xf32>,
    %75 = vector.extract_strided_slice %73 {offsets = [1, 0, 0], sizes = [1, 16, 4], strides = [1, 1, 1]} : vector<16x16x4xf32> to vector<1x16x4xf32>
    %c0_71 = arith.constant 0 : index
    %c1_72 = arith.constant 1 : index
    %c0_73 = arith.constant 0 : index
    %76 = vector.load %arg5[%c0_71, %c1_72, %c0_73] : memref<18x18x4xf32, #tpu.memory_space<vmem>>, vector<1x16x4xf32>
    tpu.vector_store %arg5[%c0_71, %c1_72, %c0_73], %75 {strides = array<i32>} : memref<18x18x4xf32, #tpu.memory_space<vmem>>, vector<1x16x4xf32>,
    %77 = vector.extract_strided_slice %73 {offsets = [14, 0, 0], sizes = [1, 16, 4], strides = [1, 1, 1]} : vector<16x16x4xf32> to vector<1x16x4xf32>
    %c17_74 = arith.constant 17 : index
    %c1_75 = arith.constant 1 : index
    %c0_76 = arith.constant 0 : index
    %78 = vector.load %arg5[%c17_74, %c1_75, %c0_76] : memref<18x18x4xf32, #tpu.memory_space<vmem>>, vector<1x16x4xf32>
    tpu.vector_store %arg5[%c17_74, %c1_75, %c0_76], %77 {strides = array<i32>} : memref<18x18x4xf32, #tpu.memory_space<vmem>>, vector<1x16x4xf32>,
    %c0_77 = arith.constant 0 : index
    %c2_78 = arith.constant 2 : index
    %c0_79 = arith.constant 0 : index
    %79 = vector.load %arg5[%c0_77, %c2_78, %c0_79] : memref<18x18x4xf32, #tpu.memory_space<vmem>>, vector<18x1x4xf32>
    %c0_80 = arith.constant 0 : index
    %c0_81 = arith.constant 0 : index
    %c0_82 = arith.constant 0 : index
    %80 = vector.load %arg5[%c0_80, %c0_81, %c0_82] : memref<18x18x4xf32, #tpu.memory_space<vmem>>, vector<18x1x4xf32>
    tpu.vector_store %arg5[%c0_80, %c0_81, %c0_82], %79 {strides = array<i32>} : memref<18x18x4xf32, #tpu.memory_space<vmem>>, vector<18x1x4xf32>,
    %c0_83 = arith.constant 0 : index
    %c15_84 = arith.constant 15 : index
    %c0_85 = arith.constant 0 : index
    %81 = vector.load %arg5[%c0_83, %c15_84, %c0_85] : memref<18x18x4xf32, #tpu.memory_space<vmem>>, vector<18x1x4xf32>
    %c0_86 = arith.constant 0 : index
    %c17_87 = arith.constant 17 : index
    %c0_88 = arith.constant 0 : index
    %82 = vector.load %arg5[%c0_86, %c17_87, %c0_88] : memref<18x18x4xf32, #tpu.memory_space<vmem>>, vector<18x1x4xf32>
    tpu.vector_store %arg5[%c0_86, %c17_87, %c0_88], %81 {strides = array<i32>} : memref<18x18x4xf32, #tpu.memory_space<vmem>>, vector<18x1x4xf32>,
    %c0_89 = arith.constant 0 : index
    %c0_90 = arith.constant 0 : index
    %c0_91 = arith.constant 0 : index
    %83 = vector.load %arg5[%c0_89, %c0_90, %c0_91] : memref<18x18x4xf32, #tpu.memory_space<vmem>>, vector<16x16x4xf32>
    %84 = vector.shape_cast %83 : vector<16x16x4xf32> to vector<256x4xf32>
    %85 = arith.truncf %84 : vector<256x4xf32> to vector<256x4xbf16>
    %c0_92 = arith.constant 0 : index
    %c0_93 = arith.constant 0 : index
    %86 = vector.load %arg6[%c0_92, %c0_93] : memref<256x36xbf16, #tpu.memory_space<vmem>>, vector<256x4xbf16>
    tpu.vector_store %arg6[%c0_92, %c0_93], %85 {strides = array<i32>} : memref<256x36xbf16, #tpu.memory_space<vmem>>, vector<256x4xbf16>,
    %c0_94 = arith.constant 0 : index
    %c1_95 = arith.constant 1 : index
    %c0_96 = arith.constant 0 : index
    %87 = vector.load %arg5[%c0_94, %c1_95, %c0_96] : memref<18x18x4xf32, #tpu.memory_space<vmem>>, vector<16x16x4xf32>
    %88 = vector.shape_cast %87 : vector<16x16x4xf32> to vector<256x4xf32>
    %89 = arith.truncf %88 : vector<256x4xf32> to vector<256x4xbf16>
    %c0_97 = arith.constant 0 : index
    %c4_98 = arith.constant 4 : index
    %90 = vector.load %arg6[%c0_97, %c4_98] : memref<256x36xbf16, #tpu.memory_space<vmem>>, vector<256x4xbf16>
    tpu.vector_store %arg6[%c0_97, %c4_98], %89 {strides = array<i32>} : memref<256x36xbf16, #tpu.memory_space<vmem>>, vector<256x4xbf16>,
    %c0_99 = arith.constant 0 : index
    %c2_100 = arith.constant 2 : index
    %c0_101 = arith.constant 0 : index
    %91 = vector.load %arg5[%c0_99, %c2_100, %c0_101] : memref<18x18x4xf32, #tpu.memory_space<vmem>>, vector<16x16x4xf32>
    %92 = vector.shape_cast %91 : vector<16x16x4xf32> to vector<256x4xf32>
    %93 = arith.truncf %92 : vector<256x4xf32> to vector<256x4xbf16>
    %c0_102 = arith.constant 0 : index
    %c8_103 = arith.constant 8 : index
    %94 = vector.load %arg6[%c0_102, %c8_103] : memref<256x36xbf16, #tpu.memory_space<vmem>>, vector<256x4xbf16>
    tpu.vector_store %arg6[%c0_102, %c8_103], %93 {strides = array<i32>} : memref<256x36xbf16, #tpu.memory_space<vmem>>, vector<256x4xbf16>,
    %c1_104 = arith.constant 1 : index
    %c0_105 = arith.constant 0 : index
    %c0_106 = arith.constant 0 : index
    %95 = vector.load %arg5[%c1_104, %c0_105, %c0_106] : memref<18x18x4xf32, #tpu.memory_space<vmem>>, vector<16x16x4xf32>
    %96 = vector.shape_cast %95 : vector<16x16x4xf32> to vector<256x4xf32>
    %97 = arith.truncf %96 : vector<256x4xf32> to vector<256x4xbf16>
    %c0_107 = arith.constant 0 : index
    %c12_108 = arith.constant 12 : index
    %98 = vector.load %arg6[%c0_107, %c12_108] : memref<256x36xbf16, #tpu.memory_space<vmem>>, vector<256x4xbf16>
    tpu.vector_store %arg6[%c0_107, %c12_108], %97 {strides = array<i32>} : memref<256x36xbf16, #tpu.memory_space<vmem>>, vector<256x4xbf16>,
    %c1_109 = arith.constant 1 : index
    %c1_110 = arith.constant 1 : index
    %c0_111 = arith.constant 0 : index
    %99 = vector.load %arg5[%c1_109, %c1_110, %c0_111] : memref<18x18x4xf32, #tpu.memory_space<vmem>>, vector<16x16x4xf32>
    %100 = vector.shape_cast %99 : vector<16x16x4xf32> to vector<256x4xf32>
    %101 = arith.truncf %100 : vector<256x4xf32> to vector<256x4xbf16>
    %c0_112 = arith.constant 0 : index
    %c16_113 = arith.constant 16 : index
    %102 = vector.load %arg6[%c0_112, %c16_113] : memref<256x36xbf16, #tpu.memory_space<vmem>>, vector<256x4xbf16>
    tpu.vector_store %arg6[%c0_112, %c16_113], %101 {strides = array<i32>} : memref<256x36xbf16, #tpu.memory_space<vmem>>, vector<256x4xbf16>,
    %c1_114 = arith.constant 1 : index
    %c2_115 = arith.constant 2 : index
    %c0_116 = arith.constant 0 : index
    %103 = vector.load %arg5[%c1_114, %c2_115, %c0_116] : memref<18x18x4xf32, #tpu.memory_space<vmem>>, vector<16x16x4xf32>
    %104 = vector.shape_cast %103 : vector<16x16x4xf32> to vector<256x4xf32>
    %105 = arith.truncf %104 : vector<256x4xf32> to vector<256x4xbf16>
    %c0_117 = arith.constant 0 : index
    %c20_118 = arith.constant 20 : index
    %106 = vector.load %arg6[%c0_117, %c20_118] : memref<256x36xbf16, #tpu.memory_space<vmem>>, vector<256x4xbf16>
    tpu.vector_store %arg6[%c0_117, %c20_118], %105 {strides = array<i32>} : memref<256x36xbf16, #tpu.memory_space<vmem>>, vector<256x4xbf16>,
    %c2_119 = arith.constant 2 : index
    %c0_120 = arith.constant 0 : index
    %c0_121 = arith.constant 0 : index
    %107 = vector.load %arg5[%c2_119, %c0_120, %c0_121] : memref<18x18x4xf32, #tpu.memory_space<vmem>>, vector<16x16x4xf32>
    %108 = vector.shape_cast %107 : vector<16x16x4xf32> to vector<256x4xf32>
    %109 = arith.truncf %108 : vector<256x4xf32> to vector<256x4xbf16>
    %c0_122 = arith.constant 0 : index
    %c24_123 = arith.constant 24 : index
    %110 = vector.load %arg6[%c0_122, %c24_123] : memref<256x36xbf16, #tpu.memory_space<vmem>>, vector<256x4xbf16>
    tpu.vector_store %arg6[%c0_122, %c24_123], %109 {strides = array<i32>} : memref<256x36xbf16, #tpu.memory_space<vmem>>, vector<256x4xbf16>,
    %c2_124 = arith.constant 2 : index
    %c1_125 = arith.constant 1 : index
    %c0_126 = arith.constant 0 : index
    %111 = vector.load %arg5[%c2_124, %c1_125, %c0_126] : memref<18x18x4xf32, #tpu.memory_space<vmem>>, vector<16x16x4xf32>
    %112 = vector.shape_cast %111 : vector<16x16x4xf32> to vector<256x4xf32>
    %113 = arith.truncf %112 : vector<256x4xf32> to vector<256x4xbf16>
    %c0_127 = arith.constant 0 : index
    %c28_128 = arith.constant 28 : index
    %114 = vector.load %arg6[%c0_127, %c28_128] : memref<256x36xbf16, #tpu.memory_space<vmem>>, vector<256x4xbf16>
    tpu.vector_store %arg6[%c0_127, %c28_128], %113 {strides = array<i32>} : memref<256x36xbf16, #tpu.memory_space<vmem>>, vector<256x4xbf16>,
    %c2_129 = arith.constant 2 : index
    %c2_130 = arith.constant 2 : index
    %c0_131 = arith.constant 0 : index
    %115 = vector.load %arg5[%c2_129, %c2_130, %c0_131] : memref<18x18x4xf32, #tpu.memory_space<vmem>>, vector<16x16x4xf32>
    %116 = vector.shape_cast %115 : vector<16x16x4xf32> to vector<256x4xf32>
    %117 = arith.truncf %116 : vector<256x4xf32> to vector<256x4xbf16>
    %c0_132 = arith.constant 0 : index
    %c32_133 = arith.constant 32 : index
    %118 = vector.load %arg6[%c0_132, %c32_133] : memref<256x36xbf16, #tpu.memory_space<vmem>>, vector<256x4xbf16>
    tpu.vector_store %arg6[%c0_132, %c32_133], %117 {strides = array<i32>} : memref<256x36xbf16, #tpu.memory_space<vmem>>, vector<256x4xbf16>,
    %c0_134 = arith.constant 0 : index
    %c0_135 = arith.constant 0 : index
    %119 = vector.load %arg6[%c0_134, %c0_135] : memref<256x36xbf16, #tpu.memory_space<vmem>>, vector<256x36xbf16>
    %c0_136 = arith.constant 0 : index
    %c0_137 = arith.constant 0 : index
    %120 = vector.load %arg3[%c0_136, %c0_137] : memref<36x4xbf16, #tpu.memory_space<vmem>>, vector<36x4xbf16>
    %cst_138 = arith.constant dense<0.000000e+00> : vector<256x4xf32>
    %121 = tpu.matmul %119, %120, %cst_138 {dimension_numbers = #tpu.dot_dimension_numbers<[1], [0], [0], [1], [0, 0, 1, 1], [], []>} : vector<256x36xbf16>, vector<36x4xbf16>, vector<256x4xf32> -> vector<256x4xf32>
    %cst_139 = arith.constant dense<0.000000e+00> : vector<4xf32>
    %122 = vector.multi_reduction <add>, %121, %cst_139 [0] : vector<256x4xf32> to vector<4xf32>
    %123 = vector.shape_cast %122 : vector<4xf32> to vector<1x4xf32>
    %124 = arith.mulf %121, %121 : vector<256x4xf32>
    %cst_140 = arith.constant dense<0.000000e+00> : vector<4xf32>
    %125 = vector.multi_reduction <add>, %124, %cst_140 [0] : vector<256x4xf32> to vector<4xf32>
    %126 = vector.shape_cast %125 : vector<4xf32> to vector<1x4xf32>
    %cst_141 = arith.constant 3.906250e-03 : f32
    %127 = vector.broadcast %cst_141 : f32 to vector<1x4xf32>
    %128 = arith.mulf %123, %127 : vector<1x4xf32>
    %cst_142 = arith.constant 3.906250e-03 : f32
    %129 = vector.broadcast %cst_142 : f32 to vector<1x4xf32>
    %130 = arith.mulf %126, %129 : vector<1x4xf32>
    %131 = arith.mulf %128, %128 : vector<1x4xf32>
    %132 = arith.subf %130, %131 : vector<1x4xf32>
    %cst_143 = arith.constant 0.000000e+00 : f32
    %133 = vector.broadcast %cst_143 : f32 to vector<1x4xf32>
    %134 = arith.maximumf %132, %133 : vector<1x4xf32>
    %135 = vector.broadcast %128 : vector<1x4xf32> to vector<256x4xf32>
    %136 = arith.subf %121, %135 : vector<256x4xf32>
    %cst_144 = arith.constant 9.99999974E-6 : f32
    %137 = vector.broadcast %cst_144 : f32 to vector<1x4xf32>
    %138 = arith.addf %134, %137 : vector<1x4xf32>
    %139 = math.rsqrt %138 : vector<1x4xf32>
    %140 = vector.broadcast %139 : vector<1x4xf32> to vector<256x4xf32>
    %141 = arith.mulf %136, %140 : vector<256x4xf32>
    %142 = vector.shape_cast %2 : vector<16x16x4xf32> to vector<256x4xf32>
    %143 = arith.addf %142, %141 : vector<256x4xf32>
    %144 = vector.extract_strided_slice %143 {offsets = [0, 0], sizes = [8, 4], strides = [1, 1]} : vector<256x4xf32> to vector<8x4xf32>
    %c0_145 = arith.constant 0 : index
    %c0_146 = arith.constant 0 : index
    %c0_147 = arith.constant 0 : index
    %145 = vector.load %arg4[%c0_145, %c0_146, %c0_147] : memref<1x8x128xf32, #tpu.memory_space<vmem>>, vector<1x8x4xf32>
    %146 = vector.shape_cast %145 : vector<1x8x4xf32> to vector<8x4xf32>
    %147 = vector.shape_cast %144 : vector<8x4xf32> to vector<1x8x4xf32>
    tpu.vector_store %arg4[%c0_145, %c0_146, %c0_147], %147 {strides = array<i32>} : memref<1x8x128xf32, #tpu.memory_space<vmem>>, vector<1x8x4xf32>,
    %148 = vector.extract_strided_slice %143 {offsets = [8, 0], sizes = [8, 4], strides = [1, 1]} : vector<256x4xf32> to vector<8x4xf32>
    %c0_148 = arith.constant 0 : index
    %c0_149 = arith.constant 0 : index
    %c4_150 = arith.constant 4 : index
    %149 = vector.load %arg4[%c0_148, %c0_149, %c4_150] : memref<1x8x128xf32, #tpu.memory_space<vmem>>, vector<1x8x4xf32>
    %150 = vector.shape_cast %149 : vector<1x8x4xf32> to vector<8x4xf32>
    %151 = vector.shape_cast %148 : vector<8x4xf32> to vector<1x8x4xf32>
    tpu.vector_store %arg4[%c0_148, %c0_149, %c4_150], %151 {strides = array<i32>} : memref<1x8x128xf32, #tpu.memory_space<vmem>>, vector<1x8x4xf32>,
    %152 = vector.extract_strided_slice %143 {offsets = [16, 0], sizes = [8, 4], strides = [1, 1]} : vector<256x4xf32> to vector<8x4xf32>
    %c0_151 = arith.constant 0 : index
    %c0_152 = arith.constant 0 : index
    %c8_153 = arith.constant 8 : index
    %153 = vector.load %arg4[%c0_151, %c0_152, %c8_153] : memref<1x8x128xf32, #tpu.memory_space<vmem>>, vector<1x8x4xf32>
    %154 = vector.shape_cast %153 : vector<1x8x4xf32> to vector<8x4xf32>
    %155 = vector.shape_cast %152 : vector<8x4xf32> to vector<1x8x4xf32>
    tpu.vector_store %arg4[%c0_151, %c0_152, %c8_153], %155 {strides = array<i32>} : memref<1x8x128xf32, #tpu.memory_space<vmem>>, vector<1x8x4xf32>,
    %156 = vector.extract_strided_slice %143 {offsets = [24, 0], sizes = [8, 4], strides = [1, 1]} : vector<256x4xf32> to vector<8x4xf32>
    %c0_154 = arith.constant 0 : index
    %c0_155 = arith.constant 0 : index
    %c12_156 = arith.constant 12 : index
    %157 = vector.load %arg4[%c0_154, %c0_155, %c12_156] : memref<1x8x128xf32, #tpu.memory_space<vmem>>, vector<1x8x4xf32>
    %158 = vector.shape_cast %157 : vector<1x8x4xf32> to vector<8x4xf32>
    %159 = vector.shape_cast %156 : vector<8x4xf32> to vector<1x8x4xf32>
    tpu.vector_store %arg4[%c0_154, %c0_155, %c12_156], %159 {strides = array<i32>} : memref<1x8x128xf32, #tpu.memory_space<vmem>>, vector<1x8x4xf32>,
    %160 = vector.extract_strided_slice %143 {offsets = [32, 0], sizes = [8, 4], strides = [1, 1]} : vector<256x4xf32> to vector<8x4xf32>
    %c0_157 = arith.constant 0 : index
    %c0_158 = arith.constant 0 : index
    %c16_159 = arith.constant 16 : index
    %161 = vector.load %arg4[%c0_157, %c0_158, %c16_159] : memref<1x8x128xf32, #tpu.memory_space<vmem>>, vector<1x8x4xf32>
    %162 = vector.shape_cast %161 : vector<1x8x4xf32> to vector<8x4xf32>
    %163 = vector.shape_cast %160 : vector<8x4xf32> to vector<1x8x4xf32>
    tpu.vector_store %arg4[%c0_157, %c0_158, %c16_159], %163 {strides = array<i32>} : memref<1x8x128xf32, #tpu.memory_space<vmem>>, vector<1x8x4xf32>,
    %164 = vector.extract_strided_slice %143 {offsets = [40, 0], sizes = [8, 4], strides = [1, 1]} : vector<256x4xf32> to vector<8x4xf32>
    %c0_160 = arith.constant 0 : index
    %c0_161 = arith.constant 0 : index
    %c20_162 = arith.constant 20 : index
    %165 = vector.load %arg4[%c0_160, %c0_161, %c20_162] : memref<1x8x128xf32, #tpu.memory_space<vmem>>, vector<1x8x4xf32>
    %166 = vector.shape_cast %165 : vector<1x8x4xf32> to vector<8x4xf32>
    %167 = vector.shape_cast %164 : vector<8x4xf32> to vector<1x8x4xf32>
    tpu.vector_store %arg4[%c0_160, %c0_161, %c20_162], %167 {strides = array<i32>} : memref<1x8x128xf32, #tpu.memory_space<vmem>>, vector<1x8x4xf32>,
    %168 = vector.extract_strided_slice %143 {offsets = [48, 0], sizes = [8, 4], strides = [1, 1]} : vector<256x4xf32> to vector<8x4xf32>
    %c0_163 = arith.constant 0 : index
    %c0_164 = arith.constant 0 : index
    %c24_165 = arith.constant 24 : index
    %169 = vector.load %arg4[%c0_163, %c0_164, %c24_165] : memref<1x8x128xf32, #tpu.memory_space<vmem>>, vector<1x8x4xf32>
    %170 = vector.shape_cast %169 : vector<1x8x4xf32> to vector<8x4xf32>
    %171 = vector.shape_cast %168 : vector<8x4xf32> to vector<1x8x4xf32>
    tpu.vector_store %arg4[%c0_163, %c0_164, %c24_165], %171 {strides = array<i32>} : memref<1x8x128xf32, #tpu.memory_space<vmem>>, vector<1x8x4xf32>,
    %172 = vector.extract_strided_slice %143 {offsets = [56, 0], sizes = [8, 4], strides = [1, 1]} : vector<256x4xf32> to vector<8x4xf32>
    %c0_166 = arith.constant 0 : index
    %c0_167 = arith.constant 0 : index
    %c28_168 = arith.constant 28 : index
    %173 = vector.load %arg4[%c0_166, %c0_167, %c28_168] : memref<1x8x128xf32, #tpu.memory_space<vmem>>, vector<1x8x4xf32>
    %174 = vector.shape_cast %173 : vector<1x8x4xf32> to vector<8x4xf32>
    %175 = vector.shape_cast %172 : vector<8x4xf32> to vector<1x8x4xf32>
    tpu.vector_store %arg4[%c0_166, %c0_167, %c28_168], %175 {strides = array<i32>} : memref<1x8x128xf32, #tpu.memory_space<vmem>>, vector<1x8x4xf32>,
    %176 = vector.extract_strided_slice %143 {offsets = [64, 0], sizes = [8, 4], strides = [1, 1]} : vector<256x4xf32> to vector<8x4xf32>
    %c0_169 = arith.constant 0 : index
    %c0_170 = arith.constant 0 : index
    %c32_171 = arith.constant 32 : index
    %177 = vector.load %arg4[%c0_169, %c0_170, %c32_171] : memref<1x8x128xf32, #tpu.memory_space<vmem>>, vector<1x8x4xf32>
    %178 = vector.shape_cast %177 : vector<1x8x4xf32> to vector<8x4xf32>
    %179 = vector.shape_cast %176 : vector<8x4xf32> to vector<1x8x4xf32>
    tpu.vector_store %arg4[%c0_169, %c0_170, %c32_171], %179 {strides = array<i32>} : memref<1x8x128xf32, #tpu.memory_space<vmem>>, vector<1x8x4xf32>,
    %180 = vector.extract_strided_slice %143 {offsets = [72, 0], sizes = [8, 4], strides = [1, 1]} : vector<256x4xf32> to vector<8x4xf32>
    %c0_172 = arith.constant 0 : index
    %c0_173 = arith.constant 0 : index
    %c36 = arith.constant 36 : index
    %181 = vector.load %arg4[%c0_172, %c0_173, %c36] : memref<1x8x128xf32, #tpu.memory_space<vmem>>, vector<1x8x4xf32>
    %182 = vector.shape_cast %181 : vector<1x8x4xf32> to vector<8x4xf32>
    %183 = vector.shape_cast %180 : vector<8x4xf32> to vector<1x8x4xf32>
    tpu.vector_store %arg4[%c0_172, %c0_173, %c36], %183 {strides = array<i32>} : memref<1x8x128xf32, #tpu.memory_space<vmem>>, vector<1x8x4xf32>,
    %184 = vector.extract_strided_slice %143 {offsets = [80, 0], sizes = [8, 4], strides = [1, 1]} : vector<256x4xf32> to vector<8x4xf32>
    %c0_174 = arith.constant 0 : index
    %c0_175 = arith.constant 0 : index
    %c40 = arith.constant 40 : index
    %185 = vector.load %arg4[%c0_174, %c0_175, %c40] : memref<1x8x128xf32, #tpu.memory_space<vmem>>, vector<1x8x4xf32>
    %186 = vector.shape_cast %185 : vector<1x8x4xf32> to vector<8x4xf32>
    %187 = vector.shape_cast %184 : vector<8x4xf32> to vector<1x8x4xf32>
    tpu.vector_store %arg4[%c0_174, %c0_175, %c40], %187 {strides = array<i32>} : memref<1x8x128xf32, #tpu.memory_space<vmem>>, vector<1x8x4xf32>,
    %188 = vector.extract_strided_slice %143 {offsets = [88, 0], sizes = [8, 4], strides = [1, 1]} : vector<256x4xf32> to vector<8x4xf32>
    %c0_176 = arith.constant 0 : index
    %c0_177 = arith.constant 0 : index
    %c44 = arith.constant 44 : index
    %189 = vector.load %arg4[%c0_176, %c0_177, %c44] : memref<1x8x128xf32, #tpu.memory_space<vmem>>, vector<1x8x4xf32>
    %190 = vector.shape_cast %189 : vector<1x8x4xf32> to vector<8x4xf32>
    %191 = vector.shape_cast %188 : vector<8x4xf32> to vector<1x8x4xf32>
    tpu.vector_store %arg4[%c0_176, %c0_177, %c44], %191 {strides = array<i32>} : memref<1x8x128xf32, #tpu.memory_space<vmem>>, vector<1x8x4xf32>,
    %192 = vector.extract_strided_slice %143 {offsets = [96, 0], sizes = [8, 4], strides = [1, 1]} : vector<256x4xf32> to vector<8x4xf32>
    %c0_178 = arith.constant 0 : index
    %c0_179 = arith.constant 0 : index
    %c48 = arith.constant 48 : index
    %193 = vector.load %arg4[%c0_178, %c0_179, %c48] : memref<1x8x128xf32, #tpu.memory_space<vmem>>, vector<1x8x4xf32>
    %194 = vector.shape_cast %193 : vector<1x8x4xf32> to vector<8x4xf32>
    %195 = vector.shape_cast %192 : vector<8x4xf32> to vector<1x8x4xf32>
    tpu.vector_store %arg4[%c0_178, %c0_179, %c48], %195 {strides = array<i32>} : memref<1x8x128xf32, #tpu.memory_space<vmem>>, vector<1x8x4xf32>,
    %196 = vector.extract_strided_slice %143 {offsets = [104, 0], sizes = [8, 4], strides = [1, 1]} : vector<256x4xf32> to vector<8x4xf32>
    %c0_180 = arith.constant 0 : index
    %c0_181 = arith.constant 0 : index
    %c52 = arith.constant 52 : index
    %197 = vector.load %arg4[%c0_180, %c0_181, %c52] : memref<1x8x128xf32, #tpu.memory_space<vmem>>, vector<1x8x4xf32>
    %198 = vector.shape_cast %197 : vector<1x8x4xf32> to vector<8x4xf32>
    %199 = vector.shape_cast %196 : vector<8x4xf32> to vector<1x8x4xf32>
    tpu.vector_store %arg4[%c0_180, %c0_181, %c52], %199 {strides = array<i32>} : memref<1x8x128xf32, #tpu.memory_space<vmem>>, vector<1x8x4xf32>,
    %200 = vector.extract_strided_slice %143 {offsets = [112, 0], sizes = [8, 4], strides = [1, 1]} : vector<256x4xf32> to vector<8x4xf32>
    %c0_182 = arith.constant 0 : index
    %c0_183 = arith.constant 0 : index
    %c56 = arith.constant 56 : index
    %201 = vector.load %arg4[%c0_182, %c0_183, %c56] : memref<1x8x128xf32, #tpu.memory_space<vmem>>, vector<1x8x4xf32>
    %202 = vector.shape_cast %201 : vector<1x8x4xf32> to vector<8x4xf32>
    %203 = vector.shape_cast %200 : vector<8x4xf32> to vector<1x8x4xf32>
    tpu.vector_store %arg4[%c0_182, %c0_183, %c56], %203 {strides = array<i32>} : memref<1x8x128xf32, #tpu.memory_space<vmem>>, vector<1x8x4xf32>,
    %204 = vector.extract_strided_slice %143 {offsets = [120, 0], sizes = [8, 4], strides = [1, 1]} : vector<256x4xf32> to vector<8x4xf32>
    %c0_184 = arith.constant 0 : index
    %c0_185 = arith.constant 0 : index
    %c60 = arith.constant 60 : index
    %205 = vector.load %arg4[%c0_184, %c0_185, %c60] : memref<1x8x128xf32, #tpu.memory_space<vmem>>, vector<1x8x4xf32>
    %206 = vector.shape_cast %205 : vector<1x8x4xf32> to vector<8x4xf32>
    %207 = vector.shape_cast %204 : vector<8x4xf32> to vector<1x8x4xf32>
    tpu.vector_store %arg4[%c0_184, %c0_185, %c60], %207 {strides = array<i32>} : memref<1x8x128xf32, #tpu.memory_space<vmem>>, vector<1x8x4xf32>,
    %208 = vector.extract_strided_slice %143 {offsets = [128, 0], sizes = [8, 4], strides = [1, 1]} : vector<256x4xf32> to vector<8x4xf32>
    %c0_186 = arith.constant 0 : index
    %c0_187 = arith.constant 0 : index
    %c64 = arith.constant 64 : index
    %209 = vector.load %arg4[%c0_186, %c0_187, %c64] : memref<1x8x128xf32, #tpu.memory_space<vmem>>, vector<1x8x4xf32>
    %210 = vector.shape_cast %209 : vector<1x8x4xf32> to vector<8x4xf32>
    %211 = vector.shape_cast %208 : vector<8x4xf32> to vector<1x8x4xf32>
    tpu.vector_store %arg4[%c0_186, %c0_187, %c64], %211 {strides = array<i32>} : memref<1x8x128xf32, #tpu.memory_space<vmem>>, vector<1x8x4xf32>,
    %212 = vector.extract_strided_slice %143 {offsets = [136, 0], sizes = [8, 4], strides = [1, 1]} : vector<256x4xf32> to vector<8x4xf32>
    %c0_188 = arith.constant 0 : index
    %c0_189 = arith.constant 0 : index
    %c68 = arith.constant 68 : index
    %213 = vector.load %arg4[%c0_188, %c0_189, %c68] : memref<1x8x128xf32, #tpu.memory_space<vmem>>, vector<1x8x4xf32>
    %214 = vector.shape_cast %213 : vector<1x8x4xf32> to vector<8x4xf32>
    %215 = vector.shape_cast %212 : vector<8x4xf32> to vector<1x8x4xf32>
    tpu.vector_store %arg4[%c0_188, %c0_189, %c68], %215 {strides = array<i32>} : memref<1x8x128xf32, #tpu.memory_space<vmem>>, vector<1x8x4xf32>,
    %216 = vector.extract_strided_slice %143 {offsets = [144, 0], sizes = [8, 4], strides = [1, 1]} : vector<256x4xf32> to vector<8x4xf32>
    %c0_190 = arith.constant 0 : index
    %c0_191 = arith.constant 0 : index
    %c72 = arith.constant 72 : index
    %217 = vector.load %arg4[%c0_190, %c0_191, %c72] : memref<1x8x128xf32, #tpu.memory_space<vmem>>, vector<1x8x4xf32>
    %218 = vector.shape_cast %217 : vector<1x8x4xf32> to vector<8x4xf32>
    %219 = vector.shape_cast %216 : vector<8x4xf32> to vector<1x8x4xf32>
    tpu.vector_store %arg4[%c0_190, %c0_191, %c72], %219 {strides = array<i32>} : memref<1x8x128xf32, #tpu.memory_space<vmem>>, vector<1x8x4xf32>,
    %220 = vector.extract_strided_slice %143 {offsets = [152, 0], sizes = [8, 4], strides = [1, 1]} : vector<256x4xf32> to vector<8x4xf32>
    %c0_192 = arith.constant 0 : index
    %c0_193 = arith.constant 0 : index
    %c76 = arith.constant 76 : index
    %221 = vector.load %arg4[%c0_192, %c0_193, %c76] : memref<1x8x128xf32, #tpu.memory_space<vmem>>, vector<1x8x4xf32>
    %222 = vector.shape_cast %221 : vector<1x8x4xf32> to vector<8x4xf32>
    %223 = vector.shape_cast %220 : vector<8x4xf32> to vector<1x8x4xf32>
    tpu.vector_store %arg4[%c0_192, %c0_193, %c76], %223 {strides = array<i32>} : memref<1x8x128xf32, #tpu.memory_space<vmem>>, vector<1x8x4xf32>,
    %224 = vector.extract_strided_slice %143 {offsets = [160, 0], sizes = [8, 4], strides = [1, 1]} : vector<256x4xf32> to vector<8x4xf32>
    %c0_194 = arith.constant 0 : index
    %c0_195 = arith.constant 0 : index
    %c80 = arith.constant 80 : index
    %225 = vector.load %arg4[%c0_194, %c0_195, %c80] : memref<1x8x128xf32, #tpu.memory_space<vmem>>, vector<1x8x4xf32>
    %226 = vector.shape_cast %225 : vector<1x8x4xf32> to vector<8x4xf32>
    %227 = vector.shape_cast %224 : vector<8x4xf32> to vector<1x8x4xf32>
    tpu.vector_store %arg4[%c0_194, %c0_195, %c80], %227 {strides = array<i32>} : memref<1x8x128xf32, #tpu.memory_space<vmem>>, vector<1x8x4xf32>,
    %228 = vector.extract_strided_slice %143 {offsets = [168, 0], sizes = [8, 4], strides = [1, 1]} : vector<256x4xf32> to vector<8x4xf32>
    %c0_196 = arith.constant 0 : index
    %c0_197 = arith.constant 0 : index
    %c84 = arith.constant 84 : index
    %229 = vector.load %arg4[%c0_196, %c0_197, %c84] : memref<1x8x128xf32, #tpu.memory_space<vmem>>, vector<1x8x4xf32>
    %230 = vector.shape_cast %229 : vector<1x8x4xf32> to vector<8x4xf32>
    %231 = vector.shape_cast %228 : vector<8x4xf32> to vector<1x8x4xf32>
    tpu.vector_store %arg4[%c0_196, %c0_197, %c84], %231 {strides = array<i32>} : memref<1x8x128xf32, #tpu.memory_space<vmem>>, vector<1x8x4xf32>,
    %232 = vector.extract_strided_slice %143 {offsets = [176, 0], sizes = [8, 4], strides = [1, 1]} : vector<256x4xf32> to vector<8x4xf32>
    %c0_198 = arith.constant 0 : index
    %c0_199 = arith.constant 0 : index
    %c88 = arith.constant 88 : index
    %233 = vector.load %arg4[%c0_198, %c0_199, %c88] : memref<1x8x128xf32, #tpu.memory_space<vmem>>, vector<1x8x4xf32>
    %234 = vector.shape_cast %233 : vector<1x8x4xf32> to vector<8x4xf32>
    %235 = vector.shape_cast %232 : vector<8x4xf32> to vector<1x8x4xf32>
    tpu.vector_store %arg4[%c0_198, %c0_199, %c88], %235 {strides = array<i32>} : memref<1x8x128xf32, #tpu.memory_space<vmem>>, vector<1x8x4xf32>,
    %236 = vector.extract_strided_slice %143 {offsets = [184, 0], sizes = [8, 4], strides = [1, 1]} : vector<256x4xf32> to vector<8x4xf32>
    %c0_200 = arith.constant 0 : index
    %c0_201 = arith.constant 0 : index
    %c92 = arith.constant 92 : index
    %237 = vector.load %arg4[%c0_200, %c0_201, %c92] : memref<1x8x128xf32, #tpu.memory_space<vmem>>, vector<1x8x4xf32>
    %238 = vector.shape_cast %237 : vector<1x8x4xf32> to vector<8x4xf32>
    %239 = vector.shape_cast %236 : vector<8x4xf32> to vector<1x8x4xf32>
    tpu.vector_store %arg4[%c0_200, %c0_201, %c92], %239 {strides = array<i32>} : memref<1x8x128xf32, #tpu.memory_space<vmem>>, vector<1x8x4xf32>,
    %240 = vector.extract_strided_slice %143 {offsets = [192, 0], sizes = [8, 4], strides = [1, 1]} : vector<256x4xf32> to vector<8x4xf32>
    %c0_202 = arith.constant 0 : index
    %c0_203 = arith.constant 0 : index
    %c96 = arith.constant 96 : index
    %241 = vector.load %arg4[%c0_202, %c0_203, %c96] : memref<1x8x128xf32, #tpu.memory_space<vmem>>, vector<1x8x4xf32>
    %242 = vector.shape_cast %241 : vector<1x8x4xf32> to vector<8x4xf32>
    %243 = vector.shape_cast %240 : vector<8x4xf32> to vector<1x8x4xf32>
    tpu.vector_store %arg4[%c0_202, %c0_203, %c96], %243 {strides = array<i32>} : memref<1x8x128xf32, #tpu.memory_space<vmem>>, vector<1x8x4xf32>,
    %244 = vector.extract_strided_slice %143 {offsets = [200, 0], sizes = [8, 4], strides = [1, 1]} : vector<256x4xf32> to vector<8x4xf32>
    %c0_204 = arith.constant 0 : index
    %c0_205 = arith.constant 0 : index
    %c100 = arith.constant 100 : index
    %245 = vector.load %arg4[%c0_204, %c0_205, %c100] : memref<1x8x128xf32, #tpu.memory_space<vmem>>, vector<1x8x4xf32>
    %246 = vector.shape_cast %245 : vector<1x8x4xf32> to vector<8x4xf32>
    %247 = vector.shape_cast %244 : vector<8x4xf32> to vector<1x8x4xf32>
    tpu.vector_store %arg4[%c0_204, %c0_205, %c100], %247 {strides = array<i32>} : memref<1x8x128xf32, #tpu.memory_space<vmem>>, vector<1x8x4xf32>,
    %248 = vector.extract_strided_slice %143 {offsets = [208, 0], sizes = [8, 4], strides = [1, 1]} : vector<256x4xf32> to vector<8x4xf32>
    %c0_206 = arith.constant 0 : index
    %c0_207 = arith.constant 0 : index
    %c104 = arith.constant 104 : index
    %249 = vector.load %arg4[%c0_206, %c0_207, %c104] : memref<1x8x128xf32, #tpu.memory_space<vmem>>, vector<1x8x4xf32>
    %250 = vector.shape_cast %249 : vector<1x8x4xf32> to vector<8x4xf32>
    %251 = vector.shape_cast %248 : vector<8x4xf32> to vector<1x8x4xf32>
    tpu.vector_store %arg4[%c0_206, %c0_207, %c104], %251 {strides = array<i32>} : memref<1x8x128xf32, #tpu.memory_space<vmem>>, vector<1x8x4xf32>,
    %252 = vector.extract_strided_slice %143 {offsets = [216, 0], sizes = [8, 4], strides = [1, 1]} : vector<256x4xf32> to vector<8x4xf32>
    %c0_208 = arith.constant 0 : index
    %c0_209 = arith.constant 0 : index
    %c108 = arith.constant 108 : index
    %253 = vector.load %arg4[%c0_208, %c0_209, %c108] : memref<1x8x128xf32, #tpu.memory_space<vmem>>, vector<1x8x4xf32>
    %254 = vector.shape_cast %253 : vector<1x8x4xf32> to vector<8x4xf32>
    %255 = vector.shape_cast %252 : vector<8x4xf32> to vector<1x8x4xf32>
    tpu.vector_store %arg4[%c0_208, %c0_209, %c108], %255 {strides = array<i32>} : memref<1x8x128xf32, #tpu.memory_space<vmem>>, vector<1x8x4xf32>,
    %256 = vector.extract_strided_slice %143 {offsets = [224, 0], sizes = [8, 4], strides = [1, 1]} : vector<256x4xf32> to vector<8x4xf32>
    %c0_210 = arith.constant 0 : index
    %c0_211 = arith.constant 0 : index
    %c112 = arith.constant 112 : index
    %257 = vector.load %arg4[%c0_210, %c0_211, %c112] : memref<1x8x128xf32, #tpu.memory_space<vmem>>, vector<1x8x4xf32>
    %258 = vector.shape_cast %257 : vector<1x8x4xf32> to vector<8x4xf32>
    %259 = vector.shape_cast %256 : vector<8x4xf32> to vector<1x8x4xf32>
    tpu.vector_store %arg4[%c0_210, %c0_211, %c112], %259 {strides = array<i32>} : memref<1x8x128xf32, #tpu.memory_space<vmem>>, vector<1x8x4xf32>,
    %260 = vector.extract_strided_slice %143 {offsets = [232, 0], sizes = [8, 4], strides = [1, 1]} : vector<256x4xf32> to vector<8x4xf32>
    %c0_212 = arith.constant 0 : index
    %c0_213 = arith.constant 0 : index
    %c116 = arith.constant 116 : index
    %261 = vector.load %arg4[%c0_212, %c0_213, %c116] : memref<1x8x128xf32, #tpu.memory_space<vmem>>, vector<1x8x4xf32>
    %262 = vector.shape_cast %261 : vector<1x8x4xf32> to vector<8x4xf32>
    %263 = vector.shape_cast %260 : vector<8x4xf32> to vector<1x8x4xf32>
    tpu.vector_store %arg4[%c0_212, %c0_213, %c116], %263 {strides = array<i32>} : memref<1x8x128xf32, #tpu.memory_space<vmem>>, vector<1x8x4xf32>,
    %264 = vector.extract_strided_slice %143 {offsets = [240, 0], sizes = [8, 4], strides = [1, 1]} : vector<256x4xf32> to vector<8x4xf32>
    %c0_214 = arith.constant 0 : index
    %c0_215 = arith.constant 0 : index
    %c120 = arith.constant 120 : index
    %265 = vector.load %arg4[%c0_214, %c0_215, %c120] : memref<1x8x128xf32, #tpu.memory_space<vmem>>, vector<1x8x4xf32>
    %266 = vector.shape_cast %265 : vector<1x8x4xf32> to vector<8x4xf32>
    %267 = vector.shape_cast %264 : vector<8x4xf32> to vector<1x8x4xf32>
    tpu.vector_store %arg4[%c0_214, %c0_215, %c120], %267 {strides = array<i32>} : memref<1x8x128xf32, #tpu.memory_space<vmem>>, vector<1x8x4xf32>,
    %268 = vector.extract_strided_slice %143 {offsets = [248, 0], sizes = [8, 4], strides = [1, 1]} : vector<256x4xf32> to vector<8x4xf32>
    %c0_216 = arith.constant 0 : index
    %c0_217 = arith.constant 0 : index
    %c124 = arith.constant 124 : index
    %269 = vector.load %arg4[%c0_216, %c0_217, %c124] : memref<1x8x128xf32, #tpu.memory_space<vmem>>, vector<1x8x4xf32>
    %270 = vector.shape_cast %269 : vector<1x8x4xf32> to vector<8x4xf32>
    %271 = vector.shape_cast %268 : vector<8x4xf32> to vector<1x8x4xf32>
    tpu.vector_store %arg4[%c0_216, %c0_217, %c124], %271 {strides = array<i32>} : memref<1x8x128xf32, #tpu.memory_space<vmem>>, vector<1x8x4xf32>,
    return
  }
  func.func @transform_0(%arg0: i32) -> (i32, i32, i32, i32) {
    %c0_i32 = arith.constant 0 : i32
    %c0_i32_0 = arith.constant 0 : i32
    %c0_i32_1 = arith.constant 0 : i32
    %c0_i32_2 = arith.constant 0 : i32
    return %arg0, %c0_i32, %c0_i32_0, %c0_i32_1 : i32, i32, i32, i32
  }
  func.func @transform_1(%arg0: i32) -> (i32, i32) {
    %c0_i32 = arith.constant 0 : i32
    %c0_i32_0 = arith.constant 0 : i32
    %c0_i32_1 = arith.constant 0 : i32
    return %c0_i32, %c0_i32_0 : i32, i32
  }
  func.func @transform_2(%arg0: i32) -> (i32, i32) {
    %c0_i32 = arith.constant 0 : i32
    %c0_i32_0 = arith.constant 0 : i32
    %c0_i32_1 = arith.constant 0 : i32
    return %c0_i32, %c0_i32_0 : i32, i32
  }
  func.func @transform_3(%arg0: i32) -> (i32, i32, i32) {
    %c0_i32 = arith.constant 0 : i32
    %c0_i32_0 = arith.constant 0 : i32
    %c0_i32_1 = arith.constant 0 : i32
    return %arg0, %c0_i32, %c0_i32_0 : i32, i32, i32
  }
}

</mosaic_0001>

<bundles_post_ra>
// kernel: resnet_block.1
= control target key start
LH: loop header
LB: loop body
LE: loop exit
PB: predicated region body
PF: predicated region fallthrough
CT: control target
= control target key end

     0   :  { %s4267_s12 = smov 0   ;;  %s6225_s0 = inlined_call_operand.vmem [shape: bf16[2,16,16,4], index: 0, kind: input, shape index: {}]   ;;  %s6226_s1 = inlined_call_operand.vmem [shape: bf16[36,4], index: 1, kind: input, shape index: {}]   ;;  %s6227_s2 = inlined_call_operand.vmem [shape: bf16[36,4], index: 2, kind: input, shape index: {}]   ;;  %s6228_s3 = inlined_call_operand.vmem [shape: f32[2,8,128], index: 3, kind: output, shape index: {}]  }
   0x1 LB: > { %s3915_s13 = sadd.s32 4294967295, %s4214_s12   ;;  %p3919_p0 = scmp.ge.s32.totalorder %s4214_s12, 1  ;;  %s4214_s12 = sphi %s4267_s12, %s13_s12  }
   0x2   : > { %p137_p1 = scmp.lt.s32.totalorder %s4214_s12, 3 }
   0x4   : > { %p138_p2 = pnand %p3919_p0, %p137_p1 }
   0x6   : > { %141 = sbr.rel (%p138_p2) target bundleno = 1497 (0x5d9), region = 32 }
   0xd   : > { %p160_p3 = scmp.lt.s32.totalorder %s3915_s13, 1  ;;  %vm235_vm0 = vcmask 31744   ;;  %vm291_vm1 = vcmask 24576   ;;  %s4216_s18 = smov 4   ;;  %vm1528_vm2 = vcmask 1041408   ;;  %vm522_vm3 = vcmask 64544  }
   0xe   : > { %s4217_s19 = smov 16   ;;  %s4218_s20 = smov 28   ;;  %vm651_vm4 = vcmask 97344   ;;  %vm780_vm5 = vcmask 130144   ;;  %vm909_vm6 = vcmask 162944   ;;  %vm1038_vm7 = vcmask 195744  }
   0xf   : > { %s6320_s13 = smov (!%p160_p3, %s3915_s13), 1  ;;  %s4219_s21 = smov 8   ;;  %vm1168_vm8 = vcmask 228544   ;;  %vm1297_vm9 = vcmask 261344   ;;  %vm1426_vm10 = vcmask 294144   ;;  %vm1479_vm11 = vcmask 293888  }
  0x10   : > { %s3963_s14 = sshll.u32 %s6320_s13, 7  ;;  %s4220_s22 = smov 12   ;;  %vm3728_vm12 = vcmask 326944   ;;  %vm3734_vm13 = vcmask 359744   ;;  %vm3740_vm14 = vcmask 392544   ;;  %vm3746_vm15 = vcmask 425344  }
  0x11   : > { %s4281_s17 = scalar_lea.vmem %s6225_s0, %s3963_s14  ;;  %s4221_s23 = smov 20  }
  0x12   : > { %v4028_v0 = vld [vmem:[%s4281_s17 + $0x8] sm:$0xff]   ;;  %v4285_v1 = vld [vmem:[%s4281_s17 + $0x10] sm:$0xff]   ;;  %v4288_v2 = vld [vmem:[%s4281_s17] sm:$0xff]   ;;  %s4222_s26 = smov 24   ;;  %s4223_s4 = smov 32  }
  0x13   : > { %v4290_v3 = vunpack.c.l.bf16 %v4028_v0  ;;  %v4292_v4 = vunpack.c.h.bf16 %v4028_v0  ;;  %v6255_v5 = vunpack.c.l.bf16 %v4285_v1  ;;  %v6253_v6 = vunpack.c.h.bf16 %v4285_v1  ;;  %v4297_v7 = vld [vmem:[%s4281_s17 + $0x18] sm:$0xff]   ;;  %v4300_v8 = vld [vmem:[%s4281_s17 + $0x20] sm:$0xff]   ;;  %v4303_v9 = vld [vmem:[%s4281_s17 + $0x28] sm:$0xff]   ;;  %s3922_s11 = sshll.u32 %s6320_s13, 3  ;;  %s4224_s16 = smov 40  }
  0x14   : > { %v6250_v10 = vunpack.c.l.bf16 %v4288_v2  ;;  %v6256_v11 = vunpack.c.h.bf16 %v4288_v2  ;;  %v6254_v12 = vunpack.c.l.bf16 %v4297_v7  ;;  %v6251_v13 = vunpack.c.h.bf16 %v4297_v7  ;;  %v4310_v14 = vld [vmem:[%s4281_s17 + $0x30] sm:$0xff]   ;;  %v4313_v15 = vld [vmem:[%s4281_s17 + $0x38] sm:$0xff]   ;;  %v4316_v16 = vld [vmem:[%s4281_s17 + $0x40] sm:$0xff]   ;;  %s6126_s15 = scalar_lea.vmem %s6228_s3, %s3922_s11  ;;  %s4232_s24 = smov 72  }
  0x15   : > { %6273 = vst [vmem:[#allocation4_spill] sm:$0xff] %v4316_v16  ;;  %268 = vst.msk [vmem:[#allocation2 + $0x1] sm:$0xff] %vm235_vm0, %v4290_v3  ;;  %v6252_v17 = vunpack.c.l.bf16 %v4300_v8  ;;  %v6248_v18 = vunpack.c.h.bf16 %v4300_v8  ;;  %v6249_v19 = vunpack.c.l.bf16 %v4303_v9  ;;  %v6246_v20 = vunpack.c.h.bf16 %v4303_v9  ;;  %v4337_v21 = vld [vmem:[%s4281_s17 + $0x48] sm:$0xff]   ;;  %s4233_s25 = smov 68   ;;  %s4235_s27 = smov 76  }
  0x16   : > { %269 = vst.msk [vmem:[#allocation2 + $0x9] sm:$0xff] %vm235_vm0, %v4292_v4  ;;  %238 = vst.msk [vmem:[#allocation2 + $0x31] sm:$0xff] %vm235_vm0, %v4290_v3  ;;  %v6247_v22 = vunpack.c.l.bf16 %v4310_v14  ;;  %v6244_v23 = vunpack.c.h.bf16 %v4310_v14  ;;  %v6245_v24 = vunpack.c.l.bf16 %v4313_v15  ;;  %v6242_v25 = vunpack.c.h.bf16 %v4313_v15  ;;  %s4236_s28 = smov 88   ;;  %s4237_s29 = smov 84  }
  0x17   : > { %239 = vst.msk [vmem:[#allocation2 + $0x39] sm:$0xff] %vm235_vm0, %v4292_v4  ;;  %240 = vst.msk [vmem:[#allocation2 + $0x49] sm:$0xff] %vm235_vm0, %v6255_v5  ;;  %v6243_v26 = vunpack.c.l.bf16 %v4316_v16  ;;  %v6240_v27 = vunpack.c.h.bf16 %v4316_v16  ;;  %v6241_v28 = vunpack.c.l.bf16 %v4337_v21  ;;  %v6238_v40 = vunpack.c.h.bf16 %v4337_v21  ;;  %s4238_s30 = smov 96   ;;  %s4240_s5 = smov 104  }
  0x18   : > { %241 = vst.msk [vmem:[#allocation2 + $0x51] sm:$0xff] %vm235_vm0, %v6253_v6  ;;  %6274 = vst [vmem:[#allocation5_spill] sm:$0xff] %v4337_v21  ;;  %s4241_s6 = smov 100   ;;  %s4242_s7 = smov 112  }
  0x19   : > { %236 = vst.msk [vmem:[#allocation2 + $0x19] sm:$0xff] %vm235_vm0, %v6250_v10  ;;  %237 = vst.msk [vmem:[#allocation2 + $0x21] sm:$0xff] %vm235_vm0, %v6256_v11  ;;  %s4243_s8 = smov 108   ;;  %s4244_s9 = smov 120  }
  0x1a   : > { %242 = vst.msk [vmem:[#allocation2 + $0x61] sm:$0xff] %vm235_vm0, %v6254_v12  ;;  %243 = vst.msk [vmem:[#allocation2 + $0x69] sm:$0xff] %vm235_vm0, %v6251_v13  ;;  %s4245_s10 = smov 116   ;;  %s4246_s11 = smov 124  }
  0x1b   : > { %244 = vst.msk [vmem:[#allocation2 + $0x79] sm:$0xff] %vm235_vm0, %v6252_v17  ;;  %245 = vst.msk [vmem:[#allocation2 + $0x81] sm:$0xff] %vm235_vm0, %v6248_v18 }
  0x1c   : > { %246 = vst.msk [vmem:[#allocation2 + $0x91] sm:$0xff] %vm235_vm0, %v6249_v19  ;;  %247 = vst.msk [vmem:[#allocation2 + $0x99] sm:$0xff] %vm235_vm0, %v6246_v20  ;;  %v410_v29 = vld [vmem:[#allocation2 + $0x1] sm:$0xff] }
  0x1d   : > { %248 = vst.msk [vmem:[#allocation2 + $0xa9] sm:$0xff] %vm235_vm0, %v6247_v22  ;;  %249 = vst.msk [vmem:[#allocation2 + $0xb1] sm:$0xff] %vm235_vm0, %v6244_v23  ;;  %v411_v30 = vld [vmem:[#allocation2 + $0x9] sm:$0xff]  ;;  %v799_v31 = vld [vmem:[#allocation2 + $0x31] sm:$0xff] }
  0x1e   : > { %250 = vst.msk [vmem:[#allocation2 + $0xc1] sm:$0xff] %vm235_vm0, %v6245_v24  ;;  %251 = vst.msk [vmem:[#allocation2 + $0xc9] sm:$0xff] %vm235_vm0, %v6242_v25  ;;  %v442_v32 = vpack.c.bf16 %v411_v30, %v410_v29  ;;  %v800_v33 = vld [vmem:[#allocation2 + $0x39] sm:$0xff]  ;;  %v1187_v34 = vld [vmem:[#allocation2 + $0x49] sm:$0xff] }
  0x1f   : > { %252 = vst.msk [vmem:[#allocation2 + $0xd9] sm:$0xff] %vm235_vm0, %v6243_v26  ;;  %253 = vst.msk [vmem:[#allocation2 + $0xe1] sm:$0xff] %vm235_vm0, %v6240_v27  ;;  %v1188_v35 = vld [vmem:[#allocation2 + $0x51] sm:$0xff]  ;;  %v4391_v36 = vpack.c.bf16 %v800_v33, %v799_v31  ;;  %v310_v39 = vld [vmem:[#allocation2 + $0xf] sm:$0x1] }
  0x20   : > { %254 = vst.msk [vmem:[#allocation2 + $0xf1] sm:$0xff] %vm235_vm0, %v6241_v28  ;;  %v412_v37 = vld [vmem:[#allocation2 + $0x19] sm:$0xff]  ;;  %v413_v38 = vld [vmem:[#allocation2 + $0x21] sm:$0xff]  ;;  %474 = vrot.lane.b32.xlu0 %v442_v32, %s4216_s18  ;;  %v4398_v43 = vpack.c.bf16 %v1188_v35, %v1187_v34  ;;  %v275_v44 = vld [vmem:[#allocation2 + $0x32] sm:$0x1] }
  0x21   : > { %v443_v41 = vpack.c.bf16 %v413_v38, %v412_v37  ;;  %328 = vst.msk [vmem:[#allocation2 + $0x11] sm:$0x1] %vm291_vm1, %v310_v39  ;;  %v311_v42 = vld [vmem:[#allocation2 + $0x27] sm:$0x1]  ;;  %863 = vrot.lane.b32.xlu1 %v4391_v36, %s4217_s19  ;;  %v274_v45 = vld [vmem:[#allocation2 + $0x1a] sm:$0x1] }
  0x22   : > { %329 = vst.msk [vmem:[#allocation2 + $0x29] sm:$0x1] %vm291_vm1, %v311_v42  ;;  %294 = vst.msk [vmem:[#allocation2 + $0x30] sm:$0x1] %vm291_vm1, %v275_v44  ;;  %v312_v46 = vld [vmem:[#allocation2 + $0x3f] sm:$0x1] }
  0x23   : > { %255 = vst.msk [vmem:[#allocation2 + $0xf9] sm:$0xff] %vm235_vm0, %v6238_v40  ;;  %v276_v47 = vld [vmem:[#allocation2 + $0x4a] sm:$0x1]  ;;  %v313_v48 = vld [vmem:[#allocation2 + $0x57] sm:$0x1]  ;;  %v539_v50 = vld [vmem:[#allocation2 + $0x2] sm:$0xff] }
  0x24   : > { %293 = vst.msk [vmem:[#allocation2 + $0x18] sm:$0x1] %vm291_vm1, %v274_v45  ;;  %330 = vst.msk [vmem:[#allocation2 + $0x41] sm:$0x1] %vm291_vm1, %v312_v46  ;;  %476 = vrot.lane.b32.xlu0 %v443_v41, %s4216_s18  ;;  %v277_v49 = vld [vmem:[#allocation2 + $0x62] sm:$0x1] }
  0x25   : > { %295 = vst.msk [vmem:[#allocation2 + $0x48] sm:$0x1] %vm291_vm1, %v276_v47  ;;  %331 = vst.msk [vmem:[#allocation2 + $0x59] sm:$0x1] %vm291_vm1, %v313_v48  ;;  %1251 = vrot.lane.b32.xlu1 %v4398_v43, %s4218_s20  ;;  %v314_v51 = vld [vmem:[#allocation2 + $0x6f] sm:$0x1] }
  0x26   : > { %296 = vst.msk [vmem:[#allocation2 + $0x60] sm:$0x1] %vm291_vm1, %v277_v49  ;;  %v541_v52 = vld [vmem:[#allocation2 + $0x1a] sm:$0xff]  ;;  %332 = vst.msk [vmem:[#allocation2 + $0x71] sm:$0x1] %vm291_vm1, %v314_v51  ;;  %v1059_v59 = vld [vmem:[#allocation2 + $0x50] sm:$0xff] }
  0x27   : > { %v278_v53 = vld [vmem:[#allocation2 + $0x7a] sm:$0x1]  ;;  %v669_v56 = vld [vmem:[#allocation2 + $0x20] sm:$0xff]  ;;  %v279_v63 = vld [vmem:[#allocation2 + $0x92] sm:$0x1] }
  0x28   : > { %v540_v54 = vld [vmem:[#allocation2 + $0xa] sm:$0xff]  ;;  %v671_v55 = vld [vmem:[#allocation2 + $0x38] sm:$0xff]  ;;  %297 = vst.msk [vmem:[#allocation2 + $0x78] sm:$0x1] %vm291_vm1, %v278_v53  ;;  %861 = vrot.lane.b32.xlu0 %v443_v41, %s4217_s19  ;;  %v315_v60 = vld [vmem:[#allocation2 + $0x87] sm:$0x1] }
  0x29   : > { %v571_v57 = vpack.c.bf16 %v540_v54, %v539_v50  ;;  %v542_v58 = vld [vmem:[#allocation2 + $0x22] sm:$0xff]  ;;  %v670_v61 = vld [vmem:[#allocation2 + $0x30] sm:$0xff]  ;;  %333 = vst.msk [vmem:[#allocation2 + $0x89] sm:$0x1] %vm291_vm1, %v315_v60  ;;  %298 = vst.msk [vmem:[#allocation2 + $0x90] sm:$0x1] %vm291_vm1, %v279_v63 }
  0x2a   : > { %v572_v0 = vpack.c.bf16 %v542_v58, %v541_v52  ;;  %v701_v29 = vpack.c.bf16 %v671_v55, %v670_v61  ;;  %v675_v31 = vld [vmem:[#allocation2 + $0x68] sm:$0xff]  ;;  %v1063_v35 = vld [vmem:[#allocation2 + $0x80] sm:$0xff]  ;;  %v316_v37 = vld [vmem:[#allocation2 + $0x9f] sm:$0x1] }
  0x2b   : > { %v668_v62 = vld [vmem:[#allocation2 + $0x18] sm:$0xff]  ;;  %603 = vrot.lane.b32.xlu1 %v571_v57, %s4219_s21  ;;  %334 = vst.msk [vmem:[#allocation2 + $0xa1] sm:$0x1] %vm291_vm1, %v316_v37  ;;  %v280_v39 = vld [vmem:[#allocation2 + $0xaa] sm:$0x1]  ;;  %v1067_v54 = vld [vmem:[#allocation2 + $0xb0] sm:$0xff] }
  0x2c   : > { %v700_v30 = vpack.c.bf16 %v669_v56, %v668_v62  ;;  %v1058_v32 = vld [vmem:[#allocation2 + $0x48] sm:$0xff]  ;;  %1249 = vrot.lane.b32.xlu0 %v4391_v36, %s4218_s20  ;;  %396 = vst.msk [vmem:[#allocation3 + $0x10] sm:$0xff] %vm235_vm0, %v701_v29  ;;  %v928_v41 = vld [vmem:[#allocation2 + $0x32] sm:$0xff]  ;;  %v929_v42 = vld [vmem:[#allocation2 + $0x3a] sm:$0xff] }
  0x2d   : > { %v4421_v33 = vpack.c.bf16 %v1059_v59, %v1058_v32  ;;  %v674_v34 = vld [vmem:[#allocation2 + $0x60] sm:$0xff]  ;;  %299 = vst.msk [vmem:[#allocation2 + $0xa8] sm:$0x1] %vm291_vm1, %v280_v39  ;;  %v679_v46 = vld [vmem:[#allocation2 + $0x98] sm:$0xff]  ;;  %v317_v47 = vld [vmem:[#allocation2 + $0xb7] sm:$0x1]  ;;  %v4442_v51 = vpack.c.bf16 %v929_v42, %v928_v41 }
  0x2e   : > { %395 = vst.msk [vmem:[#allocation3 + $0x8] sm:$0xff] %vm235_vm0, %v700_v30  ;;  %v4425_v38 = vpack.c.bf16 %v675_v31, %v674_v34  ;;  %v281_v48 = vld [vmem:[#allocation2 + $0xc2] sm:$0x1]  ;;  %v318_v50 = vld [vmem:[#allocation2 + $0xcf] sm:$0x1]  ;;  %v4469_v31 = vld [vmem:[%s4281_s17 + $0x50] sm:$0xff]  }
  0x2f   : > { %605 = vrot.lane.b32.xlu1 %v572_v0, %s4219_s21  ;;  %v1062_v44 = vld [vmem:[#allocation2 + $0x78] sm:$0xff]  ;;  %397 = vst.msk [vmem:[#allocation3 + $0x18] sm:$0xff] %vm235_vm0, %v4421_v33  ;;  %v273_v53 = vld [vmem:[#allocation2 + $0x2] sm:$0x1]  ;;  %v319_v56 = vld [vmem:[#allocation2 + $0xe7] sm:$0x1]  ;;  %v6239_v32 = vunpack.c.l.bf16 %v4469_v31  ;;  %v6236_v34 = vunpack.c.h.bf16 %v4469_v31 }
  0x30   : > { %v4432_v45 = vpack.c.bf16 %v1063_v35, %v1062_v44  ;;  %398 = vst.msk [vmem:[#allocation3 + $0x20] sm:$0xff] %vm235_vm0, %v4425_v38  ;;  %732 = vrot.lane.b32.xlu0 %v700_v30, %s4220_s22  ;;  %v678_v49 = vld [vmem:[#allocation2 + $0x90] sm:$0xff]  ;;  %v282_v55 = vld [vmem:[#allocation2 + $0xda] sm:$0x1]  ;;  %v4198_v60 = vld [vmem:[%s6226_s1] sm:$0xff]  }
  0x31   : > { %335 = vst.msk [vmem:[#allocation2 + $0xb9] sm:$0x1] %vm291_vm1, %v317_v47  ;;  %300 = vst.msk [vmem:[#allocation2 + $0xc0] sm:$0x1] %vm291_vm1, %v281_v48  ;;  %v4444_v52 = vpack.c.bf16 %v679_v46, %v678_v49  ;;  %v283_v58 = vld [vmem:[#allocation2 + $0xf2] sm:$0x1]  ;;  %4081 = vmatprep.subr.bf16.mxu0 %v4198_v60 }
  0x32   : > { %399 = vst.msk [vmem:[#allocation3 + $0x28] sm:$0xff] %vm235_vm0, %v4432_v45  ;;  %v347_v61 = vld [vmem:[#allocation2 + $0x8] sm:$0xff]  ;;  %v320_v62 = vld [vmem:[#allocation2 + $0xff] sm:$0x1]  ;;  %v1317_v30 = vld [vmem:[#allocation2 + $0x52] sm:$0xff]  ;;  %4082 = vmatpush3.bf16.msra.mxu0 %v4198_v60 }
  0x33   : > { %734 = vrot.lane.b32.xlu1 %v701_v29, %s4220_s22  ;;  %336 = vst.msk [vmem:[#allocation2 + $0xd1] sm:$0x1] %vm291_vm1, %v318_v50  ;;  %292 = vst.msk [vmem:[#allocation2] sm:$0x1] %vm291_vm1, %v273_v53  ;;  %v4199_v63 = vld [vmem:[%s6226_s1 + $0x8] sm:$0xff]   ;;  %v4476_v35 = vld [vmem:[%s4281_s17 + $0x58] sm:$0xff]  }
  0x34   : > { %990 = vrot.lane.b32.xlu0 %v572_v0, %s4221_s23  ;;  %301 = vst.msk [vmem:[#allocation2 + $0xd8] sm:$0x1] %vm291_vm1, %v282_v55  ;;  %v1066_v57 = vld [vmem:[#allocation2 + $0xa8] sm:$0xff]  ;;  %337 = vst.msk [vmem:[#allocation2 + $0xe9] sm:$0x1] %vm291_vm1, %v319_v56  ;;  %v687_v39 = vld [vmem:[#allocation2 + $0xf8] sm:$0xff]  ;;  %4083 = vmatprep.subr.bf16.mxu0 %v4199_v63  ;;  %v6237_v42 = vunpack.c.l.bf16 %v4476_v35  ;;  %v6234_v49 = vunpack.c.h.bf16 %v4476_v35 }
  0x35   : > { %400 = vst.msk [vmem:[#allocation3 + $0x30] sm:$0xff] %vm235_vm0, %v4444_v52  ;;  %v4455_v59 = vpack.c.bf16 %v1067_v54, %v1066_v57  ;;  %v1316_v0 = vld [vmem:[#allocation2 + $0x4a] sm:$0xff]  ;;  %6275 = vst [vmem:[#allocation6_spill] sm:$0xff] %v4469_v31  ;;  %v803_v56 = vld [vmem:[#allocation2 + $0x61] sm:$0xff] }
  0x36   : > { %302 = vst.msk [vmem:[#allocation2 + $0xf0] sm:$0x1] %vm291_vm1, %v283_v58  ;;  %338 = vst.msk [vmem:[#allocation2 + $0x101] sm:$0x1] %vm291_vm1, %v320_v62  ;;  %v1347_v44 = vpack.c.bf16 %v1317_v30, %v1316_v0  ;;  %4084 = vmatpush3.bf16.msra.mxu0 %v4199_v63  ;;  %v804_v57 = vld [vmem:[#allocation2 + $0x69] sm:$0xff] }
  0x37   : > { %992 = vrot.lane.b32.xlu1 %v4442_v51, %s4221_s23  ;;  %401 = vst.msk [vmem:[#allocation3 + $0x38] sm:$0xff] %vm235_vm0, %v4455_v59  ;;  %6276 = vst [vmem:[#allocation7_spill] sm:$0xff] %v4476_v35  ;;  %v4200_v41 = vld [vmem:[%s6226_s1 + $0x10] ss:$0 sps:$4 sm:$0x33]   ;;  %v832_v60 = vpack.c.bf16 %v804_v57, %v803_v56  ;;  %v4552_v56 = vld [vmem:[%s4281_s17 + $0x68] sm:$0xff]  }
  0x38   : > { %1120 = vrot.lane.b32.xlu0 %v701_v29, %s4222_s26  ;;  %256 = vst.msk [vmem:[#allocation2 + $0x109] sm:$0xff] %vm235_vm0, %v6239_v32  ;;  %257 = vst.msk [vmem:[#allocation2 + $0x111] sm:$0xff] %vm235_vm0, %v6236_v34  ;;  %4157 = vmatprep.subr.msk.bf16.mxu0 %vm1528_vm2, %v4200_v41  ;;  %v1530_v48 = vsel %vm1528_vm2, %v4200_v41, 0  ;;  %v933_v62 = vld [vmem:[#allocation2 + $0x6a] sm:$0xff]  ;;  %v6233_v57 = vunpack.c.l.bf16 %v4552_v56 }
  0x39   : > { %258 = vst.msk [vmem:[#allocation2 + $0x121] sm:$0xff] %vm235_vm0, %v6237_v42  ;;  %259 = vst.msk [vmem:[#allocation2 + $0x129] sm:$0xff] %vm235_vm0, %v6234_v49 }
  0x3a   : > { %v346_v29 = vld [vmem:[#allocation2] sm:$0xff]  ;;  %4086 = vmatpush3.bf16.msra.mxu0 %v1530_v48  ;;  %6278 = vst [vmem:[#allocation9_spill] sm:$0xff] %v4552_v56  ;;  %262 = vst.msk [vmem:[#allocation2 + $0x151] sm:$0xff] %vm235_vm0, %v6233_v57 }
  0x3b   : > { %1122 = vrot.lane.b32.xlu1 %v4421_v33, %s4222_s26  ;;  %v378_v37 = vpack.c.bf16 %v347_v61, %v346_v29  ;;  %v932_v61 = vld [vmem:[#allocation2 + $0x62] sm:$0xff] }
  0x3c   : > { %1378 = vrot.lane.b32.xlu0 %v4442_v51, %s4223_s4 }
  0x3d   : > { %394 = vst.msk [vmem:[#allocation3] sm:$0xff] %vm235_vm0, %v378_v37  ;;  %v686_v46 = vld [vmem:[#allocation2 + $0xf0] sm:$0xff] }
  0x3e   : > { %v4496_v47 = vpack.c.bf16 %v687_v39, %v686_v46  ;;  %v961_v39 = vpack.c.bf16 %v933_v62, %v932_v61  ;;  %v1192_v46 = vld [vmem:[#allocation2 + $0x81] sm:$0xff]  ;;  %v6231_v61 = vunpack.c.h.bf16 %v4552_v56 }
  0x3f   : > { %478 = vrot.lane.b32.xlu1 %v4391_v36, %s4216_s18  ;;  %v4510_v36 = vld [vmem:[%s4281_s17 + $0x60] sm:$0xff]   ;;  %v284_v50 = vld [vmem:[#allocation2 + $0x10a] sm:$0x1]  ;;  %v321_v54 = vld [vmem:[#allocation2 + $0x117] sm:$0x1] }
  0x40   : > { %1380 = vrot.lane.b32.xlu0 %v1347_v44, %s4223_s4  ;;  %404 = vst.msk [vmem:[#allocation3 + $0x50] sm:$0xff] %vm235_vm0, %v4496_v47  ;;  %6277 = vst [vmem:[#allocation8_spill] sm:$0xff] %v4510_v36  ;;  %v6235_v53 = vunpack.c.l.bf16 %v4510_v36  ;;  %v285_v55 = vld [vmem:[#allocation2 + $0x122] sm:$0x1]  ;;  %v1075_v58 = vld [vmem:[#allocation2 + $0x110] sm:$0xff]  ;;  %v6232_v30 = vunpack.c.h.bf16 %v4510_v36 }
  0x41   : > { %303 = vst.msk [vmem:[#allocation2 + $0x108] sm:$0x1] %vm291_vm1, %v284_v50  ;;  %339 = vst.msk [vmem:[#allocation2 + $0x119] sm:$0x1] %vm291_vm1, %v321_v54  ;;  %v691_v0 = vld [vmem:[#allocation2 + $0x128] sm:$0xff] }
  0x42   : > { %260 = vst.msk [vmem:[#allocation2 + $0x139] sm:$0xff] %vm235_vm0, %v6235_v53  ;;  %261 = vst.msk [vmem:[#allocation2 + $0x141] sm:$0xff] %vm235_vm0, %v6232_v30  ;;  %v287_v62 = vld [vmem:[#allocation2 + $0x152] sm:$0x1] }
  0x43   : > { %480 = vrot.lane.b32.xlu1 %v4398_v43, %s4216_s18  ;;  %304 = vst.msk [vmem:[#allocation2 + $0x120] sm:$0x1] %vm291_vm1, %v285_v55  ;;  %306 = vst.msk [vmem:[#allocation2 + $0x150] sm:$0x1] %vm291_vm1, %v287_v62  ;;  %v1195_v62 = vld [vmem:[#allocation2 + $0xa9] sm:$0xff] }
  0x44   : > { %607 = vrot.lane.b32.xlu0 %v4442_v51, %s4219_s21  ;;  %v322_v51 = vld [vmem:[#allocation2 + $0x12f] sm:$0x1]  ;;  %263 = vst.msk [vmem:[#allocation2 + $0x159] sm:$0xff] %vm235_vm0, %v6231_v61  ;;  %v1070_v61 = vld [vmem:[#allocation2 + $0xd8] sm:$0xff] }
  0x45   : > { %340 = vst.msk [vmem:[#allocation2 + $0x131] sm:$0x1] %vm291_vm1, %v322_v51  ;;  %v1321_v51 = vld [vmem:[#allocation2 + $0x82] sm:$0xff] }
  0x47   : > { %609 = vrot.lane.b32.xlu1 %v1347_v44, %s4219_s21 }
  0x48   : > { %736 = vrot.lane.b32.xlu0 %v4421_v33, %s4220_s22  ;;  %v1074_v63 = vld [vmem:[#allocation2 + $0x108] sm:$0xff] }
  0x49   : > { %v4530_v29 = vpack.c.bf16 %v1075_v58, %v1074_v63  ;;  %v286_v37 = vld [vmem:[#allocation2 + $0x13a] sm:$0x1]  ;;  %v1079_v48 = vld [vmem:[#allocation2 + $0x140] sm:$0xff]  ;;  %v4041_v63 = vld [vmem:[%s4281_s17 + $0x70] sm:$0xff]  }
  0x4a   : > { %v690_v33 = vld [vmem:[#allocation2 + $0x120] sm:$0xff]  ;;  %305 = vst.msk [vmem:[#allocation2 + $0x138] sm:$0x1] %vm291_vm1, %v286_v37  ;;  %v694_v37 = vld [vmem:[#allocation2 + $0x150] sm:$0xff] }
  0x4b   : > { %738 = vrot.lane.b32.xlu1 %v4425_v38, %s4220_s22  ;;  %v4536_v41 = vpack.c.bf16 %v691_v0, %v690_v33  ;;  %405 = vst.msk [vmem:[#allocation3 + $0x58] sm:$0xff] %vm235_vm0, %v4530_v29  ;;  %v4573_v0 = vunpack.c.l.bf16 %v4041_v63  ;;  %v808_v33 = vld [vmem:[#allocation2 + $0x99] sm:$0xff] }
  0x4c   : > { %865 = vrot.lane.b32.xlu0 %v4398_v43, %s4217_s19  ;;  %v1191_v43 = vld [vmem:[#allocation2 + $0x79] sm:$0xff] }
  0x4d   : > { %406 = vst.msk [vmem:[#allocation3 + $0x60] sm:$0xff] %vm235_vm0, %v4536_v41  ;;  %v1220_v54 = vpack.c.bf16 %v1192_v46, %v1191_v43  ;;  %6279 = vst [vmem:[#allocation10_spill] sm:$0xff] %v4573_v0  ;;  %v695_v43 = vld [vmem:[#allocation2 + $0x158] sm:$0xff] }
  0x4e   : > { %264 = vst.msk [vmem:[#allocation2 + $0x169] sm:$0xff] %vm235_vm0, %v4573_v0  ;;  %271 = vst.msk [vmem:[#allocation2 + $0x199] sm:$0xff] %vm235_vm0, %v4573_v0  ;;  %v324_v46 = vld [vmem:[#allocation2 + $0x15f] sm:$0x1] }
  0x4f   : > { %867 = vrot.lane.b32.xlu1 %v832_v60, %s4217_s19  ;;  %342 = vst.msk [vmem:[#allocation2 + $0x161] sm:$0x1] %vm291_vm1, %v324_v46 }
  0x50   : > { %994 = vrot.lane.b32.xlu0 %v1347_v44, %s4221_s23  ;;  %v323_v44 = vld [vmem:[#allocation2 + $0x147] sm:$0x1] }
  0x51   : > { %v1078_v50 = vld [vmem:[#allocation2 + $0x138] sm:$0xff]  ;;  %341 = vst.msk [vmem:[#allocation2 + $0x149] sm:$0x1] %vm291_vm1, %v323_v44 }
  0x52   : > { %v4549_v55 = vpack.c.bf16 %v1079_v48, %v1078_v50  ;;  %v4583_v48 = vpack.c.bf16 %v695_v43, %v694_v37  ;;  %v936_v50 = vld [vmem:[#allocation2 + $0x92] sm:$0xff]  ;;  %v937_v44 = vld [vmem:[#allocation2 + $0x9a] sm:$0xff] }
  0x53   : > { %996 = vrot.lane.b32.xlu1 %v961_v39, %s4221_s23  ;;  %v4608_v43 = vld [vmem:[%s4281_s17 + $0x78] sm:$0xff]   ;;  %s4225_s17 = smov 36  }
  0x54   : > { %1124 = vrot.lane.b32.xlu0 %v4425_v38, %s4222_s26  ;;  %407 = vst.msk [vmem:[#allocation3 + $0x68] sm:$0xff] %vm235_vm0, %v4549_v55  ;;  %v1320_v38 = vld [vmem:[#allocation2 + $0x7a] sm:$0xff]  ;;  %408 = vst.msk [vmem:[#allocation3 + $0x70] sm:$0xff] %vm235_vm0, %v4583_v48 }
  0x55   : > { %v1349_v58 = vpack.c.bf16 %v1321_v51, %v1320_v38  ;;  %v4588_v38 = vunpack.c.h.bf16 %v4041_v63  ;;  %v963_v51 = vpack.c.bf16 %v937_v44, %v936_v50  ;;  %v1196_v63 = vld [vmem:[#allocation2 + $0xb1] sm:$0xff]  ;;  %6281 = vst [vmem:[#allocation12_spill] sm:$0xff] %v4608_v43 }
  0x56   : > { %v1222_v37 = vpack.c.bf16 %v1196_v63, %v1195_v62  ;;  %v1325_v50 = vld [vmem:[#allocation2 + $0xb2] sm:$0xff]  ;;  %v682_v63 = vld [vmem:[#allocation2 + $0xc0] sm:$0xff] }
  0x57   : > { %1126 = vrot.lane.b32.xlu1 %v4432_v45, %s4222_s26  ;;  %6280 = vst [vmem:[#allocation11_spill] sm:$0xff] %v4588_v38  ;;  %265 = vst.msk [vmem:[#allocation2 + $0x171] sm:$0xff] %vm235_vm0, %v4588_v38 }
  0x58   : > { %1253 = vrot.lane.b32.xlu0 %v832_v60, %s4218_s20  ;;  %272 = vst.msk [vmem:[#allocation2 + $0x1a1] sm:$0xff] %vm235_vm0, %v4588_v38 }
  0x5b   : > { %1255 = vrot.lane.b32.xlu1 %v1220_v54, %s4218_s20 }
  0x5c   : > { %1382 = vrot.lane.b32.xlu0 %v961_v39, %s4223_s4 }
  0x5e   : > { %v325_v46 = vld [vmem:[#allocation2 + $0x177] sm:$0x1] }
  0x5f   : > { %482 = vrot.lane.b32.xlu1 %v832_v60, %s4216_s18  ;;  %v807_v60 = vld [vmem:[#allocation2 + $0x91] sm:$0xff]  ;;  %343 = vst.msk [vmem:[#allocation2 + $0x179] sm:$0x1] %vm291_vm1, %v325_v46  ;;  %v812_v46 = vld [vmem:[#allocation2 + $0xc9] sm:$0xff] }
  0x60   : > { %1384 = vrot.lane.b32.xlu0 %v1349_v58, %s4223_s4 }
  0x63   : > { %484 = vrot.lane.b32.xlu1 %v1220_v54, %s4216_s18 }
  0x64   : > { %611 = vrot.lane.b32.xlu0 %v961_v39, %s4219_s21  ;;  %v834_v39 = vpack.c.bf16 %v808_v33, %v807_v60  ;;  %v1083_v60 = vld [vmem:[#allocation2 + $0x170] sm:$0xff] }
  0x67   : > { %613 = vrot.lane.b32.xlu1 %v1349_v58, %s4219_s21 }
  0x68   : > { %740 = vrot.lane.b32.xlu0 %v4432_v45, %s4220_s22  ;;  %v288_v45 = vld [vmem:[#allocation2 + $0x16a] sm:$0x1] }
  0x69   : > { %307 = vst.msk [vmem:[#allocation2 + $0x168] sm:$0x1] %vm291_vm1, %v288_v45  ;;  %v6229_v45 = vunpack.c.h.bf16 %v4608_v43 }
  0x6b   : > { %742 = vrot.lane.b32.xlu1 %v4444_v52, %s4220_s22  ;;  %267 = vst.msk [vmem:[#allocation2 + $0x189] sm:$0xff] %vm235_vm0, %v6229_v45  ;;  %v941_v45 = vld [vmem:[#allocation2 + $0xca] sm:$0xff] }
  0x6c   : > { %869 = vrot.lane.b32.xlu0 %v1220_v54, %s4217_s19 }
  0x6f   : > { %871 = vrot.lane.b32.xlu1 %v834_v39, %s4217_s19 }
  0x70   : > { %998 = vrot.lane.b32.xlu0 %v1349_v58, %s4221_s23  ;;  %v1082_v54 = vld [vmem:[#allocation2 + $0x168] sm:$0xff]  ;;  %v6230_v58 = vunpack.c.l.bf16 %v4608_v43 }
  0x71   : > { %v4603_v33 = vpack.c.bf16 %v1083_v60, %v1082_v54  ;;  %v683_v54 = vld [vmem:[#allocation2 + $0xc8] sm:$0xff] }
  0x72   : > { %266 = vst.msk [vmem:[#allocation2 + $0x181] sm:$0xff] %vm235_vm0, %v6230_v58  ;;  %v811_v60 = vld [vmem:[#allocation2 + $0xc1] sm:$0xff]  ;;  %v290_v58 = vld [vmem:[#allocation2 + $0x19a] sm:$0x1] }
  0x73   : > { %1000 = vrot.lane.b32.xlu1 %v963_v51, %s4221_s23  ;;  %409 = vst.msk [vmem:[#allocation3 + $0x78] sm:$0xff] %vm235_vm0, %v4603_v33 }
  0x74   : > { %1128 = vrot.lane.b32.xlu0 %v4444_v52, %s4222_s26  ;;  %v1324_v52 = vld [vmem:[#allocation2 + $0xaa] sm:$0xff]  ;;  %309 = vst.msk [vmem:[#allocation2 + $0x198] sm:$0x1] %vm291_vm1, %v290_v58 }
  0x75   : > { %v1351_v44 = vpack.c.bf16 %v1325_v50, %v1324_v52  ;;  %v326_v52 = vld [vmem:[#allocation2 + $0x18f] sm:$0x1]  ;;  %v836_v50 = vpack.c.bf16 %v812_v46, %v811_v60  ;;  %v364_v46 = vld [vmem:[#allocation2 + $0xd8] sm:$0xff] }
  0x76   : > { %344 = vst.msk [vmem:[#allocation2 + $0x191] sm:$0x1] %vm291_vm1, %v326_v52  ;;  %v365_v52 = vld [vmem:[#allocation2 + $0xe0] sm:$0xff] }
  0x77   : > { %1130 = vrot.lane.b32.xlu1 %v4455_v59, %s4222_s26  ;;  %v387_v57 = vpack.c.bf16 %v365_v52, %v364_v46 }
  0x78   : > { %1257 = vrot.lane.b32.xlu0 %v834_v39, %s4218_s20 }
  0x79   : > { %v289_v62 = vld [vmem:[#allocation2 + $0x182] sm:$0x1]  ;;  %403 = vst.msk [vmem:[#allocation3 + $0x48] sm:$0xff] %vm235_vm0, %v387_v57 }
  0x7a   : > { %308 = vst.msk [vmem:[#allocation2 + $0x180] sm:$0x1] %vm291_vm1, %v289_v62  ;;  %v940_v62 = vld [vmem:[#allocation2 + $0xc2] sm:$0xff] }
  0x7b   : > { %1259 = vrot.lane.b32.xlu1 %v1222_v37, %s4218_s20 }
  0x7c   : > { %1386 = vrot.lane.b32.xlu0 %v963_v51, %s4223_s4 }
  0x7f   : > { %486 = vrot.lane.b32.xlu1 %v834_v39, %s4216_s18  ;;  %v707_v39 = vpack.c.bf16 %v683_v54, %v682_v63  ;;  %v362_v63 = vld [vmem:[#allocation2 + $0xc0] sm:$0xff]  ;;  %v363_v54 = vld [vmem:[#allocation2 + $0xc8] sm:$0xff] }
  0x80   : > { %1388 = vrot.lane.b32.xlu0 %v1351_v44, %s4223_s4  ;;  %v386_v30 = vpack.c.bf16 %v363_v54, %v362_v63  ;;  %v327_v63 = vld [vmem:[#allocation2 + $0x1a7] sm:$0x1]  ;;  %v1328_v54 = vld [vmem:[#allocation2 + $0xda] sm:$0xff] }
  0x81   : > { %345 = vst.msk [vmem:[#allocation2 + $0x1a9] sm:$0x1] %vm291_vm1, %v327_v63  ;;  %v815_v63 = vld [vmem:[#allocation2 + $0xf1] sm:$0xff] }
  0x82   : > { %402 = vst.msk [vmem:[#allocation3 + $0x40] sm:$0xff] %vm235_vm0, %v386_v30 }
  0x83   : > { %488 = vrot.lane.b32.xlu1 %v1222_v37, %s4216_s18 }
  0x84   : > { %615 = vrot.lane.b32.xlu0 %v963_v51, %s4219_s21  ;;  %v965_v51 = vpack.c.bf16 %v941_v45, %v940_v62  ;;  %v1199_v45 = vld [vmem:[#allocation2 + $0xd9] sm:$0xff]  ;;  %v1200_v62 = vld [vmem:[#allocation2 + $0xe1] sm:$0xff] }
  0x87   : > { %617 = vrot.lane.b32.xlu1 %v1351_v44, %s4219_s21 }
  0x88   : > { %744 = vrot.lane.b32.xlu0 %v4455_v59, %s4220_s22  ;;  %v1071_v59 = vld [vmem:[#allocation2 + $0xe0] sm:$0xff] }
  0x8b   : > { %746 = vrot.lane.b32.xlu1 %v707_v39, %s4220_s22 }
  0x8c   : > { %873 = vrot.lane.b32.xlu0 %v1222_v37, %s4217_s19  ;;  %v1095_v37 = vpack.c.bf16 %v1071_v59, %v1070_v61  ;;  %v1329_v59 = vld [vmem:[#allocation2 + $0xe2] sm:$0xff] }
  0x8d   : > { %v1353_v57 = vpack.c.bf16 %v1329_v59, %v1328_v54 }
  0x8f   : > { %875 = vrot.lane.b32.xlu1 %v836_v50, %s4217_s19 }
  0x90   : > { %1002 = vrot.lane.b32.xlu0 %v1351_v44, %s4221_s23  ;;  %v1224_v44 = vpack.c.bf16 %v1200_v62, %v1199_v45 }
  0x92   : > { %v475_v60 = vpop.permute.xlu0 %474 }
  0x93   : > { %1004 = vrot.lane.b32.xlu1 %v965_v51, %s4221_s23  ;;  %523 = vst.msk [vmem:[#allocation3] sm:$0xff] %vm522_vm3, %v475_v60  ;;  %v864_v58 = vpop.permute.xlu1 %863 }
  0x94   : > { %1132 = vrot.lane.b32.xlu0 %v707_v39, %s4222_s26 }
  0x96   : > { %v477_v30 = vpop.permute.xlu0 %476 }
  0x97   : > { %1134 = vrot.lane.b32.xlu1 %v1095_v37, %s4222_s26  ;;  %v1252_v61 = vpop.permute.xlu1 %1251  ;;  %524 = vst.msk [vmem:[#allocation3 + $0x8] sm:$0xff] %vm522_vm3, %v477_v30  ;;  %v816_v30 = vld [vmem:[#allocation2 + $0xf9] sm:$0xff] }
  0x98   : > { %1261 = vrot.lane.b32.xlu0 %v836_v50, %s4218_s20  ;;  %v838_v59 = vpack.c.bf16 %v816_v30, %v815_v63 }
  0x9a   : > { %v862_v39 = vpop.permute.xlu0 %861 }
  0x9b   : > { %1263 = vrot.lane.b32.xlu1 %v1224_v44, %s4218_s20 }
  0x9c   : > { %1390 = vrot.lane.b32.xlu0 %v965_v51, %s4223_s4 }
  0x9d   : > { %v604_v60 = vpop.permute.xlu1 %603 }
  0x9e   : > { %652 = vst.msk [vmem:[#allocation3] sm:$0xff] %vm651_vm4, %v604_v60  ;;  %v1250_v46 = vpop.permute.xlu0 %1249 }
  0x9f   : > { %490 = vrot.lane.b32.xlu1 %v836_v50, %s4216_s18 }
  0xa0   : > { %1392 = vrot.lane.b32.xlu0 %v1353_v57, %s4223_s4 }
  0xa1   : > { %v606_v52 = vpop.permute.xlu1 %605 }
  0xa2   : > { %653 = vst.msk [vmem:[#allocation3 + $0x8] sm:$0xff] %vm651_vm4, %v606_v52  ;;  %v733_v45 = vpop.permute.xlu0 %732 }
  0xa3   : > { %492 = vrot.lane.b32.xlu1 %v1224_v44, %s4216_s18  ;;  %781 = vst.msk [vmem:[#allocation3] sm:$0xff] %vm780_vm5, %v733_v45 }
  0xa4   : > { %619 = vrot.lane.b32.xlu0 %v965_v51, %s4219_s21  ;;  %910 = vst.msk [vmem:[#allocation3] sm:$0xff] %vm909_vm6, %v862_v39  ;;  %v945_v39 = vld [vmem:[#allocation2 + $0xfa] sm:$0xff] }
  0xa5   : > { %v735_v62 = vpop.permute.xlu1 %734 }
  0xa6   : > { %782 = vst.msk [vmem:[#allocation3 + $0x8] sm:$0xff] %vm780_vm5, %v735_v62  ;;  %v991_v50 = vpop.permute.xlu0 %990  ;;  %v1204_v62 = vld [vmem:[#allocation2 + $0x111] sm:$0xff] }
  0xa7   : > { %621 = vrot.lane.b32.xlu1 %v1353_v57, %s4219_s21  ;;  %911 = vst.msk [vmem:[#allocation3 + $0x8] sm:$0xff] %vm909_vm6, %v864_v58  ;;  %v944_v58 = vld [vmem:[#allocation2 + $0xf2] sm:$0xff] }
  0xa8   : > { %1039 = vst.msk [vmem:[#allocation3] sm:$0xff] %vm1038_vm7, %v991_v50  ;;  %748 = vrot.lane.b32.xlu0 %v1095_v37, %s4220_s22  ;;  %v967_v52 = vpack.c.bf16 %v945_v39, %v944_v58 }
  0xa9   : > { %v993_v54 = vpop.permute.xlu1 %992 }
  0xaa   : > { %1040 = vst.msk [vmem:[#allocation3 + $0x8] sm:$0xff] %vm1038_vm7, %v993_v54  ;;  %v1121_v51 = vpop.permute.xlu0 %1120  ;;  %v1332_v54 = vld [vmem:[#allocation2 + $0x10a] sm:$0xff] }
  0xab   : > { %750 = vrot.lane.b32.xlu1 %v4496_v47, %s4220_s22  ;;  %1169 = vst.msk [vmem:[#allocation3] sm:$0xff] %vm1168_vm8, %v1121_v51 }
  0xac   : > { %877 = vrot.lane.b32.xlu0 %v1224_v44, %s4217_s19  ;;  %1298 = vst.msk [vmem:[#allocation3] sm:$0xff] %vm1297_vm9, %v1250_v46  ;;  %v1203_v46 = vld [vmem:[#allocation2 + $0x109] sm:$0xff] }
  0xad   : > { %v1123_v60 = vpop.permute.xlu1 %1122  ;;  %v1226_v63 = vpack.c.bf16 %v1204_v62, %v1203_v46  ;;  %v819_v62 = vld [vmem:[#allocation2 + $0x121] sm:$0xff] }
  0xae   : > { %1170 = vst.msk [vmem:[#allocation3 + $0x8] sm:$0xff] %vm1168_vm8, %v1123_v60  ;;  %v1379_v37 = vpop.permute.xlu0 %1378 }
  0xaf   : > { %879 = vrot.lane.b32.xlu1 %v838_v59, %s4217_s19  ;;  %1299 = vst.msk [vmem:[#allocation3 + $0x8] sm:$0xff] %vm1297_vm9, %v1252_v61 }
  0xb0   : > { %1427 = vst.msk [vmem:[#allocation3] sm:$0xff] %vm1426_vm10, %v1379_v37  ;;  %1006 = vrot.lane.b32.xlu0 %v1353_v57, %s4221_s23 }
  0xb1   : > { %v479_v45 = vpop.permute.xlu1 %478 }
  0xb2   : > { %525 = vst.msk [vmem:[#allocation3 + $0x10] sm:$0xff] %vm522_vm3, %v479_v45  ;;  %v1381_v44 = vpop.permute.xlu0 %1380 }
  0xb3   : > { %1008 = vrot.lane.b32.xlu1 %v967_v52, %s4221_s23  ;;  %1428 = vst.msk [vmem:[#allocation3 + $0x8] sm:$0xff] %vm1426_vm10, %v1381_v44 }
  0xb4   : > { %1136 = vrot.lane.b32.xlu0 %v4496_v47, %s4222_s26  ;;  %v1333_v47 = vld [vmem:[#allocation2 + $0x112] sm:$0xff] }
  0xb5   : > { %v481_v50 = vpop.permute.xlu1 %480  ;;  %v1355_v60 = vpack.c.bf16 %v1333_v47, %v1332_v54  ;;  %v949_v54 = vld [vmem:[#allocation2 + $0x12a] sm:$0xff] }
  0xb6   : > { %526 = vst.msk [vmem:[#allocation3 + $0x18] sm:$0xff] %vm522_vm3, %v481_v50  ;;  %v608_v61 = vpop.permute.xlu0 %607  ;;  %v820_v50 = vld [vmem:[#allocation2 + $0x129] sm:$0xff] }
  0xb7   : > { %1138 = vrot.lane.b32.xlu1 %v4530_v29, %s4222_s26  ;;  %v1443_v57 = vld [vmem:[#allocation3] sm:$0xff]  ;;  %654 = vst.msk [vmem:[#allocation3 + $0x10] sm:$0xff] %vm651_vm4, %v608_v61 }
  0xb8   : > { %4087 = vmatprep.mubr.msk.bf16.mxu0 %vm1479_vm11, %v1443_v57  ;;  %1265 = vrot.lane.b32.xlu0 %v838_v59, %s4218_s20 }
  0xb9   : > { %v610_v30 = vpop.permute.xlu1 %609 }
  0xba   : > { %655 = vst.msk [vmem:[#allocation3 + $0x18] sm:$0xff] %vm651_vm4, %v610_v30  ;;  %v737_v51 = vpop.permute.xlu0 %736  ;;  %v1444_v58 = vld [vmem:[#allocation3 + $0x8] sm:$0xff]  ;;  %v948_v30 = vld [vmem:[#allocation2 + $0x122] sm:$0xff] }
  0xbb   : > { %1267 = vrot.lane.b32.xlu1 %v1226_v63, %s4218_s20  ;;  %783 = vst.msk [vmem:[#allocation3 + $0x10] sm:$0xff] %vm780_vm5, %v737_v51  ;;  %4088 = vmatmul.mubr.msk.bf16.vlgmr.msra.gmra.mrb[0].mxu0 %vm1479_vm11, %v1444_v58 }
  0xbc   : > { %1394 = vrot.lane.b32.xlu0 %v967_v52, %s4223_s4 }
  0xbd   : > { %v739_v39 = vpop.permute.xlu1 %738 }
  0xbe   : > { %784 = vst.msk [vmem:[#allocation3 + $0x18] sm:$0xff] %vm780_vm5, %v739_v39  ;;  %v866_v37 = vpop.permute.xlu0 %865 }
  0xbf   : > { %494 = vrot.lane.b32.xlu1 %v838_v59, %s4216_s18  ;;  %912 = vst.msk [vmem:[#allocation3 + $0x10] sm:$0xff] %vm909_vm6, %v866_v37  ;;  %v1207_v37 = vld [vmem:[#allocation2 + $0x139] sm:$0xff] }
  0xc0   : > { %1396 = vrot.lane.b32.xlu0 %v1355_v60, %s4223_s4 }
  0xc1   : > { %v868_v45 = vpop.permute.xlu1 %867 }
  0xc2   : > { %913 = vst.msk [vmem:[#allocation3 + $0x18] sm:$0xff] %vm909_vm6, %v868_v45  ;;  %v995_v44 = vpop.permute.xlu0 %994 }
  0xc3   : > { %496 = vrot.lane.b32.xlu1 %v1226_v63, %s4216_s18  ;;  %1041 = vst.msk [vmem:[#allocation3 + $0x10] sm:$0xff] %vm1038_vm7, %v995_v44 }
  0xc4   : > { %623 = vrot.lane.b32.xlu0 %v967_v52, %s4219_s21  ;;  %v840_v52 = vpack.c.bf16 %v820_v50, %v819_v62  ;;  %v1336_v62 = vld [vmem:[#allocation2 + $0x13a] sm:$0xff]  ;;  %v1337_v50 = vld [vmem:[#allocation2 + $0x142] sm:$0xff] }
  0xc5   : > { %v997_v46 = vpop.permute.xlu1 %996 }
  0xc6   : > { %1042 = vst.msk [vmem:[#allocation3 + $0x18] sm:$0xff] %vm1038_vm7, %v997_v46  ;;  %v1125_v59 = vpop.permute.xlu0 %1124 }
  0xc7   : > { %625 = vrot.lane.b32.xlu1 %v1355_v60, %s4219_s21  ;;  %1171 = vst.msk [vmem:[#allocation3 + $0x10] sm:$0xff] %vm1168_vm8, %v1125_v59 }
  0xc8   : > { %752 = vrot.lane.b32.xlu0 %v4530_v29, %s4220_s22  ;;  %v969_v29 = vpack.c.bf16 %v949_v54, %v948_v30  ;;  %v1357_v30 = vpack.c.bf16 %v1337_v50, %v1336_v62 }
  0xc9   : > { %v1127_v61 = vpop.permute.xlu1 %1126 }
  0xca   : > { %1172 = vst.msk [vmem:[#allocation3 + $0x18] sm:$0xff] %vm1168_vm8, %v1127_v61  ;;  %v1254_v57 = vpop.permute.xlu0 %1253 }
  0xcb   : > { %754 = vrot.lane.b32.xlu1 %v4536_v41, %s4220_s22  ;;  %1300 = vst.msk [vmem:[#allocation3 + $0x10] sm:$0xff] %vm1297_vm9, %v1254_v57 }
  0xcc   : > { %881 = vrot.lane.b32.xlu0 %v1226_v63, %s4217_s19  ;;  %v1208_v63 = vld [vmem:[#allocation2 + $0x141] sm:$0xff] }
  0xcd   : > { %v1256_v47 = vpop.permute.xlu1 %1255  ;;  %v1228_v46 = vpack.c.bf16 %v1208_v63, %v1207_v37  ;;  %v824_v37 = vld [vmem:[#allocation2 + $0x159] sm:$0xff] }
  0xce   : > { %1301 = vst.msk [vmem:[#allocation3 + $0x18] sm:$0xff] %vm1297_vm9, %v1256_v47  ;;  %v1383_v51 = vpop.permute.xlu0 %1382 }
  0xcf   : > { %883 = vrot.lane.b32.xlu1 %v840_v52, %s4217_s19  ;;  %1429 = vst.msk [vmem:[#allocation3 + $0x10] sm:$0xff] %vm1426_vm10, %v1383_v51 }
  0xd0   : > { %1010 = vrot.lane.b32.xlu0 %v1355_v60, %s4221_s23 }
  0xd1   : > { %v483_v58 = vpop.permute.xlu1 %482 }
  0xd2   : > { %527 = vst.msk [vmem:[#allocation3 + $0x20] sm:$0xff] %vm522_vm3, %v483_v58  ;;  %v1385_v39 = vpop.permute.xlu0 %1384 }
  0xd3   : > { %1012 = vrot.lane.b32.xlu1 %v969_v29, %s4221_s23  ;;  %1430 = vst.msk [vmem:[#allocation3 + $0x18] sm:$0xff] %vm1426_vm10, %v1385_v39  ;;  %v823_v39 = vld [vmem:[#allocation2 + $0x151] sm:$0xff] }
  0xd4   : > { %1140 = vrot.lane.b32.xlu0 %v4536_v41, %s4222_s26 }
  0xd5   : > { %v485_v45 = vpop.permute.xlu1 %484 }
  0xd6   : > { %528 = vst.msk [vmem:[#allocation3 + $0x28] sm:$0xff] %vm522_vm3, %v485_v45  ;;  %v612_v44 = vpop.permute.xlu0 %611  ;;  %v1445_v60 = vld [vmem:[#allocation3 + $0x10] sm:$0xff] }
  0xd7   : > { %1142 = vrot.lane.b32.xlu1 %v4549_v55, %s4222_s26  ;;  %656 = vst.msk [vmem:[#allocation3 + $0x20] sm:$0xff] %vm651_vm4, %v612_v44  ;;  %4091 = vmatprep.mubr.msk.bf16.mxu0 %vm1479_vm11, %v1445_v60  ;;  %v952_v44 = vld [vmem:[#allocation2 + $0x152] sm:$0xff]  ;;  %v953_v60 = vld [vmem:[#allocation2 + $0x15a] sm:$0xff] }
  0xd8   : > { %1269 = vrot.lane.b32.xlu0 %v840_v52, %s4218_s20 }
  0xd9   : > { %v614_v59 = vpop.permute.xlu1 %613 }
  0xda   : > { %657 = vst.msk [vmem:[#allocation3 + $0x28] sm:$0xff] %vm651_vm4, %v614_v59  ;;  %v741_v41 = vpop.permute.xlu0 %740  ;;  %v1446_v61 = vld [vmem:[#allocation3 + $0x18] sm:$0xff] }
  0xdb   : > { %1271 = vrot.lane.b32.xlu1 %v1228_v46, %s4218_s20  ;;  %785 = vst.msk [vmem:[#allocation3 + $0x20] sm:$0xff] %vm780_vm5, %v741_v41  ;;  %4092 = vmatmul.mubr.msk.bf16.gmra.mrb[4].mxu0 %vm1479_vm11, %v1446_v61  ;;  %v1211_v61 = vld [vmem:[#allocation2 + $0x169] sm:$0xff] }
  0xdc   : > { %1398 = vrot.lane.b32.xlu0 %v969_v29, %s4223_s4 }
  0xdd   : > { %v743_v57 = vpop.permute.xlu1 %742 }
  0xde   : > { %786 = vst.msk [vmem:[#allocation3 + $0x28] sm:$0xff] %vm780_vm5, %v743_v57  ;;  %v870_v54 = vpop.permute.xlu0 %869 }
  0xdf   : > { %498 = vrot.lane.b32.xlu1 %v840_v52, %s4216_s18  ;;  %914 = vst.msk [vmem:[#allocation3 + $0x20] sm:$0xff] %vm909_vm6, %v870_v54 }
  0xe0   : > { %1400 = vrot.lane.b32.xlu0 %v1357_v30, %s4223_s4 }
  0xe1   : > { %v872_v47 = vpop.permute.xlu1 %871 }
  0xe2   : > { %915 = vst.msk [vmem:[#allocation3 + $0x28] sm:$0xff] %vm909_vm6, %v872_v47  ;;  %v999_v51 = vpop.permute.xlu0 %998 }
  0xe3   : > { %500 = vrot.lane.b32.xlu1 %v1228_v46, %s4216_s18  ;;  %1043 = vst.msk [vmem:[#allocation3 + $0x20] sm:$0xff] %vm1038_vm7, %v999_v51 }
  0xe4   : > { %627 = vrot.lane.b32.xlu0 %v969_v29, %s4219_s21  ;;  %v842_v29 = vpack.c.bf16 %v824_v37, %v823_v39 }
  0xe5   : > { %v1001_v58 = vpop.permute.xlu1 %1000 }
  0xe6   : > { %1044 = vst.msk [vmem:[#allocation3 + $0x28] sm:$0xff] %vm1038_vm7, %v1001_v58  ;;  %v1129_v52 = vpop.permute.xlu0 %1128  ;;  %v1340_v58 = vld [vmem:[#allocation2 + $0x16a] sm:$0xff] }
  0xe7   : > { %629 = vrot.lane.b32.xlu1 %v1357_v30, %s4219_s21  ;;  %1173 = vst.msk [vmem:[#allocation3 + $0x20] sm:$0xff] %vm1168_vm8, %v1129_v52  ;;  %v1341_v52 = vld [vmem:[#allocation2 + $0x172] sm:$0xff] }
  0xe8   : > { %756 = vrot.lane.b32.xlu0 %v4549_v55, %s4220_s22  ;;  %v971_v55 = vpack.c.bf16 %v953_v60, %v952_v44 }
  0xe9   : > { %v1131_v63 = vpop.permute.xlu1 %1130 }
  0xea   : > { %1174 = vst.msk [vmem:[#allocation3 + $0x28] sm:$0xff] %vm1168_vm8, %v1131_v63  ;;  %v1258_v45 = vpop.permute.xlu0 %1257  ;;  %v1359_v63 = vpack.c.bf16 %v1341_v52, %v1340_v58 }
  0xeb   : > { %758 = vrot.lane.b32.xlu1 %v4583_v48, %s4220_s22  ;;  %1302 = vst.msk [vmem:[#allocation3 + $0x20] sm:$0xff] %vm1297_vm9, %v1258_v45 }
  0xec   : > { %885 = vrot.lane.b32.xlu0 %v1228_v46, %s4217_s19  ;;  %v1212_v46 = vld [vmem:[#allocation2 + $0x171] sm:$0xff] }
  0xed   : > { %v1260_v59 = vpop.permute.xlu1 %1259  ;;  %v1230_v47 = vpack.c.bf16 %v1212_v46, %v1211_v61  ;;  %v827_v61 = vld [vmem:[#allocation2 + $0x181] sm:$0xff]  ;;  %v828_v46 = vld [vmem:[#allocation2 + $0x189] sm:$0xff] }
  0xee   : > { %1303 = vst.msk [vmem:[#allocation3 + $0x28] sm:$0xff] %vm1297_vm9, %v1260_v59  ;;  %v1387_v62 = vpop.permute.xlu0 %1386  ;;  %v698_v59 = vld [vmem:[#allocation2 + $0x180] sm:$0xff] }
  0xef   : > { %887 = vrot.lane.b32.xlu1 %v842_v29, %s4217_s19  ;;  %1431 = vst.msk [vmem:[#allocation3 + $0x20] sm:$0xff] %vm1426_vm10, %v1387_v62  ;;  %v699_v62 = vld [vmem:[#allocation2 + $0x188] sm:$0xff] }
  0xf0   : > { %1014 = vrot.lane.b32.xlu0 %v1357_v30, %s4221_s23 }
  0xf1   : > { %v487_v50 = vpop.permute.xlu1 %486 }
  0xf2   : > { %529 = vst.msk [vmem:[#allocation3 + $0x30] sm:$0xff] %vm522_vm3, %v487_v50  ;;  %v1389_v41 = vpop.permute.xlu0 %1388 }
  0xf3   : > { %1016 = vrot.lane.b32.xlu1 %v971_v55, %s4221_s23  ;;  %1432 = vst.msk [vmem:[#allocation3 + $0x28] sm:$0xff] %vm1426_vm10, %v1389_v41  ;;  %v715_v41 = vpack.c.bf16 %v699_v62, %v698_v59 }
  0xf4   : > { %1144 = vrot.lane.b32.xlu0 %v4583_v48, %s4222_s26 }
  0xf5   : > { %v489_v57 = vpop.permute.xlu1 %488 }
  0xf6   : > { %530 = vst.msk [vmem:[#allocation3 + $0x38] sm:$0xff] %vm522_vm3, %v489_v57  ;;  %v616_v54 = vpop.permute.xlu0 %615  ;;  %v1447_v30 = vld [vmem:[#allocation3 + $0x20] sm:$0xff] }
  0xf7   : > { %1146 = vrot.lane.b32.xlu1 %v4603_v33, %s4222_s26  ;;  %658 = vst.msk [vmem:[#allocation3 + $0x30] sm:$0xff] %vm651_vm4, %v616_v54  ;;  %4095 = vmatprep.mubr.msk.bf16.mxu0 %vm1479_vm11, %v1447_v30  ;;  %v956_v30 = vld [vmem:[#allocation2 + $0x182] sm:$0xff] }
  0xf8   : > { %1273 = vrot.lane.b32.xlu0 %v842_v29, %s4218_s20 }
  0xf9   : > { %v618_v51 = vpop.permute.xlu1 %617 }
  0xfa   : > { %659 = vst.msk [vmem:[#allocation3 + $0x38] sm:$0xff] %vm651_vm4, %v618_v51  ;;  %v745_v48 = vpop.permute.xlu0 %744  ;;  %v1448_v39 = vld [vmem:[#allocation3 + $0x28] sm:$0xff]  ;;  %v957_v51 = vld [vmem:[#allocation2 + $0x18a] sm:$0xff] }
  0xfb   : > { %1275 = vrot.lane.b32.xlu1 %v1230_v47, %s4218_s20  ;;  %787 = vst.msk [vmem:[#allocation3 + $0x30] sm:$0xff] %vm780_vm5, %v745_v48  ;;  %4096 = vmatmul.mubr.msk.bf16.gmra.mrb[8].mxu0 %vm1479_vm11, %v1448_v39  ;;  %v973_v48 = vpack.c.bf16 %v957_v51, %v956_v30  ;;  %v1087_v39 = vld [vmem:[#allocation2 + $0x1a0] sm:$0xff] }
  0xfc   : > { %1402 = vrot.lane.b32.xlu0 %v971_v55, %s4223_s4 }
  0xfd   : > { %v747_v37 = vpop.permute.xlu1 %746 }
  0xfe   : > { %788 = vst.msk [vmem:[#allocation3 + $0x38] sm:$0xff] %vm780_vm5, %v747_v37  ;;  %v874_v45 = vpop.permute.xlu0 %873 }
  0xff   : > { %502 = vrot.lane.b32.xlu1 %v842_v29, %s4216_s18  ;;  %916 = vst.msk [vmem:[#allocation3 + $0x30] sm:$0xff] %vm909_vm6, %v874_v45 }
 0x100   : > { %1404 = vrot.lane.b32.xlu0 %v1359_v63, %s4223_s4 }
 0x101   : > { %v876_v44 = vpop.permute.xlu1 %875 }
 0x102   : > { %917 = vst.msk [vmem:[#allocation3 + $0x38] sm:$0xff] %vm909_vm6, %v876_v44  ;;  %v1003_v60 = vpop.permute.xlu0 %1002 }
 0x103   : > { %504 = vrot.lane.b32.xlu1 %v1230_v47, %s4216_s18  ;;  %1045 = vst.msk [vmem:[#allocation3 + $0x30] sm:$0xff] %vm1038_vm7, %v1003_v60  ;;  %v1216_v60 = vld [vmem:[#allocation2 + $0x1a1] sm:$0xff] }
 0x104   : > { %631 = vrot.lane.b32.xlu0 %v971_v55, %s4219_s21  ;;  %v844_v55 = vpack.c.bf16 %v828_v46, %v827_v61  ;;  %v1345_v61 = vld [vmem:[#allocation2 + $0x1a2] sm:$0xff] }
 0x105   : > { %v1005_v50 = vpop.permute.xlu1 %1004 }
 0x106   : > { %1046 = vst.msk [vmem:[#allocation3 + $0x38] sm:$0xff] %vm1038_vm7, %v1005_v50  ;;  %v1133_v29 = vpop.permute.xlu0 %1132 }
 0x107   : > { %633 = vrot.lane.b32.xlu1 %v1359_v63, %s4219_s21  ;;  %1175 = vst.msk [vmem:[#allocation3 + $0x30] sm:$0xff] %vm1168_vm8, %v1133_v29  ;;  %v1344_v29 = vld [vmem:[#allocation2 + $0x19a] sm:$0xff] }
 0x108   : > { %760 = vrot.lane.b32.xlu0 %v4603_v33, %s4220_s22  ;;  %v1086_v33 = vld [vmem:[#allocation2 + $0x198] sm:$0xff] }
 0x109   : > { %v1135_v57 = vpop.permute.xlu1 %1134  ;;  %v1103_v44 = vpack.c.bf16 %v1087_v39, %v1086_v33 }
 0x10a   : > { %1176 = vst.msk [vmem:[#allocation3 + $0x38] sm:$0xff] %vm1168_vm8, %v1135_v57  ;;  %v1262_v54 = vpop.permute.xlu0 %1261 }
 0x10b   : > { %762 = vrot.lane.b32.xlu1 %v715_v41, %s4220_s22  ;;  %1304 = vst.msk [vmem:[#allocation3 + $0x30] sm:$0xff] %vm1297_vm9, %v1262_v54  ;;  %v1361_v54 = vpack.c.bf16 %v1345_v61, %v1344_v29 }
 0x10c   : > { %889 = vrot.lane.b32.xlu0 %v1230_v47, %s4217_s19  ;;  %v1215_v47 = vld [vmem:[#allocation2 + $0x199] sm:$0xff] }
 0x10d   : > { %v1264_v58 = vpop.permute.xlu1 %1263 }
 0x10e   : > { %1305 = vst.msk [vmem:[#allocation3 + $0x38] sm:$0xff] %vm1297_vm9, %v1264_v58  ;;  %v1391_v52 = vpop.permute.xlu0 %1390 }
 0x10f   : > { %891 = vrot.lane.b32.xlu1 %v844_v55, %s4217_s19  ;;  %1433 = vst.msk [vmem:[#allocation3 + $0x30] sm:$0xff] %vm1426_vm10, %v1391_v52 }
 0x110   : > { %1018 = vrot.lane.b32.xlu0 %v1359_v63, %s4221_s23  ;;  %v1232_v63 = vpack.c.bf16 %v1216_v60, %v1215_v47 }
 0x111   : > { %v491_v37 = vpop.permute.xlu1 %490 }
 0x112   : > { %531 = vst.msk [vmem:[#allocation3 + $0x40] sm:$0xff] %vm522_vm3, %v491_v37  ;;  %v1393_v45 = vpop.permute.xlu0 %1392 }
 0x113   : > { %1020 = vrot.lane.b32.xlu1 %v973_v48, %s4221_s23  ;;  %1434 = vst.msk [vmem:[#allocation3 + $0x38] sm:$0xff] %vm1426_vm10, %v1393_v45 }
 0x114   : > { %1148 = vrot.lane.b32.xlu0 %v715_v41, %s4222_s26 }
 0x115   : > { %v493_v59 = vpop.permute.xlu1 %492 }
 0x116   : > { %532 = vst.msk [vmem:[#allocation3 + $0x48] sm:$0xff] %vm522_vm3, %v493_v59  ;;  %v620_v62 = vpop.permute.xlu0 %619  ;;  %v1449_v50 = vld [vmem:[#allocation3 + $0x30] sm:$0xff] }
 0x117   : > { %1150 = vrot.lane.b32.xlu1 %v1103_v44, %s4222_s26  ;;  %660 = vst.msk [vmem:[#allocation3 + $0x40] sm:$0xff] %vm651_vm4, %v620_v62  ;;  %4099 = vmatprep.mubr.msk.bf16.mxu0 %vm1479_vm11, %v1449_v50 }
 0x118   : > { %1277 = vrot.lane.b32.xlu0 %v844_v55, %s4218_s20 }
 0x119   : > { %v622_v46 = vpop.permute.xlu1 %621 }
 0x11a   : > { %661 = vst.msk [vmem:[#allocation3 + $0x48] sm:$0xff] %vm651_vm4, %v622_v46  ;;  %v749_v41 = vpop.permute.xlu0 %748  ;;  %v1450_v57 = vld [vmem:[#allocation3 + $0x38] sm:$0xff] }
 0x11b   : > { %1279 = vrot.lane.b32.xlu1 %v1232_v63, %s4218_s20  ;;  %789 = vst.msk [vmem:[#allocation3 + $0x40] sm:$0xff] %vm780_vm5, %v749_v41  ;;  %4100 = vmatmul.mubr.msk.bf16.gmra.mrb[12].mxu0 %vm1479_vm11, %v1450_v57 }
 0x11c   : > { %1406 = vrot.lane.b32.xlu0 %v973_v48, %s4223_s4 }
 0x11d   : > { %v751_v30 = vpop.permute.xlu1 %750 }
 0x11e   : > { %790 = vst.msk [vmem:[#allocation3 + $0x48] sm:$0xff] %vm780_vm5, %v751_v30  ;;  %v878_v51 = vpop.permute.xlu0 %877 }
 0x11f   : > { %1408 = vrot.lane.b32.xlu1 %v1361_v54, %s4223_s4  ;;  %918 = vst.msk [vmem:[#allocation3 + $0x40] sm:$0xff] %vm909_vm6, %v878_v51 }
 0x121   : > { %v880_v55 = vpop.permute.xlu1 %879 }
 0x122   : > { %919 = vst.msk [vmem:[#allocation3 + $0x48] sm:$0xff] %vm909_vm6, %v880_v55  ;;  %v1007_v58 = vpop.permute.xlu0 %1006 }
 0x123   : > { %1047 = vst.msk [vmem:[#allocation3 + $0x40] sm:$0xff] %vm1038_vm7, %v1007_v58 }
 0x125   : > { %v1009_v52 = vpop.permute.xlu1 %1008 }
 0x126   : > { %1048 = vst.msk [vmem:[#allocation3 + $0x48] sm:$0xff] %vm1038_vm7, %v1009_v52  ;;  %v1137_v33 = vpop.permute.xlu0 %1136 }
 0x127   : > { %1177 = vst.msk [vmem:[#allocation3 + $0x40] sm:$0xff] %vm1168_vm8, %v1137_v33 }
 0x129   : > { %v1139_v48 = vpop.permute.xlu1 %1138 }
 0x12a   : > { %1178 = vst.msk [vmem:[#allocation3 + $0x48] sm:$0xff] %vm1168_vm8, %v1139_v48  ;;  %v1266_v39 = vpop.permute.xlu0 %1265 }
 0x12b   : > { %1306 = vst.msk [vmem:[#allocation3 + $0x40] sm:$0xff] %vm1297_vm9, %v1266_v39 }
 0x12d   : > { %v1268_v37 = vpop.permute.xlu1 %1267 }
 0x12e   : > { %1307 = vst.msk [vmem:[#allocation3 + $0x48] sm:$0xff] %vm1297_vm9, %v1268_v37  ;;  %v1395_v45 = vpop.permute.xlu0 %1394 }
 0x12f   : > { %1435 = vst.msk [vmem:[#allocation3 + $0x40] sm:$0xff] %vm1426_vm10, %v1395_v45 }
 0x131   : > { %v495_v44 = vpop.permute.xlu1 %494 }
 0x132   : > { %533 = vst.msk [vmem:[#allocation3 + $0x50] sm:$0xff] %vm522_vm3, %v495_v44  ;;  %v1397_v47 = vpop.permute.xlu0 %1396 }
 0x133   : > { %1436 = vst.msk [vmem:[#allocation3 + $0x48] sm:$0xff] %vm1426_vm10, %v1397_v47 }
 0x135   : > { %v497_v60 = vpop.permute.xlu1 %496 }
 0x136   : > { %534 = vst.msk [vmem:[#allocation3 + $0x58] sm:$0xff] %vm522_vm3, %v497_v60  ;;  %v624_v59 = vpop.permute.xlu0 %623  ;;  %v1451_v62 = vld [vmem:[#allocation3 + $0x40] sm:$0xff] }
 0x137   : > { %662 = vst.msk [vmem:[#allocation3 + $0x50] sm:$0xff] %vm651_vm4, %v624_v59  ;;  %4103 = vmatprep.mubr.msk.bf16.mxu0 %vm1479_vm11, %v1451_v62 }
 0x139   : > { %v626_v50 = vpop.permute.xlu1 %625 }
 0x13a   : > { %663 = vst.msk [vmem:[#allocation3 + $0x58] sm:$0xff] %vm651_vm4, %v626_v50  ;;  %v753_v63 = vpop.permute.xlu0 %752  ;;  %v1452_v29 = vld [vmem:[#allocation3 + $0x48] sm:$0xff] }
 0x13b   : > { %791 = vst.msk [vmem:[#allocation3 + $0x50] sm:$0xff] %vm780_vm5, %v753_v63  ;;  %4104 = vmatmul.mubr.msk.bf16.gmra.mrb[16].mxu0 %vm1479_vm11, %v1452_v29 }
 0x13d   : > { %v755_v61 = vpop.permute.xlu1 %754 }
 0x13e   : > { %792 = vst.msk [vmem:[#allocation3 + $0x58] sm:$0xff] %vm780_vm5, %v755_v61  ;;  %v882_v46 = vpop.permute.xlu0 %881 }
 0x13f   : > { %920 = vst.msk [vmem:[#allocation3 + $0x50] sm:$0xff] %vm909_vm6, %v882_v46 }
 0x141   : > { %v884_v41 = vpop.permute.xlu1 %883 }
 0x142   : > { %921 = vst.msk [vmem:[#allocation3 + $0x58] sm:$0xff] %vm909_vm6, %v884_v41  ;;  %v1011_v57 = vpop.permute.xlu0 %1010 }
 0x143   : > { %1049 = vst.msk [vmem:[#allocation3 + $0x50] sm:$0xff] %vm1038_vm7, %v1011_v57 }
 0x145   : > { %v1013_v54 = vpop.permute.xlu1 %1012 }
 0x146   : > { %1050 = vst.msk [vmem:[#allocation3 + $0x58] sm:$0xff] %vm1038_vm7, %v1013_v54  ;;  %v1141_v30 = vpop.permute.xlu0 %1140 }
 0x147   : > { %1179 = vst.msk [vmem:[#allocation3 + $0x50] sm:$0xff] %vm1168_vm8, %v1141_v30 }
 0x149   : > { %v1143_v51 = vpop.permute.xlu1 %1142 }
 0x14a   : > { %1180 = vst.msk [vmem:[#allocation3 + $0x58] sm:$0xff] %vm1168_vm8, %v1143_v51  ;;  %v1270_v55 = vpop.permute.xlu0 %1269 }
 0x14b   : > { %1308 = vst.msk [vmem:[#allocation3 + $0x50] sm:$0xff] %vm1297_vm9, %v1270_v55 }
 0x14d   : > { %v1272_v58 = vpop.permute.xlu1 %1271 }
 0x14e   : > { %1309 = vst.msk [vmem:[#allocation3 + $0x58] sm:$0xff] %vm1297_vm9, %v1272_v58  ;;  %v1399_v52 = vpop.permute.xlu0 %1398 }
 0x14f   : > { %1437 = vst.msk [vmem:[#allocation3 + $0x50] sm:$0xff] %vm1426_vm10, %v1399_v52 }
 0x151   : > { %v499_v33 = vpop.permute.xlu1 %498 }
 0x152   : > { %535 = vst.msk [vmem:[#allocation3 + $0x60] sm:$0xff] %vm522_vm3, %v499_v33  ;;  %v1401_v48 = vpop.permute.xlu0 %1400 }
 0x153   : > { %1438 = vst.msk [vmem:[#allocation3 + $0x58] sm:$0xff] %vm1426_vm10, %v1401_v48 }
 0x155   : > { %v501_v39 = vpop.permute.xlu1 %500 }
 0x156   : > { %536 = vst.msk [vmem:[#allocation3 + $0x68] sm:$0xff] %vm522_vm3, %v501_v39  ;;  %v628_v37 = vpop.permute.xlu0 %627  ;;  %v1453_v45 = vld [vmem:[#allocation3 + $0x50] sm:$0xff] }
 0x157   : > { %664 = vst.msk [vmem:[#allocation3 + $0x60] sm:$0xff] %vm651_vm4, %v628_v37  ;;  %4107 = vmatprep.mubr.msk.bf16.mxu0 %vm1479_vm11, %v1453_v45 }
 0x159   : > { %v630_v44 = vpop.permute.xlu1 %629 }
 0x15a   : > { %665 = vst.msk [vmem:[#allocation3 + $0x68] sm:$0xff] %vm651_vm4, %v630_v44  ;;  %v757_v47 = vpop.permute.xlu0 %756  ;;  %v1454_v60 = vld [vmem:[#allocation3 + $0x58] sm:$0xff] }
 0x15b   : > { %793 = vst.msk [vmem:[#allocation3 + $0x60] sm:$0xff] %vm780_vm5, %v757_v47  ;;  %4108 = vmatmul.mubr.msk.bf16.gmra.mrb[20].mxu0 %vm1479_vm11, %v1454_v60 }
 0x15d   : > { %v759_v59 = vpop.permute.xlu1 %758 }
 0x15e   : > { %794 = vst.msk [vmem:[#allocation3 + $0x68] sm:$0xff] %vm780_vm5, %v759_v59  ;;  %v886_v62 = vpop.permute.xlu0 %885 }
 0x15f   : > { %922 = vst.msk [vmem:[#allocation3 + $0x60] sm:$0xff] %vm909_vm6, %v886_v62 }
 0x161   : > { %v888_v50 = vpop.permute.xlu1 %887 }
 0x162   : > { %923 = vst.msk [vmem:[#allocation3 + $0x68] sm:$0xff] %vm909_vm6, %v888_v50  ;;  %v1015_v63 = vpop.permute.xlu0 %1014 }
 0x163   : > { %1051 = vst.msk [vmem:[#allocation3 + $0x60] sm:$0xff] %vm1038_vm7, %v1015_v63 }
 0x165   : > { %v1017_v29 = vpop.permute.xlu1 %1016 }
 0x166   : > { %1052 = vst.msk [vmem:[#allocation3 + $0x68] sm:$0xff] %vm1038_vm7, %v1017_v29  ;;  %v1145_v61 = vpop.permute.xlu0 %1144 }
 0x167   : > { %1181 = vst.msk [vmem:[#allocation3 + $0x60] sm:$0xff] %vm1168_vm8, %v1145_v61 }
 0x169   : > { %v1147_v46 = vpop.permute.xlu1 %1146 }
 0x16a   : > { %1182 = vst.msk [vmem:[#allocation3 + $0x68] sm:$0xff] %vm1168_vm8, %v1147_v46  ;;  %v1274_v41 = vpop.permute.xlu0 %1273 }
 0x16b   : > { %1310 = vst.msk [vmem:[#allocation3 + $0x60] sm:$0xff] %vm1297_vm9, %v1274_v41 }
 0x16d   : > { %v1276_v57 = vpop.permute.xlu1 %1275 }
 0x16e   : > { %1311 = vst.msk [vmem:[#allocation3 + $0x68] sm:$0xff] %vm1297_vm9, %v1276_v57  ;;  %v1403_v54 = vpop.permute.xlu0 %1402 }
 0x16f   : > { %1439 = vst.msk [vmem:[#allocation3 + $0x60] sm:$0xff] %vm1426_vm10, %v1403_v54 }
 0x171   : > { %v503_v30 = vpop.permute.xlu1 %502 }
 0x172   : > { %537 = vst.msk [vmem:[#allocation3 + $0x70] sm:$0xff] %vm522_vm3, %v503_v30  ;;  %v1405_v51 = vpop.permute.xlu0 %1404 }
 0x173   : > { %1440 = vst.msk [vmem:[#allocation3 + $0x68] sm:$0xff] %vm1426_vm10, %v1405_v51 }
 0x175   : > { %v505_v55 = vpop.permute.xlu1 %504 }
 0x176   : > { %538 = vst.msk [vmem:[#allocation3 + $0x78] sm:$0xff] %vm522_vm3, %v505_v55  ;;  %v632_v58 = vpop.permute.xlu0 %631  ;;  %v1455_v52 = vld [vmem:[#allocation3 + $0x60] sm:$0xff] }
 0x177   : > { %666 = vst.msk [vmem:[#allocation3 + $0x70] sm:$0xff] %vm651_vm4, %v632_v58  ;;  %4111 = vmatprep.mubr.msk.bf16.mxu0 %vm1479_vm11, %v1455_v52 }
 0x179   : > { %v634_v33 = vpop.permute.xlu1 %633 }
 0x17a   : > { %667 = vst.msk [vmem:[#allocation3 + $0x78] sm:$0xff] %vm651_vm4, %v634_v33  ;;  %v761_v48 = vpop.permute.xlu0 %760  ;;  %v1456_v39 = vld [vmem:[#allocation3 + $0x68] sm:$0xff] }
 0x17b   : > { %795 = vst.msk [vmem:[#allocation3 + $0x70] sm:$0xff] %vm780_vm5, %v761_v48  ;;  %4112 = vmatmul.mubr.msk.bf16.gmra.mrb[24].mxu0 %vm1479_vm11, %v1456_v39 }
 0x17d   : > { %v763_v37 = vpop.permute.xlu1 %762 }
 0x17e   : > { %796 = vst.msk [vmem:[#allocation3 + $0x78] sm:$0xff] %vm780_vm5, %v763_v37  ;;  %v890_v45 = vpop.permute.xlu0 %889 }
 0x17f   : > { %924 = vst.msk [vmem:[#allocation3 + $0x70] sm:$0xff] %vm909_vm6, %v890_v45 }
 0x181   : > { %v892_v44 = vpop.permute.xlu1 %891 }
 0x182   : > { %925 = vst.msk [vmem:[#allocation3 + $0x78] sm:$0xff] %vm909_vm6, %v892_v44  ;;  %v1019_v47 = vpop.permute.xlu0 %1018 }
 0x183   : > { %1053 = vst.msk [vmem:[#allocation3 + $0x70] sm:$0xff] %vm1038_vm7, %v1019_v47 }
 0x185   : > { %v1021_v60 = vpop.permute.xlu1 %1020 }
 0x186   : > { %1054 = vst.msk [vmem:[#allocation3 + $0x78] sm:$0xff] %vm1038_vm7, %v1021_v60  ;;  %v1149_v59 = vpop.permute.xlu0 %1148 }
 0x187   : > { %1183 = vst.msk [vmem:[#allocation3 + $0x70] sm:$0xff] %vm1168_vm8, %v1149_v59 }
 0x189   : > { %v1151_v62 = vpop.permute.xlu1 %1150 }
 0x18a   : > { %1184 = vst.msk [vmem:[#allocation3 + $0x78] sm:$0xff] %vm1168_vm8, %v1151_v62  ;;  %v1278_v50 = vpop.permute.xlu0 %1277 }
 0x18b   : > { %1312 = vst.msk [vmem:[#allocation3 + $0x70] sm:$0xff] %vm1297_vm9, %v1278_v50 }
 0x18d   : > { %v1280_v63 = vpop.permute.xlu1 %1279 }
 0x18e   : > { %1313 = vst.msk [vmem:[#allocation3 + $0x78] sm:$0xff] %vm1297_vm9, %v1280_v63  ;;  %v1407_v29 = vpop.permute.xlu0 %1406  ;;  %v4864_v61 = vpop.f32.mrb[0].mxu0 }
 0x18f   : > { %1441 = vst.msk [vmem:[#allocation3 + $0x70] sm:$0xff] %vm1426_vm10, %v1407_v29  ;;  %v4867_v46 = vpop.f32.mrb[1].mxu0  ;;  %v1764_v51 = vmul.f32 %v4864_v61, %v4864_v61  ;;  %v1696_v48 = vsel %vm235_vm0, %v4864_v61, 0.0 }
 0x190   : > { %v1762_v57 = vmul.f32 %v4867_v46, %v4867_v46  ;;  %v4871_v54 = vpop.f32.mrb[2].mxu0  ;;  %v1693_v55 = vsel %vm235_vm0, %v4867_v46, 0.0 }
 0x191   : > { %v1409_v41 = vpop.permute.xlu1 %1408  ;;  %v4874_v30 = vpop.f32.mrb[3].mxu0  ;;  %v1765_v37 = vmul.f32 %v4871_v54, %v4871_v54  ;;  %v1797_v60 = vsel %vm235_vm0, %v1764_v51, 0.0  ;;  %v1698_v59 = vsel %vm235_vm0, %v4871_v54, 0.0 }
 0x192   : > { %1442 = vst.msk [vmem:[#allocation3 + $0x78] sm:$0xff] %vm1426_vm10, %v1409_v41  ;;  %v1694_v58 = vsel %vm235_vm0, %v4874_v30, 0.0  ;;  %v1763_v52 = vmul.f32 %v4874_v30, %v4874_v30  ;;  %v1794_v39 = vsel %vm235_vm0, %v1762_v57, 0.0 }
 0x193   : > { %v1695_v33 = vadd.f32 %v1694_v58, %v1693_v55  ;;  %v1799_v29 = vsel %vm235_vm0, %v1765_v37, 0.0 }
 0x194   : > { %v1795_v45 = vsel %vm235_vm0, %v1763_v52, 0.0 }
 0x195   : > { %v1697_v44 = vadd.f32 %v1696_v48, %v1695_v33  ;;  %v1796_v47 = vadd.f32 %v1795_v45, %v1794_v39 }
 0x196   : > { %v1457_v62 = vld [vmem:[#allocation3 + $0x70] sm:$0xff] }
 0x197   : > { %v1798_v50 = vadd.f32 %v1797_v60, %v1796_v47  ;;  %4115 = vmatprep.mubr.msk.bf16.mxu0 %vm1479_vm11, %v1457_v62  ;;  %v1699_v63 = vadd.f32 %v1698_v59, %v1697_v44 }
 0x199   : > { %v1458_v41 = vld [vmem:[#allocation3 + $0x78] sm:$0xff]  ;;  %v1800_v57 = vadd.f32 %v1799_v29, %v1798_v50 }
 0x19a   : > { %4116 = vmatmul.mubr.msk.bf16.gmra.mrb[28].mxu0 %vm1479_vm11, %v1458_v41 }
 0x1ae   : > { %v4896_v55 = vpop.f32.mrb[4].mxu0 }
 0x1af   : > { %v4898_v58 = vpop.f32.mrb[5].mxu0  ;;  %v1768_v37 = vmul.f32 %v4896_v55, %v4896_v55  ;;  %v1704_v62 = vsel %vm235_vm0, %v4896_v55, 0.0 }
 0x1b0   : > { %v1700_v51 = vsel %vm235_vm0, %v4898_v58, 0.0  ;;  %v1766_v52 = vmul.f32 %v4898_v58, %v4898_v58  ;;  %v4904_v33 = vpop.f32.mrb[6].mxu0 }
 0x1b1   : > { %v1701_v48 = vadd.f32 %v1700_v51, %v1699_v63  ;;  %v4906_v39 = vpop.f32.mrb[7].mxu0  ;;  %v1769_v50 = vmul.f32 %v4904_v33, %v4904_v33  ;;  %v1805_v51 = vsel %vm235_vm0, %v1768_v37, 0.0 }
 0x1b2   : > { %v1801_v45 = vsel %vm235_vm0, %v1766_v52, 0.0  ;;  %v1702_v44 = vsel %vm235_vm0, %v4906_v39, 0.0  ;;  %v1767_v47 = vmul.f32 %v4906_v39, %v4906_v39  ;;  %v1706_v52 = vsel %vm235_vm0, %v4904_v33, 0.0 }
 0x1b3   : > { %v1802_v60 = vadd.f32 %v1801_v45, %v1800_v57  ;;  %v1703_v59 = vadd.f32 %v1702_v44, %v1701_v48  ;;  %v1807_v57 = vsel %vm235_vm0, %v1769_v50, 0.0 }
 0x1b4   : > { %v1803_v63 = vsel %vm235_vm0, %v1767_v47, 0.0 }
 0x1b5   : > { %v1705_v29 = vadd.f32 %v1704_v62, %v1703_v59  ;;  %v1804_v41 = vadd.f32 %v1803_v63, %v1802_v60 }
 0x1b7   : > { %v1806_v49 = vadd.f32 %v1805_v51, %v1804_v41  ;;  %v1707_v53 = vadd.f32 %v1706_v52, %v1705_v29 }
 0x1b9   : > { %v1808_v48 = vadd.f32 %v1807_v57, %v1806_v49 }
 0x1ce   : > { %v4924_v45 = vpop.f32.mrb[8].mxu0 }
 0x1cf   : > { %v4926_v44 = vpop.f32.mrb[9].mxu0  ;;  %v1772_v62 = vmul.f32 %v4924_v45, %v4924_v45  ;;  %v1712_v51 = vsel %vm235_vm0, %v4924_v45, 0.0 }
 0x1d0   : > { %v1708_v34 = vsel %vm235_vm0, %v4926_v44, 0.0  ;;  %v1770_v47 = vmul.f32 %v4926_v44, %v4926_v44  ;;  %v4932_v60 = vpop.f32.mrb[10].mxu0 }
 0x1d1   : > { %v1709_v37 = vadd.f32 %v1708_v34, %v1707_v53  ;;  %v4934_v59 = vpop.f32.mrb[11].mxu0  ;;  %v1773_v34 = vmul.f32 %v4932_v60, %v4932_v60  ;;  %v1714_v42 = vsel %vm235_vm0, %v4932_v60, 0.0 }
 0x1d2   : > { %v1809_v49 = vsel %vm235_vm0, %v1770_v47, 0.0  ;;  %v1710_v50 = vsel %vm235_vm0, %v4934_v59, 0.0  ;;  %v1771_v63 = vmul.f32 %v4934_v59, %v4934_v59  ;;  %v1813_v47 = vsel %vm235_vm0, %v1772_v62, 0.0 }
 0x1d3   : > { %v1810_v29 = vadd.f32 %v1809_v49, %v1808_v48  ;;  %v1711_v41 = vadd.f32 %v1710_v50, %v1709_v37  ;;  %v1815_v48 = vsel %vm235_vm0, %v1773_v34, 0.0 }
 0x1d4   : > { %v1811_v53 = vsel %vm235_vm0, %v1771_v63, 0.0 }
 0x1d5   : > { %v1713_v52 = vadd.f32 %v1712_v51, %v1711_v41  ;;  %v1812_v57 = vadd.f32 %v1811_v53, %v1810_v29 }
 0x1d7   : > { %v1814_v40 = vadd.f32 %v1813_v47, %v1812_v57  ;;  %v1715_v32 = vadd.f32 %v1714_v42, %v1713_v52 }
 0x1d9   : > { %v1816_v37 = vadd.f32 %v1815_v48, %v1814_v40 }
 0x1ee   : > { %v4952_v49 = vpop.f32.mrb[12].mxu0 }
 0x1ef   : > { %v4954_v50 = vpop.f32.mrb[13].mxu0  ;;  %v1776_v42 = vmul.f32 %v4952_v49, %v4952_v49  ;;  %v1720_v57 = vsel %vm235_vm0, %v4952_v49, 0.0 }
 0x1f0   : > { %v1716_v27 = vsel %vm235_vm0, %v4954_v50, 0.0  ;;  %v1774_v63 = vmul.f32 %v4954_v50, %v4954_v50  ;;  %v4960_v29 = vpop.f32.mrb[14].mxu0 }
 0x1f1   : > { %v1717_v62 = vadd.f32 %v1716_v27, %v1715_v32  ;;  %v4962_v41 = vpop.f32.mrb[15].mxu0  ;;  %v1777_v27 = vmul.f32 %v4960_v29, %v4960_v29  ;;  %v1722_v28 = vsel %vm235_vm0, %v4960_v29, 0.0 }
 0x1f2   : > { %v1817_v40 = vsel %vm235_vm0, %v1774_v63, 0.0  ;;  %v1718_v51 = vsel %vm235_vm0, %v4962_v41, 0.0  ;;  %v1775_v34 = vmul.f32 %v4962_v41, %v4962_v41  ;;  %v1821_v63 = vsel %vm235_vm0, %v1776_v42, 0.0 }
 0x1f3   : > { %v1818_v53 = vadd.f32 %v1817_v40, %v1816_v37  ;;  %v1719_v52 = vadd.f32 %v1718_v51, %v1717_v62  ;;  %v1823_v37 = vsel %vm235_vm0, %v1777_v27, 0.0 }
 0x1f4   : > { %v1819_v32 = vsel %vm235_vm0, %v1775_v34, 0.0 }
 0x1f5   : > { %v1721_v47 = vadd.f32 %v1720_v57, %v1719_v52  ;;  %v1820_v48 = vadd.f32 %v1819_v32, %v1818_v53 }
 0x1f7   : > { %v1822_v25 = vadd.f32 %v1821_v63, %v1820_v48  ;;  %v1723_v26 = vadd.f32 %v1722_v28, %v1721_v47 }
 0x1f9   : > { %v1824_v62 = vadd.f32 %v1823_v37, %v1822_v25 }
 0x20e   : > { %v4980_v40 = vpop.f32.mrb[16].mxu0 }
 0x20f   : > { %v4982_v51 = vpop.f32.mrb[17].mxu0  ;;  %v1780_v28 = vmul.f32 %v4980_v40, %v4980_v40  ;;  %v1728_v48 = vsel %vm235_vm0, %v4980_v40, 0.0 }
 0x210   : > { %v1724_v23 = vsel %vm235_vm0, %v4982_v51, 0.0  ;;  %v1778_v34 = vmul.f32 %v4982_v51, %v4982_v51  ;;  %v4988_v53 = vpop.f32.mrb[18].mxu0 }
 0x211   : > { %v1725_v42 = vadd.f32 %v1724_v23, %v1723_v26  ;;  %v4990_v52 = vpop.f32.mrb[19].mxu0  ;;  %v1781_v23 = vmul.f32 %v4988_v53, %v4988_v53  ;;  %v1730_v24 = vsel %vm235_vm0, %v4988_v53, 0.0 }
 0x212   : > { %v1825_v25 = vsel %vm235_vm0, %v1778_v34, 0.0  ;;  %v1726_v57 = vsel %vm235_vm0, %v4990_v52, 0.0  ;;  %v1779_v27 = vmul.f32 %v4990_v52, %v4990_v52  ;;  %v1829_v34 = vsel %vm235_vm0, %v1780_v28, 0.0 }
 0x213   : > { %v1826_v32 = vadd.f32 %v1825_v25, %v1824_v62  ;;  %v1727_v47 = vadd.f32 %v1726_v57, %v1725_v42  ;;  %v1831_v62 = vsel %vm235_vm0, %v1781_v23, 0.0 }
 0x214   : > { %v1827_v26 = vsel %vm235_vm0, %v1779_v27, 0.0 }
 0x215   : > { %v1729_v63 = vadd.f32 %v1728_v48, %v1727_v47  ;;  %v1828_v37 = vadd.f32 %v1827_v26, %v1826_v32 }
 0x217   : > { %v1830_v20 = vadd.f32 %v1829_v34, %v1828_v37  ;;  %v1731_v22 = vadd.f32 %v1730_v24, %v1729_v63 }
 0x219   : > { %v1832_v42 = vadd.f32 %v1831_v62, %v1830_v20 }
 0x22e   : > { %v5008_v25 = vpop.f32.mrb[20].mxu0 }
 0x22f   : > { %v5010_v57 = vpop.f32.mrb[21].mxu0  ;;  %v1784_v24 = vmul.f32 %v5008_v25, %v5008_v25  ;;  %v1736_v37 = vsel %vm235_vm0, %v5008_v25, 0.0 }
 0x230   : > { %v1732_v18 = vsel %vm235_vm0, %v5010_v57, 0.0  ;;  %v1782_v27 = vmul.f32 %v5010_v57, %v5010_v57  ;;  %v5016_v32 = vpop.f32.mrb[22].mxu0 }
 0x231   : > { %v1733_v28 = vadd.f32 %v1732_v18, %v1731_v22  ;;  %v5018_v47 = vpop.f32.mrb[23].mxu0  ;;  %v1785_v18 = vmul.f32 %v5016_v32, %v5016_v32  ;;  %v1738_v19 = vsel %vm235_vm0, %v5016_v32, 0.0 }
 0x232   : > { %v1833_v20 = vsel %vm235_vm0, %v1782_v27, 0.0  ;;  %v1734_v48 = vsel %vm235_vm0, %v5018_v47, 0.0  ;;  %v1783_v23 = vmul.f32 %v5018_v47, %v5018_v47  ;;  %v1837_v27 = vsel %vm235_vm0, %v1784_v24, 0.0 }
 0x233   : > { %v1834_v26 = vadd.f32 %v1833_v20, %v1832_v42  ;;  %v1735_v63 = vadd.f32 %v1734_v48, %v1733_v28  ;;  %v1839_v42 = vsel %vm235_vm0, %v1785_v18, 0.0 }
 0x234   : > { %v1835_v22 = vsel %vm235_vm0, %v1783_v23, 0.0 }
 0x235   : > { %v1737_v34 = vadd.f32 %v1736_v37, %v1735_v63  ;;  %v1836_v62 = vadd.f32 %v1835_v22, %v1834_v26 }
 0x237   : > { %v1838_v10 = vadd.f32 %v1837_v27, %v1836_v62  ;;  %v1739_v13 = vadd.f32 %v1738_v19, %v1737_v34 }
 0x239   : > { %v1840_v28 = vadd.f32 %v1839_v42, %v1838_v10 }
 0x24e   : > { %v5036_v20 = vpop.f32.mrb[24].mxu0 }
 0x24f   : > { %v5038_v48 = vpop.f32.mrb[25].mxu0  ;;  %v1788_v19 = vmul.f32 %v5036_v20, %v5036_v20  ;;  %v1744_v62 = vsel %vm235_vm0, %v5036_v20, 0.0 }
 0x250   : > { %v1740_v17 = vsel %vm235_vm0, %v5038_v48, 0.0  ;;  %v1786_v23 = vmul.f32 %v5038_v48, %v5038_v48  ;;  %v5044_v26 = vpop.f32.mrb[26].mxu0 }
 0x251   : > { %v1741_v24 = vadd.f32 %v1740_v17, %v1739_v13  ;;  %v5046_v63 = vpop.f32.mrb[27].mxu0  ;;  %v1789_v13 = vmul.f32 %v5044_v26, %v5044_v26  ;;  %v1746_v6 = vsel %vm235_vm0, %v5044_v26, 0.0 }
 0x252   : > { %v1841_v10 = vsel %vm235_vm0, %v1786_v23, 0.0  ;;  %v1742_v37 = vsel %vm235_vm0, %v5046_v63, 0.0  ;;  %v1787_v18 = vmul.f32 %v5046_v63, %v5046_v63  ;;  %v1845_v23 = vsel %vm235_vm0, %v1788_v19, 0.0 }
 0x253   : > { %v1842_v22 = vadd.f32 %v1841_v10, %v1840_v28  ;;  %v1743_v34 = vadd.f32 %v1742_v37, %v1741_v24  ;;  %v1847_v28 = vsel %vm235_vm0, %v1789_v13, 0.0 }
 0x254   : > { %v1843_v17 = vsel %vm235_vm0, %v1787_v18, 0.0 }
 0x255   : > { %v1745_v27 = vadd.f32 %v1744_v62, %v1743_v34  ;;  %v1844_v42 = vadd.f32 %v1843_v17, %v1842_v22 }
 0x257   : > { %v1846_v12 = vadd.f32 %v1845_v23, %v1844_v42  ;;  %v1747_v5 = vadd.f32 %v1746_v6, %v1745_v27 }
 0x259   : > { %v1848_v24 = vadd.f32 %v1847_v28, %v1846_v12 }
 0x26d   : > { %v5064_v10 = vpop.f32.mrb[28].mxu0 }
 0x26e   : > { %v5066_v37 = vpop.f32.mrb[29].mxu0  ;;  %v1792_v6 = vmul.f32 %v5064_v10, %v5064_v10  ;;  %v1752_v42 = vsel %vm235_vm0, %v5064_v10, 0.0 }
 0x26f   : > { %v1748_v11 = vsel %vm235_vm0, %v5066_v37, 0.0  ;;  %v1790_v18 = vmul.f32 %v5066_v37, %v5066_v37  ;;  %v5072_v22 = vpop.f32.mrb[30].mxu0 }
 0x270   : > { %v1749_v19 = vadd.f32 %v1748_v11, %v1747_v5  ;;  %v5074_v34 = vpop.f32.mrb[31].mxu0  ;;  %v1793_v5 = vmul.f32 %v5072_v22, %v5072_v22  ;;  %v1754_v43 = vsel %vm235_vm0, %v5072_v22, 0.0 }
 0x271   : > { %v1849_v12 = vsel %vm235_vm0, %v1790_v18, 0.0  ;;  %v1750_v62 = vsel %vm235_vm0, %v5074_v34, 0.0  ;;  %v1791_v13 = vmul.f32 %v5074_v34, %v5074_v34  ;;  %v1853_v18 = vsel %vm235_vm0, %v1792_v6, 0.0 }
 0x272   : > { %v1850_v17 = vadd.f32 %v1849_v12, %v1848_v24  ;;  %v1751_v27 = vadd.f32 %v1750_v62, %v1749_v19  ;;  %v1855_v24 = vsel %vm235_vm0, %v1793_v5, 0.0 }
 0x273   : > { %v1851_v11 = vsel %vm235_vm0, %v1791_v13, 0.0 }
 0x274   : > { %v1753_v23 = vadd.f32 %v1752_v42, %v1751_v27  ;;  %v1852_v28 = vadd.f32 %v1851_v11, %v1850_v17 }
 0x276   : > { %v1755_v38 = vadd.f32 %v1754_v43, %v1753_v23  ;;  %v1854_v0 = vadd.f32 %v1853_v18, %v1852_v28 }
 0x278   : > { %v1756_v19 = vrot.slane %v1755_v38, 4  ;;  %v1856_v12 = vadd.f32 %v1855_v24, %v1854_v0 }
 0x27a   : > { %v1757_v62 = vadd.f32 %v1756_v19, %v1755_v38  ;;  %v1857_v56 = vrot.slane %v1856_v12, 4 }
 0x27c   : > { %v1758_v36 = vrot.slane %v1757_v62, 2  ;;  %v1858_v35 = vadd.f32 %v1857_v56, %v1856_v12 }
 0x27e   : > { %v1759_v31 = vadd.f32 %v1758_v36, %v1757_v62  ;;  %v1859_v21 = vrot.slane %v1858_v35, 2 }
 0x280   : > { %v1760_v13 = vrot.slane %v1759_v31, 1  ;;  %v1860_v27 = vadd.f32 %v1859_v21, %v1858_v35 }
 0x282   : > { %v1761_v17 = vadd.f32 %v1760_v13, %v1759_v31  ;;  %v1861_v42 = vrot.slane %v1860_v27, 1 }
 0x284   : > { %v1862_v6 = vadd.f32 %v1861_v42, %v1860_v27  ;;  %v5092_v11 = vmul.f32 0.00390625, %v1761_v17 }
 0x286   : > { %v1864_v16 = vmul.f32 0.00390625, %v1862_v6  ;;  %v1865_v43 = vmul.f32 %v5092_v11, %v5092_v11  ;;  %v1897_v0 = vsub.f32 %v5074_v34, %v5092_v11  ;;  %v1868_v38 = vsub.f32 %v4867_v46, %v5092_v11 }
 0x287   : > { %v1869_v36 = vsub.f32 %v4874_v30, %v5092_v11  ;;  %v1870_v21 = vsub.f32 %v4864_v61, %v5092_v11  ;;  %v1871_v31 = vsub.f32 %v4871_v54, %v5092_v11  ;;  %v1872_v35 = vsub.f32 %v4898_v58, %v5092_v11 }
 0x288   : > { %v1866_v56 = vsub.f32 %v1864_v16, %v1865_v43  ;;  %v1873_v5 = vsub.f32 %v4906_v39, %v5092_v11  ;;  %v1874_v34 = vsub.f32 %v4896_v55, %v5092_v11  ;;  %v1875_v46 = vsub.f32 %v4904_v33, %v5092_v11 }
 0x289   : > { %v1876_v30 = vsub.f32 %v4926_v44, %v5092_v11  ;;  %v1877_v61 = vsub.f32 %v4934_v59, %v5092_v11  ;;  %v1878_v54 = vsub.f32 %v4924_v45, %v5092_v11  ;;  %v1879_v16 = vsub.f32 %v4932_v60, %v5092_v11 }
 0x28a   : > { %v1867_v58 = vmax.f32 %v1866_v56, 0.0  ;;  %v1880_v39 = vsub.f32 %v4954_v50, %v5092_v11  ;;  %v1881_v55 = vsub.f32 %v4962_v41, %v5092_v11  ;;  %v1882_v33 = vsub.f32 %v4952_v49, %v5092_v11 }
 0x28b   : > { %v1883_v44 = vsub.f32 %v4960_v29, %v5092_v11  ;;  %v1884_v59 = vsub.f32 %v4982_v51, %v5092_v11  ;;  %v1885_v45 = vsub.f32 %v4990_v52, %v5092_v11  ;;  %v1886_v60 = vsub.f32 %v4980_v40, %v5092_v11 }
 0x28c   : > { %v1900_v23 = vadd.f32 1e-05, %v1867_v58  ;;  %v1887_v50 = vsub.f32 %v4988_v53, %v5092_v11  ;;  %v1888_v41 = vsub.f32 %v5010_v57, %v5092_v11  ;;  %v1889_v49 = vsub.f32 %v5018_v47, %v5092_v11 }
 0x28d   : > { %v1890_v29 = vsub.f32 %v5008_v25, %v5092_v11  ;;  %v1891_v51 = vsub.f32 %v5016_v32, %v5092_v11  ;;  %v1892_v52 = vsub.f32 %v5038_v48, %v5092_v11  ;;  %v1893_v40 = vsub.f32 %v5046_v63, %v5092_v11 }
 0x28e   : > { %4204 = vrsqrt.f32 %v1900_v23  ;;  %v1894_v53 = vsub.f32 %v5036_v20, %v5092_v11  ;;  %v1895_v57 = vsub.f32 %v5044_v26, %v5092_v11  ;;  %v1896_v47 = vsub.f32 %v5066_v37, %v5092_v11 }
 0x28f   : > { %v1898_v25 = vsub.f32 %v5064_v10, %v5092_v11  ;;  %v1899_v32 = vsub.f32 %v5072_v22, %v5092_v11 }
 0x298   : > { %v4205_v48 = vpop.eup %4204 }
 0x299   : > { %v1931_v28 = vmul.f32 %v4205_v48, %v1897_v0  ;;  %v1904_v18 = vmul.f32 %v4205_v48, %v1870_v21  ;;  %v1905_v63 = vmul.f32 %v4205_v48, %v1871_v31  ;;  %v1902_v24 = vmul.f32 %v4205_v48, %v1868_v38 }
 0x29a   : > { %v1903_v19 = vmul.f32 %v4205_v48, %v1869_v36  ;;  %v1906_v12 = vmul.f32 %v4205_v48, %v1872_v35  ;;  %v1907_v20 = vmul.f32 %v4205_v48, %v1873_v5  ;;  %v1908_v62 = vmul.f32 %v4205_v48, %v1874_v34 }
 0x29b   : > { %v1963_v13 = vmax.f32 %v1931_v28, 0.0  ;;  %v1936_v26 = vmax.f32 %v1904_v18, 0.0  ;;  %v1937_v27 = vmax.f32 %v1905_v63, 0.0  ;;  %v1909_v17 = vmul.f32 %v4205_v48, %v1875_v46 }
 0x29c   : > { %v1910_v37 = vmul.f32 %v4205_v48, %v1876_v30  ;;  %v1911_v42 = vmul.f32 %v4205_v48, %v1877_v61  ;;  %v1912_v6 = vmul.f32 %v4205_v48, %v1878_v54  ;;  %v1913_v10 = vmul.f32 %v4205_v48, %v1879_v16 }
 0x29d   : > { %2001 = vst.msk [vmem:[#allocation2 + $0x1a1] sm:$0xff] %vm235_vm0, %v1963_v13  ;;  %1995 = vst.msk [vmem:[#allocation2 + $0x171] sm:$0xff] %vm235_vm0, %v1963_v13  ;;  %v1914_v22 = vmul.f32 %v4205_v48, %v1880_v39  ;;  %v1915_v11 = vmul.f32 %v4205_v48, %v1881_v55  ;;  %v1916_v43 = vmul.f32 %v4205_v48, %v1882_v33  ;;  %v1934_v55 = vmax.f32 %v1902_v24, 0.0 }
 0x29e   : > { %1998 = vst.msk [vmem:[#allocation2 + $0x1] sm:$0xff] %vm235_vm0, %v1936_v26  ;;  %1999 = vst.msk [vmem:[#allocation2 + $0x9] sm:$0xff] %vm235_vm0, %v1937_v27  ;;  %v1917_v0 = vmul.f32 %v4205_v48, %v1883_v44  ;;  %v1918_v38 = vmul.f32 %v4205_v48, %v1884_v59  ;;  %v1919_v36 = vmul.f32 %v4205_v48, %v1885_v45  ;;  %v1935_v33 = vmax.f32 %v1903_v19, 0.0 }
 0x29f   : > { %1968 = vst.msk [vmem:[#allocation2 + $0x31] sm:$0xff] %vm235_vm0, %v1936_v26  ;;  %1969 = vst.msk [vmem:[#allocation2 + $0x39] sm:$0xff] %vm235_vm0, %v1937_v27  ;;  %v5166_v21 = vmul.f32 %v4205_v48, %v1886_v60  ;;  %v5168_v31 = vmul.f32 %v4205_v48, %v1887_v50  ;;  %v5170_v35 = vmul.f32 %v4205_v48, %v1888_v41  ;;  %v1938_v44 = vmax.f32 %v1906_v12, 0.0 }
 0x2a0   : > { %v5172_v56 = vmul.f32 %v4205_v48, %v1889_v49  ;;  %v5174_v5 = vmul.f32 %v4205_v48, %v1890_v29  ;;  %v5176_v34 = vmul.f32 %v4205_v48, %v1891_v51  ;;  %v5178_v46 = vmul.f32 %v4205_v48, %v1892_v52  ;;  %1966 = vst.msk [vmem:[#allocation2 + $0x19] sm:$0xff] %vm235_vm0, %v1934_v55 }
 0x2a1   : > { %v5180_v30 = vmul.f32 %v4205_v48, %v1893_v40  ;;  %v5182_v61 = vmul.f32 %v4205_v48, %v1894_v53  ;;  %v5184_v54 = vmul.f32 %v4205_v48, %v1895_v57  ;;  %v5186_v16 = vmul.f32 %v4205_v48, %v1896_v47  ;;  %1967 = vst.msk [vmem:[#allocation2 + $0x21] sm:$0xff] %vm235_vm0, %v1935_v33 }
 0x2a2   : > { %v5188_v58 = vmul.f32 %v4205_v48, %v1898_v25  ;;  %v5190_v39 = vmul.f32 %v4205_v48, %v1899_v32  ;;  %v1939_v59 = vmax.f32 %v1907_v20, 0.0  ;;  %v1940_v45 = vmax.f32 %v1908_v62, 0.0  ;;  %1970 = vst.msk [vmem:[#allocation2 + $0x49] sm:$0xff] %vm235_vm0, %v1938_v44 }
 0x2a3   : > { %v1941_v60 = vmax.f32 %v1909_v17, 0.0  ;;  %v1942_v23 = vmax.f32 %v1910_v37, 0.0  ;;  %v1943_v50 = vmax.f32 %v1911_v42, 0.0  ;;  %v1944_v41 = vmax.f32 %v1912_v6, 0.0 }
 0x2a4   : > { %v1945_v51 = vmax.f32 %v1913_v10, 0.0  ;;  %v1946_v52 = vmax.f32 %v1914_v22, 0.0  ;;  %v1947_v40 = vmax.f32 %v1915_v11, 0.0  ;;  %v1948_v53 = vmax.f32 %v1916_v43, 0.0  ;;  %1971 = vst.msk [vmem:[#allocation2 + $0x51] sm:$0xff] %vm235_vm0, %v1939_v59  ;;  %1972 = vst.msk [vmem:[#allocation2 + $0x61] sm:$0xff] %vm235_vm0, %v1940_v45 }
 0x2a5   : > { %v2138_v49 = vld [vmem:[#allocation2 + $0x1] sm:$0xff]  ;;  %v2139_v29 = vld [vmem:[#allocation2 + $0x9] sm:$0xff]  ;;  %v1949_v47 = vmax.f32 %v1917_v0, 0.0  ;;  %v1950_v25 = vmax.f32 %v1918_v38, 0.0  ;;  %v1951_v32 = vmax.f32 %v1919_v36, 0.0  ;;  %1973 = vst.msk [vmem:[#allocation2 + $0x69] sm:$0xff] %vm235_vm0, %v1941_v60 }
 0x2a6   : > { %v2170_v57 = vpack.c.bf16 %v2139_v29, %v2138_v49  ;;  %1974 = vst.msk [vmem:[#allocation2 + $0x79] sm:$0xff] %vm235_vm0, %v1942_v23  ;;  %1975 = vst.msk [vmem:[#allocation2 + $0x81] sm:$0xff] %vm235_vm0, %v1943_v50  ;;  %v1952_v48 = vmax.f32 %v5166_v21, 0.0  ;;  %v1953_v28 = vmax.f32 %v5168_v31, 0.0  ;;  %v1954_v18 = vmax.f32 %v5170_v35, 0.0  ;;  %v2524_v38 = vld [vmem:[#allocation2 + $0x31] sm:$0xff] }
 0x2a7   : > { %1976 = vst.msk [vmem:[#allocation2 + $0x91] sm:$0xff] %vm235_vm0, %v1944_v41  ;;  %v1955_v63 = vmax.f32 %v5172_v56, 0.0  ;;  %1977 = vst.msk [vmem:[#allocation2 + $0x99] sm:$0xff] %vm235_vm0, %v1945_v51  ;;  %v2038_v24 = vld [vmem:[#allocation2 + $0xf] sm:$0x1]  ;;  %v1956_v19 = vmax.f32 %v5174_v5, 0.0 }
 0x2a8   : > { %1978 = vst.msk [vmem:[#allocation2 + $0xa9] sm:$0xff] %vm235_vm0, %v1946_v52  ;;  %1979 = vst.msk [vmem:[#allocation2 + $0xb1] sm:$0xff] %vm235_vm0, %v1947_v40  ;;  %2202 = vrot.lane.b32.xlu0 %v2170_v57, %s4216_s18  ;;  %v1957_v12 = vmax.f32 %v5176_v34, 0.0  ;;  %v1958_v20 = vmax.f32 %v5178_v46, 0.0  ;;  %v1959_v62 = vmax.f32 %v5180_v30, 0.0  ;;  %v1960_v26 = vmax.f32 %v5182_v61, 0.0 }
 0x2a9   : > { %1980 = vst.msk [vmem:[#allocation2 + $0xc1] sm:$0xff] %vm235_vm0, %v1948_v53  ;;  %1981 = vst.msk [vmem:[#allocation2 + $0xc9] sm:$0xff] %vm235_vm0, %v1949_v47  ;;  %v2004_v13 = vld [vmem:[#allocation2 + $0x32] sm:$0x1]  ;;  %v1961_v27 = vmax.f32 %v5184_v54, 0.0  ;;  %v1962_v17 = vmax.f32 %v5186_v16, 0.0 }
 0x2aa   : > { %1982 = vst.msk [vmem:[#allocation2 + $0xd9] sm:$0xff] %vm235_vm0, %v1950_v25  ;;  %1983 = vst.msk [vmem:[#allocation2 + $0xe1] sm:$0xff] %vm235_vm0, %v1951_v32  ;;  %v1964_v37 = vmax.f32 %v5188_v58, 0.0  ;;  %v1965_v42 = vmax.f32 %v5190_v39, 0.0  ;;  %v2040_v6 = vld [vmem:[#allocation2 + $0x3f] sm:$0x1] }
 0x2ab   : > { %2056 = vst.msk [vmem:[#allocation2 + $0x11] sm:$0x1] %vm291_vm1, %v2038_v24  ;;  %2022 = vst.msk [vmem:[#allocation2 + $0x30] sm:$0x1] %vm291_vm1, %v2004_v13  ;;  %v2002_v10 = vld [vmem:[#allocation2 + $0x2] sm:$0x1] }
 0x2ac   : > { %1984 = vst.msk [vmem:[#allocation2 + $0xf1] sm:$0xff] %vm235_vm0, %v1952_v48  ;;  %1985 = vst.msk [vmem:[#allocation2 + $0xf9] sm:$0xff] %vm235_vm0, %v1953_v28  ;;  %v2140_v22 = vld [vmem:[#allocation2 + $0x19] sm:$0xff]  ;;  %v2141_v43 = vld [vmem:[#allocation2 + $0x21] sm:$0xff] }
 0x2ad   : > { %1986 = vst.msk [vmem:[#allocation2 + $0x109] sm:$0xff] %vm235_vm0, %v1954_v18  ;;  %1987 = vst.msk [vmem:[#allocation2 + $0x111] sm:$0xff] %vm235_vm0, %v1955_v63  ;;  %v2003_v11 = vld [vmem:[#allocation2 + $0x1a] sm:$0x1]  ;;  %v2171_v0 = vpack.c.bf16 %v2141_v43, %v2140_v22  ;;  %v2908_v31 = vld [vmem:[#allocation2 + $0x49] sm:$0xff] }
 0x2ae   : > { %1988 = vst.msk [vmem:[#allocation2 + $0x121] sm:$0xff] %vm235_vm0, %v1956_v19  ;;  %1989 = vst.msk [vmem:[#allocation2 + $0x129] sm:$0xff] %vm235_vm0, %v1957_v12  ;;  %v2525_v36 = vld [vmem:[#allocation2 + $0x39] sm:$0xff]  ;;  %v2909_v35 = vld [vmem:[#allocation2 + $0x51] sm:$0xff] }
 0x2af   : > { %1990 = vst.msk [vmem:[#allocation2 + $0x139] sm:$0xff] %vm235_vm0, %v1958_v20  ;;  %1991 = vst.msk [vmem:[#allocation2 + $0x141] sm:$0xff] %vm235_vm0, %v1959_v62  ;;  %2204 = vrot.lane.b32.xlu1 %v2171_v0, %s4216_s18  ;;  %2586 = vrot.lane.b32.xlu0 %v2171_v0, %s4217_s19  ;;  %v2555_v21 = vpack.c.bf16 %v2525_v36, %v2524_v38  ;;  %v2779_v5 = vld [vmem:[#allocation2 + $0x38] sm:$0xff]  ;;  %v2939_v34 = vpack.c.bf16 %v2909_v35, %v2908_v31  ;;  %v2910_v46 = vld [vmem:[#allocation2 + $0x61] sm:$0xff] }
 0x2b0   : > { %1992 = vst.msk [vmem:[#allocation2 + $0x151] sm:$0xff] %vm235_vm0, %v1960_v26  ;;  %1993 = vst.msk [vmem:[#allocation2 + $0x159] sm:$0xff] %vm235_vm0, %v1961_v27  ;;  %v2395_v30 = vld [vmem:[#allocation2 + $0x20] sm:$0xff]  ;;  %v2911_v54 = vld [vmem:[#allocation2 + $0x69] sm:$0xff] }
 0x2b1   : > { %1994 = vst.msk [vmem:[#allocation2 + $0x169] sm:$0xff] %vm235_vm0, %v1962_v17  ;;  %1996 = vst.msk [vmem:[#allocation2 + $0x181] sm:$0xff] %vm235_vm0, %v1964_v37  ;;  %v2039_v61 = vld [vmem:[#allocation2 + $0x27] sm:$0x1]  ;;  %v2041_v39 = vld [vmem:[#allocation2 + $0x57] sm:$0x1]  ;;  %v5256_v45 = vpack.c.bf16 %v2911_v54, %v2910_v46 }
 0x2b2   : > { %2000 = vst.msk [vmem:[#allocation2 + $0x199] sm:$0xff] %vm235_vm0, %v1962_v17  ;;  %1997 = vst.msk [vmem:[#allocation2 + $0x189] sm:$0xff] %vm235_vm0, %v1965_v42  ;;  %v2778_v58 = vld [vmem:[#allocation2 + $0x30] sm:$0xff]  ;;  %v2005_v33 = vld [vmem:[#allocation2 + $0x4a] sm:$0x1] }
 0x2b3   : > { %2058 = vst.msk [vmem:[#allocation2 + $0x41] sm:$0x1] %vm291_vm1, %v2040_v6  ;;  %2020 = vst.msk [vmem:[#allocation2] sm:$0x1] %vm291_vm1, %v2002_v10  ;;  %2588 = vrot.lane.b32.xlu1 %v2555_v21, %s4217_s19  ;;  %2970 = vrot.lane.b32.xlu0 %v2555_v21, %s4218_s20  ;;  %v5250_v55 = vpack.c.bf16 %v2779_v5, %v2778_v58  ;;  %v2006_v44 = vld [vmem:[#allocation2 + $0x62] sm:$0x1] }
 0x2b4   : > { %2021 = vst.msk [vmem:[#allocation2 + $0x18] sm:$0x1] %vm291_vm1, %v2003_v11  ;;  %2057 = vst.msk [vmem:[#allocation2 + $0x29] sm:$0x1] %vm291_vm1, %v2039_v61  ;;  %v2042_v59 = vld [vmem:[#allocation2 + $0x6f] sm:$0x1] }
 0x2b5   : > { %2059 = vst.msk [vmem:[#allocation2 + $0x59] sm:$0x1] %vm291_vm1, %v2041_v39  ;;  %2023 = vst.msk [vmem:[#allocation2 + $0x48] sm:$0x1] %vm291_vm1, %v2005_v33  ;;  %v2043_v60 = vld [vmem:[#allocation2 + $0x87] sm:$0x1] }
 0x2b6   : > { %2024 = vst.msk [vmem:[#allocation2 + $0x60] sm:$0x1] %vm291_vm1, %v2006_v44  ;;  %2060 = vst.msk [vmem:[#allocation2 + $0x71] sm:$0x1] %vm291_vm1, %v2042_v59  ;;  %v2530_v23 = vld [vmem:[#allocation2 + $0x79] sm:$0xff]  ;;  %v2531_v50 = vld [vmem:[#allocation2 + $0x81] sm:$0xff] }
 0x2b7   : > { %2972 = vrot.lane.b32.xlu1 %v2939_v34, %s4218_s20  ;;  %2590 = vrot.lane.b32.xlu0 %v2939_v34, %s4217_s19  ;;  %2124 = vst.msk [vmem:[#allocation3 + $0x10] sm:$0xff] %vm235_vm0, %v5250_v55  ;;  %v2007_v41 = vld [vmem:[#allocation2 + $0x7a] sm:$0x1]  ;;  %v2075_v29 = vld [vmem:[#allocation2 + $0x8] sm:$0xff]  ;;  %v2008_v51 = vld [vmem:[#allocation2 + $0x92] sm:$0x1]  ;;  %v5268_v57 = vpack.c.bf16 %v2531_v50, %v2530_v23 }
 0x2b8   : > { %2061 = vst.msk [vmem:[#allocation2 + $0x89] sm:$0x1] %vm291_vm1, %v2043_v60  ;;  %2025 = vst.msk [vmem:[#allocation2 + $0x78] sm:$0x1] %vm291_vm1, %v2007_v41  ;;  %v2044_v40 = vld [vmem:[#allocation2 + $0x9f] sm:$0x1] }
 0x2b9   : > { %2026 = vst.msk [vmem:[#allocation2 + $0x90] sm:$0x1] %vm291_vm1, %v2008_v51  ;;  %v2045_v53 = vld [vmem:[#allocation2 + $0xb7] sm:$0x1]  ;;  %2062 = vst.msk [vmem:[#allocation2 + $0xa1] sm:$0x1] %vm291_vm1, %v2044_v40 }
 0x2ba   : > { %v2074_v49 = vld [vmem:[#allocation2] sm:$0xff]  ;;  %2063 = vst.msk [vmem:[#allocation2 + $0xb9] sm:$0x1] %vm291_vm1, %v2045_v53  ;;  %v2009_v47 = vld [vmem:[#allocation2 + $0xaa] sm:$0x1]  ;;  %v2914_v25 = vld [vmem:[#allocation2 + $0x91] sm:$0xff] }
 0x2bb   : > { %v2394_v56 = vld [vmem:[#allocation2 + $0x18] sm:$0xff]  ;;  %2206 = vrot.lane.b32.xlu1 %v2555_v21, %s4216_s18  ;;  %2974 = vrot.lane.b32.xlu0 %v5256_v45, %s4218_s20  ;;  %v2106_v52 = vpack.c.bf16 %v2075_v29, %v2074_v49  ;;  %2027 = vst.msk [vmem:[#allocation2 + $0xa8] sm:$0x1] %vm291_vm1, %v2009_v47  ;;  %v2010_v48 = vld [vmem:[#allocation2 + $0xc2] sm:$0x1]  ;;  %v2399_v18 = vld [vmem:[#allocation2 + $0x50] sm:$0xff] }
 0x2bc   : > { %v5245_v16 = vpack.c.bf16 %v2395_v30, %v2394_v56  ;;  %v2915_v32 = vld [vmem:[#allocation2 + $0x99] sm:$0xff]  ;;  %v2398_v28 = vld [vmem:[#allocation2 + $0x48] sm:$0xff]  ;;  %2028 = vst.msk [vmem:[#allocation2 + $0xc0] sm:$0x1] %vm291_vm1, %v2010_v48  ;;  %v2535_v13 = vld [vmem:[#allocation2 + $0xb1] sm:$0xff] }
 0x2bd   : > { %2122 = vst.msk [vmem:[#allocation3] sm:$0xff] %vm235_vm0, %v2106_v52  ;;  %v2046_v63 = vld [vmem:[#allocation2 + $0xcf] sm:$0x1]  ;;  %v5278_v24 = vpack.c.bf16 %v2399_v18, %v2398_v28  ;;  %v2782_v19 = vld [vmem:[#allocation2 + $0x60] sm:$0xff]  ;;  %v5281_v20 = vpack.c.bf16 %v2915_v32, %v2914_v25  ;;  %v2011_v42 = vld [vmem:[#allocation2 + $0xda] sm:$0x1] }
 0x2be   : > { %2123 = vst.msk [vmem:[#allocation3 + $0x8] sm:$0xff] %vm235_vm0, %v5245_v16  ;;  %v2783_v12 = vld [vmem:[#allocation2 + $0x68] sm:$0xff]  ;;  %v2047_v27 = vld [vmem:[#allocation2 + $0xe7] sm:$0x1]  ;;  %v2787_v22 = vld [vmem:[#allocation2 + $0x98] sm:$0xff] }
 0x2bf   : > { %2208 = vrot.lane.b32.xlu1 %v2939_v34, %s4216_s18  ;;  %2594 = vrot.lane.b32.xlu0 %v5268_v57, %s4217_s19  ;;  %2064 = vst.msk [vmem:[#allocation2 + $0xd1] sm:$0x1] %vm291_vm1, %v2046_v63  ;;  %v2534_v62 = vld [vmem:[#allocation2 + $0xa9] sm:$0xff]  ;;  %v5283_v26 = vpack.c.bf16 %v2783_v12, %v2782_v19  ;;  %v2402_v17 = vld [vmem:[#allocation2 + $0x78] sm:$0xff]  ;;  %v2403_v37 = vld [vmem:[#allocation2 + $0x80] sm:$0xff] }
 0x2c0   : > { %2125 = vst.msk [vmem:[#allocation3 + $0x18] sm:$0xff] %vm235_vm0, %v5278_v24  ;;  %v5292_v6 = vpack.c.bf16 %v2403_v37, %v2402_v17  ;;  %v2786_v10 = vld [vmem:[#allocation2 + $0x90] sm:$0xff]  ;;  %v2918_v43 = vld [vmem:[#allocation2 + $0xc1] sm:$0xff]  ;;  %v2048_v36 = vld [vmem:[#allocation2 + $0xff] sm:$0x1]  ;;  %v5300_v21 = vpack.c.bf16 %v2535_v13, %v2534_v62 }
 0x2c1   : > { %2065 = vst.msk [vmem:[#allocation2 + $0xe9] sm:$0x1] %vm291_vm1, %v2047_v27  ;;  %2029 = vst.msk [vmem:[#allocation2 + $0xd8] sm:$0x1] %vm291_vm1, %v2011_v42  ;;  %v2012_v11 = vld [vmem:[#allocation2 + $0xf2] sm:$0x1]  ;;  %v5297_v38 = vpack.c.bf16 %v2787_v22, %v2786_v10 }
 0x2c2   : > { %2126 = vst.msk [vmem:[#allocation3 + $0x20] sm:$0xff] %vm235_vm0, %v5283_v26  ;;  %v2919_v0 = vld [vmem:[#allocation2 + $0xc9] sm:$0xff]  ;;  %2127 = vst.msk [vmem:[#allocation3 + $0x28] sm:$0xff] %vm235_vm0, %v5292_v6  ;;  %v2049_v56 = vld [vmem:[#allocation2 + $0x117] sm:$0x1] }
 0x2c3   : > { %2592 = vrot.lane.b32.xlu1 %v5256_v45, %s4217_s19  ;;  %2978 = vrot.lane.b32.xlu0 %v5281_v20, %s4218_s20  ;;  %2030 = vst.msk [vmem:[#allocation2 + $0xf0] sm:$0x1] %vm291_vm1, %v2012_v11  ;;  %v2406_v31 = vld [vmem:[#allocation2 + $0xa8] sm:$0xff]  ;;  %v2407_v35 = vld [vmem:[#allocation2 + $0xb0] sm:$0xff]  ;;  %2066 = vst.msk [vmem:[#allocation2 + $0x101] sm:$0x1] %vm291_vm1, %v2048_v36  ;;  %v5320_v39 = vpack.c.bf16 %v2919_v0, %v2918_v43 }
 0x2c4   : > { %v5305_v5 = vpack.c.bf16 %v2407_v35, %v2406_v31  ;;  %v2790_v34 = vld [vmem:[#allocation2 + $0xc0] sm:$0xff]  ;;  %v2791_v46 = vld [vmem:[#allocation2 + $0xc8] sm:$0xff]  ;;  %2128 = vst.msk [vmem:[#allocation3 + $0x30] sm:$0xff] %vm235_vm0, %v5297_v38  ;;  %v2015_v50 = vld [vmem:[#allocation2 + $0x13a] sm:$0x1] }
 0x2c5   : > { %2067 = vst.msk [vmem:[#allocation2 + $0x119] sm:$0x1] %vm291_vm1, %v2049_v56  ;;  %v2013_v30 = vld [vmem:[#allocation2 + $0x10a] sm:$0x1]  ;;  %v5314_v61 = vpack.c.bf16 %v2791_v46, %v2790_v34  ;;  %v2014_v54 = vld [vmem:[#allocation2 + $0x122] sm:$0x1] }
 0x2c6   : > { %2031 = vst.msk [vmem:[#allocation2 + $0x108] sm:$0x1] %vm291_vm1, %v2013_v30  ;;  %2032 = vst.msk [vmem:[#allocation2 + $0x120] sm:$0x1] %vm291_vm1, %v2014_v54  ;;  %v2050_v58 = vld [vmem:[#allocation2 + $0x12f] sm:$0x1] }
 0x2c7   : > { %2976 = vrot.lane.b32.xlu1 %v5268_v57, %s4218_s20  ;;  %2598 = vrot.lane.b32.xlu0 %v5300_v21, %s4217_s19  ;;  %2129 = vst.msk [vmem:[#allocation3 + $0x38] sm:$0xff] %vm235_vm0, %v5305_v5  ;;  %v2538_v33 = vld [vmem:[#allocation2 + $0xd9] sm:$0xff]  ;;  %v2539_v44 = vld [vmem:[#allocation2 + $0xe1] sm:$0xff]  ;;  %2130 = vst.msk [vmem:[#allocation3 + $0x40] sm:$0xff] %vm235_vm0, %v5314_v61 }
 0x2c8   : > { %2068 = vst.msk [vmem:[#allocation2 + $0x131] sm:$0x1] %vm291_vm1, %v2050_v58  ;;  %v2051_v59 = vld [vmem:[#allocation2 + $0x147] sm:$0x1]  ;;  %v2410_v60 = vld [vmem:[#allocation2 + $0xd8] sm:$0xff]  ;;  %v5336_v53 = vpack.c.bf16 %v2539_v44, %v2538_v33  ;;  %v2415_v48 = vld [vmem:[#allocation2 + $0x110] sm:$0xff] }
 0x2c9   : > { %v2411_v23 = vld [vmem:[#allocation2 + $0xe0] sm:$0xff]  ;;  %2069 = vst.msk [vmem:[#allocation2 + $0x149] sm:$0x1] %vm291_vm1, %v2051_v59  ;;  %v2795_v29 = vld [vmem:[#allocation2 + $0xf8] sm:$0xff]  ;;  %2033 = vst.msk [vmem:[#allocation2 + $0x138] sm:$0x1] %vm291_vm1, %v2015_v50 }
 0x2ca   : > { %v5330_v41 = vpack.c.bf16 %v2411_v23, %v2410_v60  ;;  %v2794_v49 = vld [vmem:[#allocation2 + $0xf0] sm:$0xff]  ;;  %v2052_v40 = vld [vmem:[#allocation2 + $0x15f] sm:$0x1]  ;;  %v2799_v19 = vld [vmem:[#allocation2 + $0x128] sm:$0xff] }
 0x2cb   : > { %2210 = vrot.lane.b32.xlu1 %v5256_v45, %s4216_s18  ;;  %2982 = vrot.lane.b32.xlu0 %v5320_v39, %s4218_s20  ;;  %v2016_v51 = vld [vmem:[#allocation2 + $0x152] sm:$0x1]  ;;  %v5333_v52 = vpack.c.bf16 %v2795_v29, %v2794_v49  ;;  %v2923_v25 = vld [vmem:[#allocation2 + $0xf9] sm:$0xff]  ;;  %2070 = vst.msk [vmem:[#allocation2 + $0x161] sm:$0x1] %vm291_vm1, %v2052_v40  ;;  %v2542_v27 = vld [vmem:[#allocation2 + $0x109] sm:$0xff] }
 0x2cc   : > { %2034 = vst.msk [vmem:[#allocation2 + $0x150] sm:$0x1] %vm291_vm1, %v2016_v51  ;;  %v2922_v47 = vld [vmem:[#allocation2 + $0xf1] sm:$0xff]  ;;  %v2017_v45 = vld [vmem:[#allocation2 + $0x16a] sm:$0x1]  ;;  %v2801_v42 = vld [vmem:[#allocation2 + $0x140] sm:$0xff] }
 0x2cd   : > { %2131 = vst.msk [vmem:[#allocation3 + $0x48] sm:$0xff] %vm235_vm0, %v5330_v41  ;;  %v2414_v32 = vld [vmem:[#allocation2 + $0x108] sm:$0xff]  ;;  %2132 = vst.msk [vmem:[#allocation3 + $0x50] sm:$0xff] %vm235_vm0, %v5333_v52  ;;  %v2053_v28 = vld [vmem:[#allocation2 + $0x177] sm:$0x1]  ;;  %v5354_v13 = vpack.c.bf16 %v2923_v25, %v2922_v47 }
 0x2ce   : > { %2035 = vst.msk [vmem:[#allocation2 + $0x168] sm:$0x1] %vm291_vm1, %v2017_v45  ;;  %v5348_v18 = vpack.c.bf16 %v2415_v48, %v2414_v32  ;;  %v2798_v63 = vld [vmem:[#allocation2 + $0x120] sm:$0xff]  ;;  %2071 = vst.msk [vmem:[#allocation2 + $0x179] sm:$0x1] %vm291_vm1, %v2053_v28  ;;  %v2543_v17 = vld [vmem:[#allocation2 + $0x111] sm:$0xff] }
 0x2cf   : > { %2212 = vrot.lane.b32.xlu1 %v5268_v57, %s4216_s18  ;;  %2602 = vrot.lane.b32.xlu0 %v5336_v53, %s4217_s19  ;;  %v2018_v12 = vld [vmem:[#allocation2 + $0x182] sm:$0x1]  ;;  %v5351_v62 = vpack.c.bf16 %v2799_v19, %v2798_v63  ;;  %v2054_v57 = vld [vmem:[#allocation2 + $0x18f] sm:$0x1]  ;;  %v2019_v10 = vld [vmem:[#allocation2 + $0x19a] sm:$0x1]  ;;  %v2564_v31 = vpack.c.bf16 %v2543_v17, %v2542_v27 }
 0x2d0   : > { %2036 = vst.msk [vmem:[#allocation2 + $0x180] sm:$0x1] %vm291_vm1, %v2018_v12  ;;  %v2800_v37 = vld [vmem:[#allocation2 + $0x138] sm:$0xff]  ;;  %2072 = vst.msk [vmem:[#allocation2 + $0x191] sm:$0x1] %vm291_vm1, %v2054_v57  ;;  %v2805_v56 = vld [vmem:[#allocation2 + $0x170] sm:$0xff] }
 0x2d1   : > { %2133 = vst.msk [vmem:[#allocation3 + $0x58] sm:$0xff] %vm235_vm0, %v5348_v18  ;;  %2134 = vst.msk [vmem:[#allocation3 + $0x60] sm:$0xff] %vm235_vm0, %v5351_v62  ;;  %v5365_v22 = vpack.c.bf16 %v2801_v42, %v2800_v37  ;;  %v2421_v43 = vld [vmem:[#allocation2 + $0x158] sm:$0xff]  ;;  %v2055_v36 = vld [vmem:[#allocation2 + $0x1a7] sm:$0x1] }
 0x2d2   : > { %2037 = vst.msk [vmem:[#allocation2 + $0x198] sm:$0x1] %vm291_vm1, %v2019_v10  ;;  %2073 = vst.msk [vmem:[#allocation2 + $0x1a9] sm:$0x1] %vm291_vm1, %v2055_v36  ;;  %v2926_v34 = vld [vmem:[#allocation2 + $0x121] sm:$0xff]  ;;  %v2927_v46 = vld [vmem:[#allocation2 + $0x129] sm:$0xff] }
 0x2d3   : > { %2596 = vrot.lane.b32.xlu1 %v5281_v20, %s4217_s19  ;;  %2986 = vrot.lane.b32.xlu0 %v5354_v13, %s4218_s20  ;;  %v2420_v11 = vld [vmem:[#allocation2 + $0x150] sm:$0xff]  ;;  %2135 = vst.msk [vmem:[#allocation3 + $0x68] sm:$0xff] %vm235_vm0, %v5365_v22  ;;  %v2948_v54 = vpack.c.bf16 %v2927_v46, %v2926_v34  ;;  %v2546_v58 = vld [vmem:[#allocation2 + $0x139] sm:$0xff]  ;;  %v2547_v33 = vld [vmem:[#allocation2 + $0x141] sm:$0xff]  ;;  %vm3758_vm1 = vcmask 490944  }
 0x2d4   : > { %v5368_v0 = vpack.c.bf16 %v2421_v43, %v2420_v11  ;;  %v2566_v44 = vpack.c.bf16 %v2547_v33, %v2546_v58  ;;  %v2930_v59 = vld [vmem:[#allocation2 + $0x151] sm:$0xff]  ;;  %v2931_v60 = vld [vmem:[#allocation2 + $0x159] sm:$0xff]  ;;  %v2266_v49 = vld [vmem:[#allocation2 + $0x2] sm:$0xff] }
 0x2d5   : > { %v2804_v35 = vld [vmem:[#allocation2 + $0x168] sm:$0xff]  ;;  %v2950_v23 = vpack.c.bf16 %v2931_v60, %v2930_v59  ;;  %v3035_v40 = vld [vmem:[#allocation2 + $0x3a] sm:$0xff]  ;;  %v3034_v47 = vld [vmem:[#allocation2 + $0x32] sm:$0xff] }
 0x2d6   : > { %2136 = vst.msk [vmem:[#allocation3 + $0x70] sm:$0xff] %vm235_vm0, %v5368_v0  ;;  %v5375_v30 = vpack.c.bf16 %v2805_v56, %v2804_v35  ;;  %v2267_v50 = vld [vmem:[#allocation2 + $0xa] sm:$0xff]  ;;  %v5405_v25 = vpack.c.bf16 %v3035_v40, %v3034_v47  ;;  %v3038_v32 = vld [vmem:[#allocation2 + $0x62] sm:$0xff]  ;;  %v3040_v63 = vld [vmem:[#allocation2 + $0x7a] sm:$0xff] }
 0x2d7   : > { %2980 = vrot.lane.b32.xlu1 %v5300_v21, %s4218_s20  ;;  %2606 = vrot.lane.b32.xlu0 %v2564_v31, %s4217_s19  ;;  %v2298_v29 = vpack.c.bf16 %v2267_v50, %v2266_v49  ;;  %v3039_v45 = vld [vmem:[#allocation2 + $0x6a] sm:$0xff]  ;;  %v3041_v28 = vld [vmem:[#allocation2 + $0x82] sm:$0xff]  ;;  %v3043_v10 = vld [vmem:[#allocation2 + $0x9a] sm:$0xff] }
 0x2d8   : > { %2137 = vst.msk [vmem:[#allocation3 + $0x78] sm:$0xff] %vm235_vm0, %v5375_v30  ;;  %v5428_v48 = vpack.c.bf16 %v3039_v45, %v3038_v32  ;;  %v5433_v19 = vpack.c.bf16 %v3041_v28, %v3040_v63  ;;  %v2932_v12 = vld [vmem:[#allocation2 + $0x169] sm:$0xff]  ;;  %v4201_v57 = vld [vmem:[%s6227_s2] sm:$0xff]   ;;  %v3042_v11 = vld [vmem:[#allocation2 + $0x92] sm:$0xff] }
 0x2d9   : > { %4119 = vmatprep.subr.bf16.mxu1 %v4201_v57  ;;  %v4202_v43 = vld [vmem:[%s6227_s2 + $0x8] sm:$0xff]   ;;  %v3070_v35 = vpack.c.bf16 %v3043_v10, %v3042_v11  ;;  %v3045_v56 = vld [vmem:[#allocation2 + $0xb2] sm:$0xff]  ;;  %v4203_v34 = vld [vmem:[%s6227_s2 + $0x10] ss:$0 sps:$4 sm:$0x33]  }
 0x2da   : > { %4120 = vmatpush3.bf16.msra.mxu1 %v4201_v57  ;;  %v3044_v46 = vld [vmem:[#allocation2 + $0xaa] sm:$0xff] }
 0x2db   : > { %2214 = vrot.lane.b32.xlu1 %v5281_v20, %s4216_s18  ;;  %2990 = vrot.lane.b32.xlu0 %v2948_v54, %s4218_s20  ;;  %v2651_v20 = vld [vmem:[#allocation2 + $0x22] sm:$0xff]  ;;  %v3071_v33 = vpack.c.bf16 %v3045_v56, %v3044_v46  ;;  %v3052_v10 = vld [vmem:[#allocation2 + $0x10a] sm:$0xff] }
 0x2dc   : > { %4121 = vmatprep.subr.bf16.mxu1 %v4202_v43 }
 0x2de   : > { %4122 = vmatpush3.bf16.msra.mxu1 %v4202_v43 }
 0x2df   : > { %2216 = vrot.lane.b32.xlu1 %v5300_v21, %s4216_s18  ;;  %2610 = vrot.lane.b32.xlu0 %v2566_v44, %s4217_s19  ;;  %v2650_v21 = vld [vmem:[#allocation2 + $0x1a] sm:$0xff] }
 0x2e0   : > { %v2682_v51 = vpack.c.bf16 %v2651_v20, %v2650_v21  ;;  %4158 = vmatprep.subr.msk.bf16.mxu1 %vm1528_vm2, %v4203_v34  ;;  %v3047_v20 = vld [vmem:[#allocation2 + $0xca] sm:$0xff]  ;;  %v3046_v21 = vld [vmem:[#allocation2 + $0xc2] sm:$0xff] }
 0x2e1   : > { %v3072_v47 = vpack.c.bf16 %v3047_v20, %v3046_v21 }
 0x2e3   : > { %2600 = vrot.lane.b32.xlu1 %v5320_v39, %s4217_s19  ;;  %2994 = vrot.lane.b32.xlu0 %v2950_v23, %s4218_s20 }
 0x2e7   : > { %2984 = vrot.lane.b32.xlu1 %v5336_v53, %s4218_s20  ;;  %2330 = vrot.lane.b32.xlu0 %v2298_v29, %s4219_s21 }
 0x2eb   : > { %2218 = vrot.lane.b32.xlu1 %v5320_v39, %s4216_s18  ;;  %2458 = vrot.lane.b32.xlu0 %v5245_v16, %s4220_s22  ;;  %v3037_v39 = vld [vmem:[#allocation2 + $0x52] sm:$0xff]  ;;  %v3036_v16 = vld [vmem:[#allocation2 + $0x4a] sm:$0xff] }
 0x2ef   : > { %2220 = vrot.lane.b32.xlu1 %v5336_v53, %s4216_s18  ;;  %2714 = vrot.lane.b32.xlu0 %v2682_v51, %s4221_s23  ;;  %v5410_v53 = vpack.c.bf16 %v3037_v39, %v3036_v16 }
 0x2f3   : > { %2604 = vrot.lane.b32.xlu1 %v5354_v13, %s4217_s19  ;;  %2842 = vrot.lane.b32.xlu0 %v5250_v55, %s4222_s26 }
 0x2f7   : > { %2988 = vrot.lane.b32.xlu1 %v2564_v31, %s4218_s20  ;;  %3098 = vrot.lane.b32.xlu0 %v5405_v25, %s4223_s4 }
 0x2fb   : > { %2222 = vrot.lane.b32.xlu1 %v5354_v13, %s4216_s18  ;;  %3100 = vrot.lane.b32.xlu0 %v5410_v53, %s4223_s4  ;;  %v2933_v13 = vld [vmem:[#allocation2 + $0x171] sm:$0xff] }
 0x2fc   : > { %v5438_v27 = vpack.c.bf16 %v2933_v13, %v2932_v12  ;;  %v3051_v12 = vld [vmem:[#allocation2 + $0xfa] sm:$0xff]  ;;  %v3050_v13 = vld [vmem:[#allocation2 + $0xf2] sm:$0xff] }
 0x2ff   : > { %2224 = vrot.lane.b32.xlu1 %v2564_v31, %s4216_s18  ;;  %2334 = vrot.lane.b32.xlu0 %v5405_v25, %s4219_s21 }
 0x303   : > { %2608 = vrot.lane.b32.xlu1 %v2948_v54, %s4217_s19  ;;  %2462 = vrot.lane.b32.xlu0 %v5278_v24, %s4220_s22 }
 0x307   : > { %2992 = vrot.lane.b32.xlu1 %v2566_v44, %s4218_s20  ;;  %2718 = vrot.lane.b32.xlu0 %v5410_v53, %s4221_s23 }
 0x30b   : > { %2226 = vrot.lane.b32.xlu1 %v2948_v54, %s4216_s18  ;;  %2846 = vrot.lane.b32.xlu0 %v5283_v26, %s4222_s26 }
 0x30f   : > { %2228 = vrot.lane.b32.xlu1 %v2566_v44, %s4216_s18  ;;  %3102 = vrot.lane.b32.xlu0 %v5428_v48, %s4223_s4  ;;  %v3247_v44 = vsel %vm1528_vm2, %v4203_v34, 0  ;;  %vm3764_vm2 = vcmask 523744  }
 0x310   : > { %4124 = vmatpush3.bf16.msra.mxu1 %v3247_v44 }
 0x313   : > { %2612 = vrot.lane.b32.xlu1 %v2950_v23, %s4217_s19  ;;  %3104 = vrot.lane.b32.xlu0 %v5433_v19, %s4223_s4 }
 0x317   : > { %2996 = vrot.lane.b32.xlu1 %v5438_v27, %s4218_s20  ;;  %2338 = vrot.lane.b32.xlu0 %v5428_v48, %s4219_s21 }
 0x31a   : > { %v2203_v17 = vpop.permute.xlu0 %2202 }
 0x31b   : > { %2230 = vrot.lane.b32.xlu1 %v2950_v23, %s4216_s18  ;;  %2466 = vrot.lane.b32.xlu0 %v5292_v6, %s4220_s22  ;;  %2250 = vst.msk [vmem:[#allocation3] sm:$0xff] %vm522_vm3, %v2203_v17 }
 0x31f   : > { %2232 = vrot.lane.b32.xlu1 %v5438_v27, %s4216_s18  ;;  %2722 = vrot.lane.b32.xlu0 %v5433_v19, %s4221_s23 }
 0x321   : > { %v2205_v37 = vpop.permute.xlu1 %2204  ;;  %v5455_v42 = vpop.permute.xlu0 %2586 }
 0x322   : > { %2251 = vst.msk [vmem:[#allocation3 + $0x8] sm:$0xff] %vm522_vm3, %v2205_v37  ;;  %v3074_v37 = vpack.c.bf16 %v3051_v12, %v3050_v13 }
 0x323   : > { %2332 = vrot.lane.b32.xlu1 %v2682_v51, %s4219_s21  ;;  %2850 = vrot.lane.b32.xlu0 %v5297_v38, %s4222_s26 }
 0x325   : > { %v5464_v36 = vpop.permute.xlu1 %2588  ;;  %v5466_v31 = vpop.permute.xlu0 %2970 }
 0x327   : > { %2460 = vrot.lane.b32.xlu1 %v5250_v55, %s4220_s22  ;;  %3106 = vrot.lane.b32.xlu0 %v3070_v35, %s4223_s4 }
 0x329   : > { %v5474_v54 = vpop.permute.xlu1 %2972  ;;  %v5476_v58 = vpop.permute.xlu0 %2590 }
 0x32b   : > { %2716 = vrot.lane.b32.xlu1 %v5405_v25, %s4221_s23  ;;  %3108 = vrot.lane.b32.xlu0 %v3071_v33, %s4223_s4  ;;  %v3048_v25 = vld [vmem:[#allocation2 + $0xda] sm:$0xff] }
 0x32d   : > { %v2207_v55 = vpop.permute.xlu1 %2206  ;;  %v5483_v59 = vpop.permute.xlu0 %2974 }
 0x32e   : > { %2252 = vst.msk [vmem:[#allocation3 + $0x10] sm:$0xff] %vm522_vm3, %v2207_v55  ;;  %v3055_v55 = vld [vmem:[#allocation2 + $0x12a] sm:$0xff] }
 0x32f   : > { %2844 = vrot.lane.b32.xlu1 %v5278_v24, %s4222_s26  ;;  %2342 = vrot.lane.b32.xlu0 %v3070_v35, %s4219_s21 }
 0x331   : > { %v2209_v60 = vpop.permute.xlu1 %2208  ;;  %v5489_v23 = vpop.permute.xlu0 %2594 }
 0x332   : > { %2253 = vst.msk [vmem:[#allocation3 + $0x18] sm:$0xff] %vm522_vm3, %v2209_v60  ;;  %v3054_v60 = vld [vmem:[#allocation2 + $0x122] sm:$0xff] }
 0x333   : > { %2336 = vrot.lane.b32.xlu1 %v5410_v53, %s4219_s21  ;;  %2470 = vrot.lane.b32.xlu0 %v5305_v5, %s4220_s22 }
 0x335   : > { %v5496_v50 = vpop.permute.xlu1 %2592  ;;  %v5498_v49 = vpop.permute.xlu0 %2978 }
 0x337   : > { %2464 = vrot.lane.b32.xlu1 %v5283_v26, %s4220_s22  ;;  %2726 = vrot.lane.b32.xlu0 %v3071_v33, %s4221_s23  ;;  %v3049_v26 = vld [vmem:[#allocation2 + $0xe2] sm:$0xff] }
 0x338   : > { %v3073_v53 = vpack.c.bf16 %v3049_v26, %v3048_v25 }
 0x339   : > { %v5503_v24 = vpop.permute.xlu1 %2976  ;;  %v5505_v29 = vpop.permute.xlu0 %2598 }
 0x33b   : > { %2720 = vrot.lane.b32.xlu1 %v5428_v48, %s4221_s23  ;;  %2854 = vrot.lane.b32.xlu0 %v5314_v61, %s4222_s26 }
 0x33d   : > { %v2211_v51 = vpop.permute.xlu1 %2210  ;;  %v5511_v40 = vpop.permute.xlu0 %2982 }
 0x33e   : > { %2254 = vst.msk [vmem:[#allocation3 + $0x20] sm:$0xff] %vm522_vm3, %v2211_v51  ;;  %v3056_v51 = vld [vmem:[#allocation2 + $0x13a] sm:$0xff] }
 0x33f   : > { %2848 = vrot.lane.b32.xlu1 %v5292_v6, %s4222_s26  ;;  %3110 = vrot.lane.b32.xlu0 %v3072_v47, %s4223_s4 }
 0x341   : > { %v2213_v39 = vpop.permute.xlu1 %2212  ;;  %v5517_v16 = vpop.permute.xlu0 %2602 }
 0x342   : > { %2255 = vst.msk [vmem:[#allocation3 + $0x28] sm:$0xff] %vm522_vm3, %v2213_v39 }
 0x343   : > { %2340 = vrot.lane.b32.xlu1 %v5433_v19, %s4219_s21  ;;  %3112 = vrot.lane.b32.xlu0 %v3073_v53, %s4223_s4 }
 0x345   : > { %v5523_v45 = vpop.permute.xlu1 %2596  ;;  %v5525_v32 = vpop.permute.xlu0 %2986 }
 0x347   : > { %2468 = vrot.lane.b32.xlu1 %v5297_v38, %s4220_s22  ;;  %2346 = vrot.lane.b32.xlu0 %v3072_v47, %s4219_s21 }
 0x349   : > { %v5530_v6 = vpop.permute.xlu1 %2980  ;;  %v5532_v48 = vpop.permute.xlu0 %2606 }
 0x34b   : > { %2724 = vrot.lane.b32.xlu1 %v3070_v35, %s4221_s23  ;;  %2474 = vrot.lane.b32.xlu0 %v5330_v41, %s4220_s22 }
 0x34d   : > { %v2215_v28 = vpop.permute.xlu1 %2214  ;;  %v5537_v63 = vpop.permute.xlu0 %2990 }
 0x34e   : > { %2256 = vst.msk [vmem:[#allocation3 + $0x30] sm:$0xff] %vm522_vm3, %v2215_v28 }
 0x34f   : > { %2852 = vrot.lane.b32.xlu1 %v5305_v5, %s4222_s26  ;;  %2730 = vrot.lane.b32.xlu0 %v3073_v53, %s4221_s23  ;;  %v3053_v5 = vld [vmem:[#allocation2 + $0x112] sm:$0xff] }
 0x350   : > { %v3075_v35 = vpack.c.bf16 %v3053_v5, %v3052_v10  ;;  %v2676_v5 = vld [vmem:[#allocation2 + $0x152] sm:$0xff] }
 0x351   : > { %v2217_v38 = vpop.permute.xlu1 %2216  ;;  %v5543_v19 = vpop.permute.xlu0 %2610 }
 0x352   : > { %2257 = vst.msk [vmem:[#allocation3 + $0x38] sm:$0xff] %vm522_vm3, %v2217_v38 }
 0x353   : > { %2344 = vrot.lane.b32.xlu1 %v3071_v33, %s4219_s21  ;;  %2858 = vrot.lane.b32.xlu0 %v5333_v52, %s4222_s26 }
 0x355   : > { %v5549_v17 = vpop.permute.xlu1 %2600  ;;  %v5551_v57 = vpop.permute.xlu0 %2994 }
 0x357   : > { %2472 = vrot.lane.b32.xlu1 %v5314_v61, %s4220_s22  ;;  %3114 = vrot.lane.b32.xlu0 %v3074_v37, %s4223_s4 }
 0x359   : > { %v5556_v11 = vpop.permute.xlu1 %2984  ;;  %v2331_v43 = vpop.permute.xlu0 %2330 }
 0x35a   : > { %2378 = vst.msk [vmem:[#allocation3] sm:$0xff] %vm651_vm4, %v2331_v43  ;;  %v3061_v43 = vld [vmem:[#allocation2 + $0x172] sm:$0xff] }
 0x35b   : > { %2728 = vrot.lane.b32.xlu1 %v3072_v47, %s4221_s23  ;;  %3116 = vrot.lane.b32.xlu0 %v3075_v35, %s4223_s4 }
 0x35d   : > { %v2219_v56 = vpop.permute.xlu1 %2218  ;;  %v2459_v34 = vpop.permute.xlu0 %2458 }
 0x35e   : > { %2258 = vst.msk [vmem:[#allocation3 + $0x40] sm:$0xff] %vm522_vm3, %v2219_v56 }
 0x35f   : > { %2506 = vst.msk [vmem:[#allocation3] sm:$0xff] %vm780_vm5, %v2459_v34  ;;  %2856 = vrot.lane.b32.xlu1 %v5330_v41, %s4222_s26  ;;  %2350 = vrot.lane.b32.xlu0 %v3074_v37, %s4219_s21 }
 0x360   : > { %2634 = vst.msk [vmem:[#allocation3] sm:$0xff] %vm909_vm6, %v5455_v42 }
 0x361   : > { %v2221_v61 = vpop.permute.xlu1 %2220  ;;  %v2715_v46 = vpop.permute.xlu0 %2714 }
 0x362   : > { %2259 = vst.msk [vmem:[#allocation3 + $0x48] sm:$0xff] %vm522_vm3, %v2221_v61 }
 0x363   : > { %2762 = vst.msk [vmem:[#allocation3] sm:$0xff] %vm1038_vm7, %v2715_v46  ;;  %2348 = vrot.lane.b32.xlu1 %v3073_v53, %s4219_s21  ;;  %2478 = vrot.lane.b32.xlu0 %v5348_v18, %s4220_s22 }
 0x365   : > { %v5573_v33 = vpop.permute.xlu1 %2604  ;;  %v2843_v44 = vpop.permute.xlu0 %2842 }
 0x366   : > { %2890 = vst.msk [vmem:[#allocation3] sm:$0xff] %vm1168_vm8, %v2843_v44 }
 0x367   : > { %2476 = vrot.lane.b32.xlu1 %v5333_v52, %s4220_s22  ;;  %3018 = vst.msk [vmem:[#allocation3] sm:$0xff] %vm1297_vm9, %v5466_v31  ;;  %2734 = vrot.lane.b32.xlu0 %v3075_v35, %s4221_s23  ;;  %v3076_v52 = vpack.c.bf16 %v3055_v55, %v3054_v60  ;;  %v3057_v31 = vld [vmem:[#allocation2 + $0x142] sm:$0xff] }
 0x368   : > { %v3077_v39 = vpack.c.bf16 %v3057_v31, %v3056_v51  ;;  %v2424_v55 = vld [vmem:[#allocation2 + $0x180] sm:$0xff]  ;;  %v2425_v60 = vld [vmem:[#allocation2 + $0x188] sm:$0xff] }
 0x369   : > { %v5581_v41 = vpop.permute.xlu1 %2988  ;;  %v3099_v42 = vpop.permute.xlu0 %3098  ;;  %v2553_v51 = vld [vmem:[#allocation2 + $0x189] sm:$0xff] }
 0x36a   : > { %3146 = vst.msk [vmem:[#allocation3] sm:$0xff] %vm1426_vm10, %v3099_v42 }
 0x36b   : > { %2732 = vrot.lane.b32.xlu1 %v3074_v37, %s4221_s23  ;;  %2862 = vrot.lane.b32.xlu0 %v5351_v62, %s4222_s26  ;;  %v2677_v37 = vld [vmem:[#allocation2 + $0x15a] sm:$0xff] }
 0x36d   : > { %v2223_v20 = vpop.permute.xlu1 %2222  ;;  %v5587_v21 = vpop.permute.xlu0 %3100 }
 0x36e   : > { %2260 = vst.msk [vmem:[#allocation3 + $0x50] sm:$0xff] %vm522_vm3, %v2223_v20 }
 0x36f   : > { %2860 = vrot.lane.b32.xlu1 %v5348_v18, %s4222_s26  ;;  %3118 = vrot.lane.b32.xlu0 %v3076_v52, %s4223_s4 }
 0x371   : > { %v2225_v47 = vpop.permute.xlu1 %2224  ;;  %v2335_v26 = vpop.permute.xlu0 %2334  ;;  %v3162_v25 = vld [vmem:[#allocation3] sm:$0xff] }
 0x372   : > { %2261 = vst.msk [vmem:[#allocation3 + $0x58] sm:$0xff] %vm522_vm3, %v2225_v47  ;;  %4125 = vmatprep.mubr.msk.bf16.mxu1 %vm1479_vm11, %v3162_v25  ;;  %v2681_v25 = vld [vmem:[#allocation2 + $0x18a] sm:$0xff] }
 0x373   : > { %2380 = vst.msk [vmem:[#allocation3 + $0x10] sm:$0xff] %vm651_vm4, %v2335_v26  ;;  %2352 = vrot.lane.b32.xlu1 %v3075_v35, %s4219_s21  ;;  %3120 = vrot.lane.b32.xlu0 %v3077_v39, %s4223_s4  ;;  %v3060_v35 = vld [vmem:[#allocation2 + $0x16a] sm:$0xff] }
 0x374   : > { %v3079_v61 = vpack.c.bf16 %v3061_v43, %v3060_v35  ;;  %v3065_v35 = vld [vmem:[#allocation2 + $0x1a2] sm:$0xff] }
 0x375   : > { %v5598_v53 = vpop.permute.xlu1 %2608  ;;  %v2463_v18 = vpop.permute.xlu0 %2462 }
 0x376   : > { %2508 = vst.msk [vmem:[#allocation3 + $0x10] sm:$0xff] %vm780_vm5, %v2463_v18 }
 0x377   : > { %2480 = vrot.lane.b32.xlu1 %v5351_v62, %s4220_s22  ;;  %2636 = vst.msk [vmem:[#allocation3 + $0x10] sm:$0xff] %vm909_vm6, %v5476_v58  ;;  %2354 = vrot.lane.b32.xlu0 %v3076_v52, %s4219_s21 }
 0x379   : > { %v5606_v28 = vpop.permute.xlu1 %2992  ;;  %v2719_v38 = vpop.permute.xlu0 %2718 }
 0x37a   : > { %2764 = vst.msk [vmem:[#allocation3 + $0x10] sm:$0xff] %vm1038_vm7, %v2719_v38 }
 0x37b   : > { %2736 = vrot.lane.b32.xlu1 %v3076_v52, %s4221_s23  ;;  %2482 = vrot.lane.b32.xlu0 %v5365_v22, %s4220_s22  ;;  %v2441_v52 = vpack.c.bf16 %v2425_v60, %v2424_v55 }
 0x37d   : > { %v2227_v12 = vpop.permute.xlu1 %2226  ;;  %v2847_v13 = vpop.permute.xlu0 %2846 }
 0x37e   : > { %2262 = vst.msk [vmem:[#allocation3 + $0x60] sm:$0xff] %vm522_vm3, %v2227_v12  ;;  %v2809_v12 = vld [vmem:[#allocation2 + $0x1a0] sm:$0xff] }
 0x37f   : > { %2892 = vst.msk [vmem:[#allocation3 + $0x10] sm:$0xff] %vm1168_vm8, %v2847_v13  ;;  %2864 = vrot.lane.b32.xlu1 %v5365_v22, %s4222_s26  ;;  %2738 = vrot.lane.b32.xlu0 %v3077_v39, %s4221_s23 }
 0x380   : > { %3020 = vst.msk [vmem:[#allocation3 + $0x10] sm:$0xff] %vm1297_vm9, %v5483_v59  ;;  %v2695_v59 = vpack.c.bf16 %v2677_v37, %v2676_v5  ;;  %v2937_v37 = vld [vmem:[#allocation2 + $0x1a1] sm:$0xff] }
 0x381   : > { %v2229_v62 = vpop.permute.xlu1 %2228  ;;  %v3103_v58 = vpop.permute.xlu0 %3102 }
 0x382   : > { %2263 = vst.msk [vmem:[#allocation3 + $0x68] sm:$0xff] %vm522_vm3, %v2229_v62 }
 0x383   : > { %3148 = vst.msk [vmem:[#allocation3 + $0x10] sm:$0xff] %vm1426_vm10, %v3103_v58  ;;  %2356 = vrot.lane.b32.xlu1 %v3077_v39, %s4219_s21  ;;  %2866 = vrot.lane.b32.xlu0 %v5368_v0, %s4222_s26  ;;  %v2680_v39 = vld [vmem:[#allocation2 + $0x182] sm:$0xff]  ;;  %v2936_v58 = vld [vmem:[#allocation2 + $0x199] sm:$0xff] }
 0x384   : > { %v2697_v18 = vpack.c.bf16 %v2681_v25, %v2680_v39 }
 0x385   : > { %v5624_v10 = vpop.permute.xlu1 %2612  ;;  %v5626_v22 = vpop.permute.xlu0 %3104 }
 0x387   : > { %2484 = vrot.lane.b32.xlu1 %v5368_v0, %s4220_s22  ;;  %3122 = vrot.lane.b32.xlu0 %v2695_v59, %s4223_s4 }
 0x389   : > { %v5631_v56 = vpop.permute.xlu1 %2996  ;;  %v2339_v34 = vpop.permute.xlu0 %2338 }
 0x38a   : > { %2382 = vst.msk [vmem:[#allocation3 + $0x20] sm:$0xff] %vm651_vm4, %v2339_v34 }
 0x38b   : > { %2740 = vrot.lane.b32.xlu1 %v2695_v59, %s4221_s23  ;;  %3124 = vrot.lane.b32.xlu0 %v3079_v61, %s4223_s4 }
 0x38d   : > { %v2231_v46 = vpop.permute.xlu1 %2230  ;;  %v2467_v44 = vpop.permute.xlu0 %2466 }
 0x38e   : > { %2264 = vst.msk [vmem:[#allocation3 + $0x70] sm:$0xff] %vm522_vm3, %v2231_v46 }
 0x38f   : > { %2510 = vst.msk [vmem:[#allocation3 + $0x20] sm:$0xff] %vm780_vm5, %v2467_v44  ;;  %2868 = vrot.lane.b32.xlu1 %v5375_v30, %s4222_s26  ;;  %2358 = vrot.lane.b32.xlu0 %v2695_v59, %s4219_s21  ;;  %v2953_v59 = vpack.c.bf16 %v2937_v37, %v2936_v58  ;;  %v3164_v44 = vld [vmem:[#allocation3 + $0x10] sm:$0xff] }
 0x390   : > { %2638 = vst.msk [vmem:[#allocation3 + $0x20] sm:$0xff] %vm909_vm6, %v5489_v23  ;;  %v2552_v23 = vld [vmem:[#allocation2 + $0x181] sm:$0xff] }
 0x391   : > { %v2233_v0 = vpop.permute.xlu1 %2232  ;;  %v2723_v42 = vpop.permute.xlu0 %2722 }
 0x392   : > { %2265 = vst.msk [vmem:[#allocation3 + $0x78] sm:$0xff] %vm522_vm3, %v2233_v0 }
 0x393   : > { %2766 = vst.msk [vmem:[#allocation3 + $0x20] sm:$0xff] %vm1038_vm7, %v2723_v42  ;;  %2360 = vrot.lane.b32.xlu1 %v3079_v61, %s4219_s21  ;;  %2486 = vrot.lane.b32.xlu0 %v5375_v30, %s4220_s22  ;;  %v2569_v30 = vpack.c.bf16 %v2553_v51, %v2552_v23 }
 0x395   : > { %v2333_v20 = vpop.permute.xlu1 %2332  ;;  %v2851_v31 = vpop.permute.xlu0 %2850 }
 0x396   : > { %2379 = vst.msk [vmem:[#allocation3 + $0x8] sm:$0xff] %vm651_vm4, %v2333_v20 }
 0x397   : > { %2894 = vst.msk [vmem:[#allocation3 + $0x20] sm:$0xff] %vm1168_vm8, %v2851_v31  ;;  %2488 = vrot.lane.b32.xlu1 %v2441_v52, %s4220_s22  ;;  %2614 = vrot.lane.b32.xlu0 %v5438_v27, %s4217_s19  ;;  %v2808_v27 = vld [vmem:[#allocation2 + $0x198] sm:$0xff] }
 0x398   : > { %3022 = vst.msk [vmem:[#allocation3 + $0x20] sm:$0xff] %vm1297_vm9, %v5498_v49  ;;  %v2825_v62 = vpack.c.bf16 %v2809_v12, %v2808_v27 }
 0x399   : > { %v2461_v47 = vpop.permute.xlu1 %2460  ;;  %v3107_v26 = vpop.permute.xlu0 %3106 }
 0x39a   : > { %2507 = vst.msk [vmem:[#allocation3 + $0x8] sm:$0xff] %vm780_vm5, %v2461_v47 }
 0x39b   : > { %3150 = vst.msk [vmem:[#allocation3 + $0x20] sm:$0xff] %vm1426_vm10, %v3107_v26  ;;  %2616 = vrot.lane.b32.xlu1 %v2569_v30, %s4217_s19  ;;  %2742 = vrot.lane.b32.xlu0 %v3079_v61, %s4221_s23 }
 0x39c   : > { %2635 = vst.msk [vmem:[#allocation3 + $0x8] sm:$0xff] %vm909_vm6, %v5464_v36 }
 0x39d   : > { %v2717_v49 = vpop.permute.xlu1 %2716  ;;  %v5661_v38 = vpop.permute.xlu0 %3108 }
 0x39e   : > { %2763 = vst.msk [vmem:[#allocation3 + $0x8] sm:$0xff] %vm1038_vm7, %v2717_v49 }
 0x39f   : > { %2744 = vrot.lane.b32.xlu1 %v2697_v18, %s4221_s23  ;;  %2870 = vrot.lane.b32.xlu0 %v2441_v52, %s4222_s26 }
 0x3a1   : > { %v2845_v13 = vpop.permute.xlu1 %2844  ;;  %v2343_v36 = vpop.permute.xlu0 %2342 }
 0x3a2   : > { %2891 = vst.msk [vmem:[#allocation3 + $0x8] sm:$0xff] %vm1168_vm8, %v2845_v13 }
 0x3a3   : > { %2384 = vst.msk [vmem:[#allocation3 + $0x30] sm:$0xff] %vm651_vm4, %v2343_v36  ;;  %2872 = vrot.lane.b32.xlu1 %v2825_v62, %s4222_s26  ;;  %2998 = vrot.lane.b32.xlu0 %v2569_v30, %s4218_s20 }
 0x3a4   : > { %3019 = vst.msk [vmem:[#allocation3 + $0x8] sm:$0xff] %vm1297_vm9, %v5474_v54  ;;  %v3064_v54 = vld [vmem:[#allocation2 + $0x19a] sm:$0xff] }
 0x3a5   : > { %3147 = vst.msk [vmem:[#allocation3 + $0x8] sm:$0xff] %vm1426_vm10, %v5587_v21  ;;  %v2337_v5 = vpop.permute.xlu1 %2336  ;;  %v2471_v43 = vpop.permute.xlu0 %2470  ;;  %v3081_v61 = vpack.c.bf16 %v3065_v35, %v3064_v54 }
 0x3a6   : > { %2381 = vst.msk [vmem:[#allocation3 + $0x18] sm:$0xff] %vm651_vm4, %v2337_v5 }
 0x3a7   : > { %2512 = vst.msk [vmem:[#allocation3 + $0x30] sm:$0xff] %vm780_vm5, %v2471_v43  ;;  %3000 = vrot.lane.b32.xlu1 %v2953_v59, %s4218_s20  ;;  %3126 = vrot.lane.b32.xlu0 %v2697_v18, %s4223_s4 }
 0x3a8   : > { %2640 = vst.msk [vmem:[#allocation3 + $0x30] sm:$0xff] %vm909_vm6, %v5505_v29 }
 0x3a9   : > { %v2465_v34 = vpop.permute.xlu1 %2464  ;;  %v2727_v46 = vpop.permute.xlu0 %2726 }
 0x3aa   : > { %2509 = vst.msk [vmem:[#allocation3 + $0x18] sm:$0xff] %vm780_vm5, %v2465_v34 }
 0x3ab   : > { %2768 = vst.msk [vmem:[#allocation3 + $0x30] sm:$0xff] %vm1038_vm7, %v2727_v46  ;;  %3128 = vrot.lane.b32.xlu1 %v3081_v61, %s4223_s4 }
 0x3ac   : > { %2637 = vst.msk [vmem:[#allocation3 + $0x18] sm:$0xff] %vm909_vm6, %v5496_v50  ;;  %v3163_v21 = vld [vmem:[#allocation3 + $0x8] sm:$0xff] }
 0x3ad   : > { %4126 = vmatmul.mubr.msk.bf16.vlgmr.msra.gmra.mrb[0].mxu1 %vm1479_vm11, %v3163_v21  ;;  %v2721_v29 = vpop.permute.xlu1 %2720  ;;  %v2855_v0 = vpop.permute.xlu0 %2854 }
 0x3ae   : > { %4129 = vmatprep.mubr.msk.bf16.mxu1 %vm1479_vm11, %v3164_v44  ;;  %2765 = vst.msk [vmem:[#allocation3 + $0x18] sm:$0xff] %vm1038_vm7, %v2721_v29 }
 0x3af   : > { %2896 = vst.msk [vmem:[#allocation3 + $0x30] sm:$0xff] %vm1168_vm8, %v2855_v0 }
 0x3b0   : > { %3024 = vst.msk [vmem:[#allocation3 + $0x30] sm:$0xff] %vm1297_vm9, %v5511_v40 }
 0x3b1   : > { %v2849_v42 = vpop.permute.xlu1 %2848  ;;  %v3111_v55 = vpop.permute.xlu0 %3110 }
 0x3b2   : > { %2893 = vst.msk [vmem:[#allocation3 + $0x18] sm:$0xff] %vm1168_vm8, %v2849_v42 }
 0x3b3   : > { %3152 = vst.msk [vmem:[#allocation3 + $0x30] sm:$0xff] %vm1426_vm10, %v3111_v55 }
 0x3b4   : > { %3021 = vst.msk [vmem:[#allocation3 + $0x18] sm:$0xff] %vm1297_vm9, %v5503_v24  ;;  %v3166_v24 = vld [vmem:[#allocation3 + $0x20] sm:$0xff] }
 0x3b5   : > { %3149 = vst.msk [vmem:[#allocation3 + $0x18] sm:$0xff] %vm1426_vm10, %v5626_v22  ;;  %v2341_v50 = vpop.permute.xlu1 %2340  ;;  %v3113_v60 = vpop.permute.xlu0 %3112 }
 0x3b6   : > { %2383 = vst.msk [vmem:[#allocation3 + $0x28] sm:$0xff] %vm651_vm4, %v2341_v50 }
 0x3b9   : > { %v2469_v20 = vpop.permute.xlu1 %2468  ;;  %v2347_v52 = vpop.permute.xlu0 %2346 }
 0x3ba   : > { %2511 = vst.msk [vmem:[#allocation3 + $0x28] sm:$0xff] %vm780_vm5, %v2469_v20  ;;  %v3168_v26 = vld [vmem:[#allocation3 + $0x30] sm:$0xff] }
 0x3bb   : > { %2386 = vst.msk [vmem:[#allocation3 + $0x40] sm:$0xff] %vm651_vm4, %v2347_v52 }
 0x3bc   : > { %2639 = vst.msk [vmem:[#allocation3 + $0x28] sm:$0xff] %vm909_vm6, %v5523_v45  ;;  %v3165_v40 = vld [vmem:[#allocation3 + $0x18] sm:$0xff] }
 0x3bd   : > { %4130 = vmatmul.mubr.msk.bf16.gmra.mrb[4].mxu1 %vm1479_vm11, %v3165_v40  ;;  %v2725_v31 = vpop.permute.xlu1 %2724  ;;  %v2475_v22 = vpop.permute.xlu0 %2474 }
 0x3be   : > { %4133 = vmatprep.mubr.msk.bf16.mxu1 %vm1479_vm11, %v3166_v24  ;;  %2767 = vst.msk [vmem:[#allocation3 + $0x28] sm:$0xff] %vm1038_vm7, %v2725_v31 }
 0x3bf   : > { %2514 = vst.msk [vmem:[#allocation3 + $0x40] sm:$0xff] %vm780_vm5, %v2475_v22 }
 0x3c0   : > { %2642 = vst.msk [vmem:[#allocation3 + $0x40] sm:$0xff] %vm909_vm6, %v5517_v16 }
 0x3c1   : > { %v2853_v23 = vpop.permute.xlu1 %2852  ;;  %v2731_v51 = vpop.permute.xlu0 %2730 }
 0x3c2   : > { %2895 = vst.msk [vmem:[#allocation3 + $0x28] sm:$0xff] %vm1168_vm8, %v2853_v23 }
 0x3c3   : > { %2770 = vst.msk [vmem:[#allocation3 + $0x40] sm:$0xff] %vm1038_vm7, %v2731_v51 }
 0x3c4   : > { %3023 = vst.msk [vmem:[#allocation3 + $0x28] sm:$0xff] %vm1297_vm9, %v5530_v6 }
 0x3c5   : > { %3151 = vst.msk [vmem:[#allocation3 + $0x28] sm:$0xff] %vm1426_vm10, %v5661_v38  ;;  %v2345_v45 = vpop.permute.xlu1 %2344  ;;  %v2859_v47 = vpop.permute.xlu0 %2858 }
 0x3c6   : > { %2385 = vst.msk [vmem:[#allocation3 + $0x38] sm:$0xff] %vm651_vm4, %v2345_v45 }
 0x3c7   : > { %2898 = vst.msk [vmem:[#allocation3 + $0x40] sm:$0xff] %vm1168_vm8, %v2859_v47 }
 0x3c8   : > { %3026 = vst.msk [vmem:[#allocation3 + $0x40] sm:$0xff] %vm1297_vm9, %v5525_v32 }
 0x3c9   : > { %v2473_v16 = vpop.permute.xlu1 %2472  ;;  %v3115_v30 = vpop.permute.xlu0 %3114 }
 0x3ca   : > { %2513 = vst.msk [vmem:[#allocation3 + $0x38] sm:$0xff] %vm780_vm5, %v2473_v16 }
 0x3cb   : > { %3154 = vst.msk [vmem:[#allocation3 + $0x40] sm:$0xff] %vm1426_vm10, %v3115_v30 }
 0x3cc   : > { %2641 = vst.msk [vmem:[#allocation3 + $0x38] sm:$0xff] %vm909_vm6, %v5549_v17  ;;  %v3167_v6 = vld [vmem:[#allocation3 + $0x28] sm:$0xff] }
 0x3cd   : > { %4134 = vmatmul.mubr.msk.bf16.gmra.mrb[8].mxu1 %vm1479_vm11, %v3167_v6  ;;  %v2729_v25 = vpop.permute.xlu1 %2728  ;;  %v3117_v39 = vpop.permute.xlu0 %3116 }
 0x3ce   : > { %4137 = vmatprep.mubr.msk.bf16.mxu1 %vm1479_vm11, %v3168_v26  ;;  %2769 = vst.msk [vmem:[#allocation3 + $0x38] sm:$0xff] %vm1038_vm7, %v2729_v25 }
 0x3d1   : > { %v2857_v32 = vpop.permute.xlu1 %2856  ;;  %v2351_v49 = vpop.permute.xlu0 %2350 }
 0x3d2   : > { %2897 = vst.msk [vmem:[#allocation3 + $0x38] sm:$0xff] %vm1168_vm8, %v2857_v32  ;;  %v3170_v12 = vld [vmem:[#allocation3 + $0x40] sm:$0xff] }
 0x3d3   : > { %2388 = vst.msk [vmem:[#allocation3 + $0x50] sm:$0xff] %vm651_vm4, %v2351_v49 }
 0x3d4   : > { %3025 = vst.msk [vmem:[#allocation3 + $0x38] sm:$0xff] %vm1297_vm9, %v5556_v11 }
 0x3d5   : > { %3153 = vst.msk [vmem:[#allocation3 + $0x38] sm:$0xff] %vm1426_vm10, %v3113_v60  ;;  %v2349_v17 = vpop.permute.xlu1 %2348  ;;  %v2479_v18 = vpop.permute.xlu0 %2478 }
 0x3d6   : > { %2387 = vst.msk [vmem:[#allocation3 + $0x48] sm:$0xff] %vm651_vm4, %v2349_v17 }
 0x3d7   : > { %2516 = vst.msk [vmem:[#allocation3 + $0x50] sm:$0xff] %vm780_vm5, %v2479_v18 }
 0x3d8   : > { %2644 = vst.msk [vmem:[#allocation3 + $0x50] sm:$0xff] %vm909_vm6, %v5532_v48 }
 0x3d9   : > { %v2477_v38 = vpop.permute.xlu1 %2476  ;;  %v2735_v27 = vpop.permute.xlu0 %2734 }
 0x3da   : > { %2515 = vst.msk [vmem:[#allocation3 + $0x48] sm:$0xff] %vm780_vm5, %v2477_v38 }
 0x3db   : > { %2772 = vst.msk [vmem:[#allocation3 + $0x50] sm:$0xff] %vm1038_vm7, %v2735_v27 }
 0x3dc   : > { %2643 = vst.msk [vmem:[#allocation3 + $0x48] sm:$0xff] %vm909_vm6, %v5573_v33  ;;  %v3169_v11 = vld [vmem:[#allocation3 + $0x38] sm:$0xff] }
 0x3dd   : > { %4138 = vmatmul.mubr.msk.bf16.gmra.mrb[12].mxu1 %vm1479_vm11, %v3169_v11  ;;  %v2733_v13 = vpop.permute.xlu1 %2732  ;;  %v2863_v62 = vpop.permute.xlu0 %2862 }
 0x3de   : > { %4141 = vmatprep.mubr.msk.bf16.mxu1 %vm1479_vm11, %v3170_v12  ;;  %2771 = vst.msk [vmem:[#allocation3 + $0x48] sm:$0xff] %vm1038_vm7, %v2733_v13 }
 0x3df   : > { %2900 = vst.msk [vmem:[#allocation3 + $0x50] sm:$0xff] %vm1168_vm8, %v2863_v62 }
 0x3e0   : > { %3028 = vst.msk [vmem:[#allocation3 + $0x50] sm:$0xff] %vm1297_vm9, %v5537_v63 }
 0x3e1   : > { %v2861_v48 = vpop.permute.xlu1 %2860  ;;  %v3119_v36 = vpop.permute.xlu0 %3118 }
 0x3e2   : > { %2899 = vst.msk [vmem:[#allocation3 + $0x48] sm:$0xff] %vm1168_vm8, %v2861_v48 }
 0x3e3   : > { %3156 = vst.msk [vmem:[#allocation3 + $0x50] sm:$0xff] %vm1426_vm10, %v3119_v36 }
 0x3e4   : > { %3027 = vst.msk [vmem:[#allocation3 + $0x48] sm:$0xff] %vm1297_vm9, %v5581_v41 }
 0x3e5   : > { %3155 = vst.msk [vmem:[#allocation3 + $0x48] sm:$0xff] %vm1426_vm10, %v3117_v39  ;;  %v2353_v33 = vpop.permute.xlu1 %2352  ;;  %v3121_v58 = vpop.permute.xlu0 %3120 }
 0x3e6   : > { %2389 = vst.msk [vmem:[#allocation3 + $0x58] sm:$0xff] %vm651_vm4, %v2353_v33 }
 0x3e9   : > { %v2481_v37 = vpop.permute.xlu1 %2480  ;;  %v2355_v5 = vpop.permute.xlu0 %2354 }
 0x3ea   : > { %2517 = vst.msk [vmem:[#allocation3 + $0x58] sm:$0xff] %vm780_vm5, %v2481_v37  ;;  %v3172_v63 = vld [vmem:[#allocation3 + $0x50] sm:$0xff] }
 0x3eb   : > { %2390 = vst.msk [vmem:[#allocation3 + $0x60] sm:$0xff] %vm651_vm4, %v2355_v5 }
 0x3ec   : > { %2645 = vst.msk [vmem:[#allocation3 + $0x58] sm:$0xff] %vm909_vm6, %v5598_v53  ;;  %v3171_v59 = vld [vmem:[#allocation3 + $0x48] sm:$0xff] }
 0x3ed   : > { %4142 = vmatmul.mubr.msk.bf16.gmra.mrb[16].mxu1 %vm1479_vm11, %v3171_v59  ;;  %v2737_v41 = vpop.permute.xlu1 %2736  ;;  %v2483_v43 = vpop.permute.xlu0 %2482 }
 0x3ee   : > { %4145 = vmatprep.mubr.msk.bf16.mxu1 %vm1479_vm11, %v3172_v63  ;;  %2773 = vst.msk [vmem:[#allocation3 + $0x58] sm:$0xff] %vm1038_vm7, %v2737_v41 }
 0x3ef   : > { %2518 = vst.msk [vmem:[#allocation3 + $0x60] sm:$0xff] %vm780_vm5, %v2483_v43 }
 0x3f0   : > { %2646 = vst.msk [vmem:[#allocation3 + $0x60] sm:$0xff] %vm909_vm6, %v5543_v19 }
 0x3f1   : > { %v2865_v35 = vpop.permute.xlu1 %2864  ;;  %v2739_v54 = vpop.permute.xlu0 %2738 }
 0x3f2   : > { %2901 = vst.msk [vmem:[#allocation3 + $0x58] sm:$0xff] %vm1168_vm8, %v2865_v35 }
 0x3f3   : > { %2774 = vst.msk [vmem:[#allocation3 + $0x60] sm:$0xff] %vm1038_vm7, %v2739_v54 }
 0x3f4   : > { %3029 = vst.msk [vmem:[#allocation3 + $0x58] sm:$0xff] %vm1297_vm9, %v5606_v28 }
 0x3f5   : > { %3157 = vst.msk [vmem:[#allocation3 + $0x58] sm:$0xff] %vm1426_vm10, %v3121_v58  ;;  %v2357_v53 = vpop.permute.xlu1 %2356  ;;  %v2867_v34 = vpop.permute.xlu0 %2866 }
 0x3f6   : > { %2391 = vst.msk [vmem:[#allocation3 + $0x68] sm:$0xff] %vm651_vm4, %v2357_v53 }
 0x3f7   : > { %2902 = vst.msk [vmem:[#allocation3 + $0x60] sm:$0xff] %vm1168_vm8, %v2867_v34 }
 0x3f8   : > { %3030 = vst.msk [vmem:[#allocation3 + $0x60] sm:$0xff] %vm1297_vm9, %v5551_v57 }
 0x3f9   : > { %v2485_v19 = vpop.permute.xlu1 %2484  ;;  %v3123_v61 = vpop.permute.xlu0 %3122 }
 0x3fa   : > { %2519 = vst.msk [vmem:[#allocation3 + $0x68] sm:$0xff] %vm780_vm5, %v2485_v19 }
 0x3fb   : > { %3158 = vst.msk [vmem:[#allocation3 + $0x60] sm:$0xff] %vm1426_vm10, %v3123_v61 }
 0x3fc   : > { %2647 = vst.msk [vmem:[#allocation3 + $0x68] sm:$0xff] %vm909_vm6, %v5624_v10  ;;  %v3173_v28 = vld [vmem:[#allocation3 + $0x58] sm:$0xff] }
 0x3fd   : > { %4146 = vmatmul.mubr.msk.bf16.gmra.mrb[20].mxu1 %vm1479_vm11, %v3173_v28  ;;  %v2741_v46 = vpop.permute.xlu1 %2740  ;;  %v3125_v21 = vpop.permute.xlu0 %3124 }
 0x3fe   : > { %2775 = vst.msk [vmem:[#allocation3 + $0x68] sm:$0xff] %vm1038_vm7, %v2741_v46 }
 0x401   : > { %v2869_v44 = vpop.permute.xlu1 %2868  ;;  %v2359_v29 = vpop.permute.xlu0 %2358 }
 0x402   : > { %v3174_v0 = vld [vmem:[#allocation3 + $0x60] sm:$0xff]  ;;  %2903 = vst.msk [vmem:[#allocation3 + $0x68] sm:$0xff] %vm1168_vm8, %v2869_v44 }
 0x403   : > { %2392 = vst.msk [vmem:[#allocation3 + $0x70] sm:$0xff] %vm651_vm4, %v2359_v29  ;;  %4149 = vmatprep.mubr.msk.bf16.mxu1 %vm1479_vm11, %v3174_v0 }
 0x404   : > { %3031 = vst.msk [vmem:[#allocation3 + $0x68] sm:$0xff] %vm1297_vm9, %v5631_v56 }
 0x405   : > { %3159 = vst.msk [vmem:[#allocation3 + $0x68] sm:$0xff] %vm1426_vm10, %v3125_v21  ;;  %v2361_v57 = vpop.permute.xlu1 %2360  ;;  %v2487_v10 = vpop.permute.xlu0 %2486 }
 0x406   : > { %2393 = vst.msk [vmem:[#allocation3 + $0x78] sm:$0xff] %vm651_vm4, %v2361_v57 }
 0x407   : > { %2520 = vst.msk [vmem:[#allocation3 + $0x70] sm:$0xff] %vm780_vm5, %v2487_v10 }
 0x409   : > { %v2489_v42 = vpop.permute.xlu1 %2488  ;;  %v2615_v55 = vpop.permute.xlu0 %2614 }
 0x40a   : > { %2521 = vst.msk [vmem:[#allocation3 + $0x78] sm:$0xff] %vm780_vm5, %v2489_v42 }
 0x40b   : > { %2648 = vst.msk [vmem:[#allocation3 + $0x70] sm:$0xff] %vm909_vm6, %v2615_v55 }
 0x40c   : > { %v3175_v50 = vld [vmem:[#allocation3 + $0x68] sm:$0xff] }
 0x40d   : > { %4150 = vmatmul.mubr.msk.bf16.gmra.mrb[24].mxu1 %vm1479_vm11, %v3175_v50  ;;  %v2617_v60 = vpop.permute.xlu1 %2616  ;;  %v2743_v20 = vpop.permute.xlu0 %2742 }
 0x40e   : > { %2649 = vst.msk [vmem:[#allocation3 + $0x78] sm:$0xff] %vm909_vm6, %v2617_v60 }
 0x40f   : > { %2776 = vst.msk [vmem:[#allocation3 + $0x70] sm:$0xff] %vm1038_vm7, %v2743_v20 }
 0x411   : > { %v2745_v56 = vpop.permute.xlu1 %2744  ;;  %v2871_v52 = vpop.permute.xlu0 %2870 }
 0x412   : > { %2777 = vst.msk [vmem:[#allocation3 + $0x78] sm:$0xff] %vm1038_vm7, %v2745_v56 }
 0x413   : > { %2904 = vst.msk [vmem:[#allocation3 + $0x70] sm:$0xff] %vm1168_vm8, %v2871_v52 }
 0x415   : > { %v2873_v40 = vpop.permute.xlu1 %2872  ;;  %v2999_v24 = vpop.permute.xlu0 %2998 }
 0x416   : > { %2905 = vst.msk [vmem:[#allocation3 + $0x78] sm:$0xff] %vm1168_vm8, %v2873_v40 }
 0x417   : > { %3032 = vst.msk [vmem:[#allocation3 + $0x70] sm:$0xff] %vm1297_vm9, %v2999_v24 }
 0x419   : > { %v3001_v31 = vpop.permute.xlu1 %3000  ;;  %v3127_v22 = vpop.permute.xlu0 %3126 }
 0x41a   : > { %3033 = vst.msk [vmem:[#allocation3 + $0x78] sm:$0xff] %vm1297_vm9, %v3001_v31 }
 0x41b   : > { %3160 = vst.msk [vmem:[#allocation3 + $0x70] sm:$0xff] %vm1426_vm10, %v3127_v22 }
 0x41d   : > { %v3129_v23 = vpop.permute.xlu1 %3128 }
 0x41e   : > { %3161 = vst.msk [vmem:[#allocation3 + $0x78] sm:$0xff] %vm1426_vm10, %v3129_v23 }
 0x422   : > { %v3176_v51 = vld [vmem:[#allocation3 + $0x70] sm:$0xff] }
 0x423   : > { %4153 = vmatprep.mubr.msk.bf16.mxu1 %vm1479_vm11, %v3176_v51 }
 0x425   : > { %v3177_v45 = vld [vmem:[#allocation3 + $0x78] sm:$0xff] }
 0x426   : > { %4154 = vmatmul.mubr.msk.bf16.gmra.mrb[28].mxu1 %vm1479_vm11, %v3177_v45  ;;  %vm3818_vm11 = vcmask 818944  }
 0x480   : > { %v5797_v47 = vpop.f32.mrb[0].mxu1 }
 0x481   : > { %v5799_v16 = vpop.f32.mrb[1].mxu1  ;;  %v3481_v25 = vmul.f32 %v5797_v47, %v5797_v47  ;;  %v3413_v18 = vsel %vm235_vm0, %v5797_v47, 0.0 }
 0x482   : > { %v3479_v30 = vmul.f32 %v5799_v16, %v5799_v16  ;;  %v5803_v6 = vpop.f32.mrb[2].mxu1  ;;  %v3410_v39 = vsel %vm235_vm0, %v5799_v16, 0.0 }
 0x483   : > { %v5805_v26 = vpop.f32.mrb[3].mxu1  ;;  %v3482_v27 = vmul.f32 %v5803_v6, %v5803_v6  ;;  %v3514_v62 = vsel %vm235_vm0, %v3481_v25, 0.0  ;;  %v3415_v48 = vsel %vm235_vm0, %v5803_v6, 0.0 }
 0x484   : > { %v3411_v32 = vsel %vm235_vm0, %v5805_v26, 0.0  ;;  %v3480_v49 = vmul.f32 %v5805_v26, %v5805_v26  ;;  %v3511_v38 = vsel %vm235_vm0, %v3479_v30, 0.0 }
 0x485   : > { %v3412_v17 = vadd.f32 %v3411_v32, %v3410_v39  ;;  %v3516_v58 = vsel %vm235_vm0, %v3482_v27, 0.0 }
 0x486   : > { %v3512_v11 = vsel %vm235_vm0, %v3480_v49, 0.0 }
 0x487   : > { %v3414_v12 = vadd.f32 %v3413_v18, %v3412_v17  ;;  %v3513_v13 = vadd.f32 %v3512_v11, %v3511_v38 }
 0x489   : > { %v3515_v36 = vadd.f32 %v3514_v62, %v3513_v13  ;;  %v3416_v33 = vadd.f32 %v3415_v48, %v3414_v12 }
 0x48b   : > { %v3517_v37 = vadd.f32 %v3516_v58, %v3515_v36 }
 0x490   : > { %v5825_v5 = vpop.f32.mrb[4].mxu1 }
 0x491   : > { %v5827_v63 = vpop.f32.mrb[5].mxu1  ;;  %v3485_v53 = vmul.f32 %v5825_v5, %v5825_v5  ;;  %v3421_v21 = vsel %vm235_vm0, %v5825_v5, 0.0 }
 0x492   : > { %v3417_v59 = vsel %vm235_vm0, %v5827_v63, 0.0  ;;  %v3483_v41 = vmul.f32 %v5827_v63, %v5827_v63  ;;  %v5833_v43 = vpop.f32.mrb[6].mxu1 }
 0x493   : > { %v3418_v35 = vadd.f32 %v3417_v59, %v3416_v33  ;;  %v5835_v54 = vpop.f32.mrb[7].mxu1  ;;  %v3486_v44 = vmul.f32 %v5833_v43, %v5833_v43  ;;  %v3522_v10 = vsel %vm235_vm0, %v3485_v53, 0.0  ;;  %v3423_v42 = vsel %vm235_vm0, %v5833_v43, 0.0 }
 0x494   : > { %v3518_v34 = vsel %vm235_vm0, %v3483_v41, 0.0  ;;  %v3419_v19 = vsel %vm235_vm0, %v5835_v54, 0.0  ;;  %v3484_v61 = vmul.f32 %v5835_v54, %v5835_v54 }
 0x495   : > { %v3519_v28 = vadd.f32 %v3518_v34, %v3517_v37  ;;  %v3420_v46 = vadd.f32 %v3419_v19, %v3418_v35  ;;  %v3524_v60 = vsel %vm235_vm0, %v3486_v44, 0.0 }
 0x496   : > { %v3520_v29 = vsel %vm235_vm0, %v3484_v61, 0.0 }
 0x497   : > { %v3422_v0 = vadd.f32 %v3421_v21, %v3420_v46  ;;  %v3521_v57 = vadd.f32 %v3520_v29, %v3519_v28 }
 0x499   : > { %v3523_v55 = vadd.f32 %v3522_v10, %v3521_v57  ;;  %v3424_v50 = vadd.f32 %v3423_v42, %v3422_v0 }
 0x49b   : > { %v3525_v20 = vadd.f32 %v3524_v60, %v3523_v55 }
 0x4a0   : > { %v5853_v56 = vpop.f32.mrb[8].mxu1 }
 0x4a1   : > { %v5855_v52 = vpop.f32.mrb[9].mxu1  ;;  %v3489_v51 = vmul.f32 %v5853_v56, %v5853_v56  ;;  %v3429_v49 = vsel %vm235_vm0, %v5853_v56, 0.0 }
 0x4a2   : > { %v3425_v40 = vsel %vm235_vm0, %v5855_v52, 0.0  ;;  %v3487_v24 = vmul.f32 %v5855_v52, %v5855_v52  ;;  %v5861_v31 = vpop.f32.mrb[10].mxu1 }
 0x4a3   : > { %v3426_v22 = vadd.f32 %v3425_v40, %v3424_v50  ;;  %v5863_v23 = vpop.f32.mrb[11].mxu1  ;;  %v3490_v17 = vmul.f32 %v5861_v31, %v5861_v31  ;;  %v3530_v11 = vsel %vm235_vm0, %v3489_v51, 0.0  ;;  %v3431_v12 = vsel %vm235_vm0, %v5861_v31, 0.0 }
 0x4a4   : > { %v3526_v45 = vsel %vm235_vm0, %v3487_v24, 0.0  ;;  %v3427_v30 = vsel %vm235_vm0, %v5863_v23, 0.0  ;;  %v3488_v25 = vmul.f32 %v5863_v23, %v5863_v23 }
 0x4a5   : > { %v3527_v39 = vadd.f32 %v3526_v45, %v3525_v20  ;;  %v3428_v32 = vadd.f32 %v3427_v30, %v3426_v22  ;;  %v3532_v48 = vsel %vm235_vm0, %v3490_v17, 0.0 }
 0x4a6   : > { %v3528_v18 = vsel %vm235_vm0, %v3488_v25, 0.0 }
 0x4a7   : > { %v3430_v38 = vadd.f32 %v3429_v49, %v3428_v32  ;;  %v3529_v27 = vadd.f32 %v3528_v18, %v3527_v39 }
 0x4a9   : > { %v3531_v13 = vadd.f32 %v3530_v11, %v3529_v27  ;;  %v3432_v62 = vadd.f32 %v3431_v12, %v3430_v38 }
 0x4ab   : > { %v3533_v36 = vadd.f32 %v3532_v48, %v3531_v13 }
 0x4b0   : > { %v5881_v33 = vpop.f32.mrb[12].mxu1 }
 0x4b1   : > { %v5883_v58 = vpop.f32.mrb[13].mxu1  ;;  %v3493_v34 = vmul.f32 %v5881_v33, %v5881_v33  ;;  %v3437_v44 = vsel %vm235_vm0, %v5881_v33, 0.0 }
 0x4b2   : > { %v3433_v37 = vsel %vm235_vm0, %v5883_v58, 0.0  ;;  %v3491_v59 = vmul.f32 %v5883_v58, %v5883_v58  ;;  %v5889_v41 = vpop.f32.mrb[14].mxu1 }
 0x4b3   : > { %v3434_v35 = vadd.f32 %v3433_v37, %v3432_v62  ;;  %v5891_v53 = vpop.f32.mrb[15].mxu1  ;;  %v3494_v29 = vmul.f32 %v5889_v41, %v5889_v41  ;;  %v3538_v42 = vsel %vm235_vm0, %v3493_v34, 0.0  ;;  %v3439_v55 = vsel %vm235_vm0, %v5889_v41, 0.0 }
 0x4b4   : > { %v3534_v19 = vsel %vm235_vm0, %v3491_v59, 0.0  ;;  %v3435_v61 = vsel %vm235_vm0, %v5891_v53, 0.0  ;;  %v3492_v28 = vmul.f32 %v5891_v53, %v5891_v53 }
 0x4b5   : > { %v3535_v46 = vadd.f32 %v3534_v19, %v3533_v36  ;;  %v3436_v21 = vadd.f32 %v3435_v61, %v3434_v35  ;;  %v3540_v20 = vsel %vm235_vm0, %v3494_v29, 0.0 }
 0x4b6   : > { %v3536_v0 = vsel %vm235_vm0, %v3492_v28, 0.0 }
 0x4b7   : > { %v3438_v57 = vadd.f32 %v3437_v44, %v3436_v21  ;;  %v3537_v10 = vadd.f32 %v3536_v0, %v3535_v46 }
 0x4b9   : > { %v3539_v50 = vadd.f32 %v3538_v42, %v3537_v10  ;;  %v3440_v60 = vadd.f32 %v3439_v55, %v3438_v57 }
 0x4bb   : > { %v3541_v40 = vadd.f32 %v3540_v20, %v3539_v50 }
 0x4c0   : > { %v5909_v24 = vpop.f32.mrb[16].mxu1 }
 0x4c1   : > { %v5911_v22 = vpop.f32.mrb[17].mxu1  ;;  %v3497_v32 = vmul.f32 %v5909_v24, %v5909_v24  ;;  %v3445_v11 = vsel %vm235_vm0, %v5909_v24, 0.0 }
 0x4c2   : > { %v3441_v51 = vsel %vm235_vm0, %v5911_v22, 0.0  ;;  %v3495_v45 = vmul.f32 %v5911_v22, %v5911_v22  ;;  %v5917_v30 = vpop.f32.mrb[18].mxu1 }
 0x4c3   : > { %v3442_v25 = vadd.f32 %v3441_v51, %v3440_v60  ;;  %v5919_v39 = vpop.f32.mrb[19].mxu1  ;;  %v3498_v12 = vmul.f32 %v5917_v30, %v5917_v30  ;;  %v3546_v36 = vsel %vm235_vm0, %v3497_v32, 0.0  ;;  %v3447_v37 = vsel %vm235_vm0, %v5917_v30, 0.0 }
 0x4c4   : > { %v3542_v49 = vsel %vm235_vm0, %v3495_v45, 0.0  ;;  %v3443_v17 = vsel %vm235_vm0, %v5919_v39, 0.0  ;;  %v3496_v18 = vmul.f32 %v5919_v39, %v5919_v39 }
 0x4c5   : > { %v3543_v38 = vadd.f32 %v3542_v49, %v3541_v40  ;;  %v3444_v27 = vadd.f32 %v3443_v17, %v3442_v25  ;;  %v3548_v34 = vsel %vm235_vm0, %v3498_v12, 0.0 }
 0x4c6   : > { %v3544_v13 = vsel %vm235_vm0, %v3496_v18, 0.0 }
 0x4c7   : > { %v3446_v62 = vadd.f32 %v3445_v11, %v3444_v27  ;;  %v3545_v48 = vadd.f32 %v3544_v13, %v3543_v38 }
 0x4c9   : > { %v3547_v59 = vadd.f32 %v3546_v36, %v3545_v48  ;;  %v3448_v35 = vadd.f32 %v3447_v37, %v3446_v62 }
 0x4cb   : > { %v3549_v19 = vadd.f32 %v3548_v34, %v3547_v59 }
 0x4d0   : > { %v5937_v61 = vpop.f32.mrb[20].mxu1 }
 0x4d1   : > { %v5939_v28 = vpop.f32.mrb[21].mxu1  ;;  %v3501_v57 = vmul.f32 %v5937_v61, %v5937_v61  ;;  %v3453_v20 = vsel %vm235_vm0, %v5937_v61, 0.0 }
 0x4d2   : > { %v3449_v46 = vsel %vm235_vm0, %v5939_v28, 0.0  ;;  %v3499_v21 = vmul.f32 %v5939_v28, %v5939_v28  ;;  %v5945_v44 = vpop.f32.mrb[22].mxu1 }
 0x4d3   : > { %v3450_v29 = vadd.f32 %v3449_v46, %v3448_v35  ;;  %v5947_v0 = vpop.f32.mrb[23].mxu1  ;;  %v3502_v40 = vmul.f32 %v5945_v44, %v5945_v44  ;;  %v3554_v32 = vsel %vm235_vm0, %v3501_v57, 0.0  ;;  %v3455_v49 = vsel %vm235_vm0, %v5945_v44, 0.0 }
 0x4d4   : > { %v3550_v10 = vsel %vm235_vm0, %v3499_v21, 0.0  ;;  %v3451_v42 = vsel %vm235_vm0, %v5947_v0, 0.0  ;;  %v3500_v55 = vmul.f32 %v5947_v0, %v5947_v0 }
 0x4d5   : > { %v3551_v50 = vadd.f32 %v3550_v10, %v3549_v19  ;;  %v3452_v60 = vadd.f32 %v3451_v42, %v3450_v29  ;;  %v3556_v38 = vsel %vm235_vm0, %v3502_v40, 0.0 }
 0x4d6   : > { %v3552_v51 = vsel %vm235_vm0, %v3500_v55, 0.0 }
 0x4d7   : > { %v3454_v45 = vadd.f32 %v3453_v20, %v3452_v60  ;;  %v3553_v25 = vadd.f32 %v3552_v51, %v3551_v50 }
 0x4d9   : > { %v3555_v17 = vadd.f32 %v3554_v32, %v3553_v25  ;;  %v3456_v18 = vadd.f32 %v3455_v49, %v3454_v45 }
 0x4db   : > { %v3557_v27 = vadd.f32 %v3556_v38, %v3555_v17 }
 0x4e0   : > { %v5965_v11 = vpop.f32.mrb[24].mxu1 }
 0x4e1   : > { %v5967_v12 = vpop.f32.mrb[25].mxu1  ;;  %v3505_v59 = vmul.f32 %v5965_v11, %v5965_v11  ;;  %v3461_v29 = vsel %vm235_vm0, %v5965_v11, 0.0 }
 0x4e2   : > { %v3457_v13 = vsel %vm235_vm0, %v5967_v12, 0.0  ;;  %v3503_v62 = vmul.f32 %v5967_v12, %v5967_v12  ;;  %v5973_v48 = vpop.f32.mrb[26].mxu1 }
 0x4e3   : > { %v3458_v36 = vadd.f32 %v3457_v13, %v3456_v18  ;;  %v5975_v37 = vpop.f32.mrb[27].mxu1  ;;  %v3506_v57 = vmul.f32 %v5973_v48, %v5973_v48  ;;  %v3562_v50 = vsel %vm235_vm0, %v3505_v59, 0.0  ;;  %v3463_v60 = vsel %vm235_vm0, %v5973_v48, 0.0 }
 0x4e4   : > { %v3558_v35 = vsel %vm235_vm0, %v3503_v62, 0.0  ;;  %v3459_v34 = vsel %vm235_vm0, %v5975_v37, 0.0  ;;  %v3504_v19 = vmul.f32 %v5975_v37, %v5975_v37 }
 0x4e5   : > { %v3559_v46 = vadd.f32 %v3558_v35, %v3557_v27  ;;  %v3460_v21 = vadd.f32 %v3459_v34, %v3458_v36  ;;  %v3564_v51 = vsel %vm235_vm0, %v3506_v57, 0.0 }
 0x4e6   : > { %v3560_v10 = vsel %vm235_vm0, %v3504_v19, 0.0 }
 0x4e7   : > { %v3462_v42 = vadd.f32 %v3461_v29, %v3460_v21  ;;  %v3561_v55 = vadd.f32 %v3560_v10, %v3559_v46 }
 0x4e9   : > { %v3563_v20 = vadd.f32 %v3562_v50, %v3561_v55  ;;  %v3464_v40 = vadd.f32 %v3463_v60, %v3462_v42 }
 0x4eb   : > { %v3565_v45 = vadd.f32 %v3564_v51, %v3563_v20 }
 0x4f9   : > { %v5993_v25 = vpop.f32.mrb[28].mxu1 }
 0x4fa   : > { %v5995_v32 = vpop.f32.mrb[29].mxu1  ;;  %v3509_v13 = vmul.f32 %v5993_v25, %v5993_v25  ;;  %v3469_v19 = vsel %vm235_vm0, %v5993_v25, 0.0 }
 0x4fb   : > { %v3465_v49 = vsel %vm235_vm0, %v5995_v32, 0.0  ;;  %v3507_v17 = vmul.f32 %v5995_v32, %v5995_v32  ;;  %v6001_v18 = vpop.f32.mrb[30].mxu1 }
 0x4fc   : > { %v3466_v38 = vadd.f32 %v3465_v49, %v3464_v40  ;;  %v6003_v27 = vpop.f32.mrb[31].mxu1  ;;  %v3510_v46 = vmul.f32 %v6001_v18, %v6001_v18  ;;  %v3570_v10 = vsel %vm235_vm0, %v3509_v13, 0.0  ;;  %v3471_v42 = vsel %vm235_vm0, %v6001_v18, 0.0 }
 0x4fd   : > { %v3566_v62 = vsel %vm235_vm0, %v3507_v17, 0.0  ;;  %v3467_v36 = vsel %vm235_vm0, %v6003_v27, 0.0  ;;  %v3508_v59 = vmul.f32 %v6003_v27, %v6003_v27 }
 0x4fe   : > { %v3567_v35 = vadd.f32 %v3566_v62, %v3565_v45  ;;  %v3468_v34 = vadd.f32 %v3467_v36, %v3466_v38  ;;  %v3572_v60 = vsel %vm235_vm0, %v3510_v46, 0.0 }
 0x4ff   : > { %v3568_v21 = vsel %vm235_vm0, %v3508_v59, 0.0 }
 0x500   : > { %v3470_v29 = vadd.f32 %v3469_v19, %v3468_v34  ;;  %v3569_v57 = vadd.f32 %v3568_v21, %v3567_v35 }
 0x502   : > { %v3472_v55 = vadd.f32 %v3471_v42, %v3470_v29  ;;  %v3571_v50 = vadd.f32 %v3570_v10, %v3569_v57 }
 0x504   : > { %v3473_v20 = vrot.slane %v3472_v55, 4  ;;  %v3573_v40 = vadd.f32 %v3572_v60, %v3571_v50 }
 0x506   : > { %v3474_v51 = vadd.f32 %v3473_v20, %v3472_v55  ;;  %v3574_v45 = vrot.slane %v3573_v40, 4 }
 0x508   : > { %v3475_v49 = vrot.slane %v3474_v51, 2  ;;  %v3575_v17 = vadd.f32 %v3574_v45, %v3573_v40 }
 0x50a   : > { %v3476_v38 = vadd.f32 %v3475_v49, %v3474_v51  ;;  %v3576_v62 = vrot.slane %v3575_v17, 2 }
 0x50c   : > { %v3477_v36 = vrot.slane %v3476_v38, 1  ;;  %v3577_v59 = vadd.f32 %v3576_v62, %v3575_v17 }
 0x50e   : > { %v3478_v35 = vadd.f32 %v3477_v36, %v3476_v38  ;;  %v3578_v34 = vrot.slane %v3577_v59, 1 }
 0x510   : > { %v3579_v13 = vadd.f32 %v3578_v34, %v3577_v59  ;;  %v6021_v19 = vmul.f32 0.00390625, %v3478_v35 }
 0x512   : > { %v3581_v21 = vmul.f32 0.00390625, %v3579_v13  ;;  %v3582_v29 = vmul.f32 %v6021_v19, %v6021_v19  ;;  %v3614_v46 = vsub.f32 %v6003_v27, %v6021_v19  ;;  %v3585_v57 = vsub.f32 %v5799_v16, %v6021_v19 }
 0x513   : > { %v3586_v10 = vsub.f32 %v5805_v26, %v6021_v19  ;;  %v3587_v42 = vsub.f32 %v5797_v47, %v6021_v19  ;;  %v3588_v55 = vsub.f32 %v5803_v6, %v6021_v19  ;;  %v3589_v50 = vsub.f32 %v5827_v63, %v6021_v19 }
 0x514   : > { %v3583_v60 = vsub.f32 %v3581_v21, %v3582_v29  ;;  %v3590_v20 = vsub.f32 %v5835_v54, %v6021_v19  ;;  %v3591_v27 = vsub.f32 %v5825_v5, %v6021_v19  ;;  %v3592_v40 = vsub.f32 %v5833_v43, %v6021_v19 }
 0x515   : > { %v3593_v26 = vsub.f32 %v5855_v52, %v6021_v19  ;;  %v3594_v47 = vsub.f32 %v5863_v23, %v6021_v19  ;;  %v3595_v6 = vsub.f32 %v5853_v56, %v6021_v19  ;;  %v3596_v63 = vsub.f32 %v5861_v31, %v6021_v19 }
 0x516   : > { %v3584_v51 = vmax.f32 %v3583_v60, 0.0  ;;  %v3597_v54 = vsub.f32 %v5883_v58, %v6021_v19  ;;  %v3598_v5 = vsub.f32 %v5891_v53, %v6021_v19  ;;  %v3599_v43 = vsub.f32 %v5881_v33, %v6021_v19 }
 0x517   : > { %v3600_v52 = vsub.f32 %v5889_v41, %v6021_v19  ;;  %v3601_v23 = vsub.f32 %v5911_v22, %v6021_v19  ;;  %v3602_v56 = vsub.f32 %v5919_v39, %v6021_v19  ;;  %v3603_v31 = vsub.f32 %v5909_v24, %v6021_v19 }
 0x518   : > { %v3617_v45 = vadd.f32 1e-05, %v3584_v51  ;;  %v3604_v58 = vsub.f32 %v5917_v30, %v6021_v19  ;;  %v3605_v53 = vsub.f32 %v5939_v28, %v6021_v19  ;;  %v3606_v33 = vsub.f32 %v5947_v0, %v6021_v19 }
 0x519   : > { %v3607_v41 = vsub.f32 %v5937_v61, %v6021_v19  ;;  %v3608_v22 = vsub.f32 %v5945_v44, %v6021_v19  ;;  %v3609_v39 = vsub.f32 %v5967_v12, %v6021_v19  ;;  %v3610_v24 = vsub.f32 %v5975_v37, %v6021_v19 }
 0x51a   : > { %4206 = vrsqrt.f32 %v3617_v45  ;;  %v3611_v30 = vsub.f32 %v5965_v11, %v6021_v19  ;;  %v3612_v28 = vsub.f32 %v5973_v48, %v6021_v19  ;;  %v3613_v0 = vsub.f32 %v5995_v32, %v6021_v19 }
 0x51b   : > { %v3615_v61 = vsub.f32 %v5993_v25, %v6021_v19  ;;  %v3616_v44 = vsub.f32 %v6001_v18, %v6021_v19  ;;  %v6282_v32 = vunpack.c.h.bf16 %v4288_v2  ;;  %v6291_v19 = vunpack.c.l.bf16 %v4310_v14 }
 0x524   : > { %v4207_v12 = vpop.eup %4206 }
 0x525   : > { %v6089_v49 = vmul.f32 %v4207_v12, %v3614_v46  ;;  %v3621_v37 = vmul.f32 %v4207_v12, %v3587_v42  ;;  %v3620_v17 = vmul.f32 %v4207_v12, %v3586_v10  ;;  %v3623_v38 = vmul.f32 %v4207_v12, %v3589_v50 }
 0x526   : > { %v3622_v62 = vmul.f32 %v4207_v12, %v3588_v55  ;;  %v3625_v11 = vmul.f32 %v4207_v12, %v3591_v27  ;;  %v3624_v36 = vmul.f32 %v4207_v12, %v3590_v20  ;;  %v3627_v59 = vmul.f32 %v4207_v12, %v3593_v26 }
 0x527   : > { %v3653_v48 = vadd.f32 %v4290_v3, %v3621_v37  ;;  %v3652_v35 = vadd.f32 %v6282_v32, %v3620_v17  ;;  %v3626_v25 = vmul.f32 %v4207_v12, %v3592_v40  ;;  %v3629_v18 = vmul.f32 %v4207_v12, %v3595_v6 }
 0x528   : > { %v3628_v34 = vmul.f32 %v4207_v12, %v3594_v47  ;;  %v3631_v13 = vmul.f32 %v4207_v12, %v3597_v54  ;;  %v3630_v21 = vmul.f32 %v4207_v12, %v3596_v63  ;;  %v3633_v29 = vmul.f32 %v4207_v12, %v3599_v43 }
 0x529   : > { %3690 = vrot.lane.b32.xlu1 %v3653_v48, %s4219_s21  ;;  %3685 = vrot.lane.b32.xlu0 %v3652_v35, %s4216_s18  ;;  %v3632_v46 = vmul.f32 %v4207_v12, %v3598_v5  ;;  %v6283_v10 = vunpack.c.l.bf16 %v4285_v1  ;;  %v3654_v3 = vadd.f32 %v4292_v4, %v3622_v62  ;;  %v3635_v55 = vmul.f32 %v4207_v12, %v3601_v23  ;;  %s4226_s18 = smov 48   ;;  %s4229_s21 = smov 52   ;;  %v6298_v62 = vld [vmem:[#allocation5_spill] sm:$0xff]  ;;  %v6301_v48 = vld [vmem:[#allocation6_spill] sm:$0xff] }
 0x52a   : > { %v3634_v50 = vmul.f32 %v4207_v12, %v3600_v52  ;;  %v3637_v60 = vmul.f32 %v4207_v12, %v3603_v31  ;;  %v3636_v20 = vmul.f32 %v4207_v12, %v3602_v56  ;;  %v3639_v27 = vmul.f32 %v4207_v12, %v3605_v53 }
 0x52b   : > { %v3655_v42 = vadd.f32 %v6283_v10, %v3623_v38  ;;  %v3638_v40 = vmul.f32 %v4207_v12, %v3604_v58  ;;  %v3641_v26 = vmul.f32 %v4207_v12, %v3607_v41  ;;  %v6284_v47 = vunpack.c.l.bf16 %v4297_v7 }
 0x52c   : > { %v6285_v63 = vunpack.c.h.bf16 %v4285_v1  ;;  %v3640_v54 = vmul.f32 %v4207_v12, %v3606_v33  ;;  %v3643_v5 = vmul.f32 %v4207_v12, %v3609_v39  ;;  %v6286_v4 = vunpack.c.l.bf16 %v4300_v8 }
 0x52d   : > { %3700 = vrot.lane.b32.xlu1 %v3655_v42, %s4217_s19  ;;  %3695 = vrot.lane.b32.xlu0 %v3654_v3, %s4220_s22  ;;  %v3657_v6 = vadd.f32 %v6284_v47, %v3625_v11  ;;  %v3642_v52 = vmul.f32 %v4207_v12, %v3608_v22  ;;  %v3645_v23 = vmul.f32 %v4207_v12, %v3611_v30  ;;  %v6287_v1 = vunpack.c.h.bf16 %v4297_v7  ;;  %s4227_s19 = smov 44   ;;  %s4230_s22 = smov 64  }
 0x52e   : > { %v3656_v51 = vadd.f32 %v6285_v63, %v3624_v36  ;;  %v3659_v43 = vadd.f32 %v6286_v4, %v3627_v59  ;;  %v3644_v56 = vmul.f32 %v4207_v12, %v3610_v24  ;;  %v6110_v31 = vmul.f32 %v4207_v12, %v3613_v0 }
 0x52f   : > { %v6112_v45 = vmul.f32 %v4207_v12, %v3612_v28  ;;  %v3658_v58 = vadd.f32 %v6287_v1, %v3626_v25  ;;  %v6116_v53 = vmul.f32 %v4207_v12, %v3615_v61  ;;  %v6118_v33 = vmul.f32 %v4207_v12, %v3616_v44 }
 0x530   : > { %v3619_v41 = vmul.f32 %v4207_v12, %v3585_v57  ;;  %v6288_v7 = vunpack.c.l.bf16 %v4288_v2  ;;  %v6289_v39 = vunpack.c.l.bf16 %v4303_v9  ;;  %v6290_v30 = vunpack.c.h.bf16 %v4300_v8  ;;  %v6295_v12 = vld [vmem:[#allocation4_spill] sm:$0xff] }
 0x531   : > { %3710 = vrot.lane.b32.xlu1 %v3657_v6, %s4222_s26  ;;  %3705 = vrot.lane.b32.xlu0 %v3656_v51, %s4221_s23  ;;  %v3663_v57 = vadd.f32 %v6291_v19, %v3631_v13  ;;  %v6292_v28 = vunpack.c.h.bf16 %v4303_v9  ;;  %v6293_v2 = vunpack.c.l.bf16 %v4313_v15  ;;  %v6294_v61 = vunpack.c.h.bf16 %v4310_v14  ;;  %s4231_s23 = smov 60   ;;  %s4234_s26 = smov 80   ;;  %v6315_v51 = vld [vmem:[#allocation11_spill] sm:$0xff] }
 0x532   : > { %v3651_v22 = vadd.f32 %v6288_v7, %v3619_v41  ;;  %v3661_v24 = vadd.f32 %v6289_v39, %v3629_v18  ;;  %v3660_v16 = vadd.f32 %v6290_v30, %v3628_v34  ;;  %v6296_v37 = vunpack.c.l.bf16 %v6295_v12  ;;  %v6304_v18 = vld [vmem:[#allocation7_spill] sm:$0xff] }
 0x533   : > { %v3662_v0 = vadd.f32 %v6292_v28, %v3630_v21  ;;  %v3665_v8 = vadd.f32 %v6293_v2, %v3633_v29  ;;  %v3664_v44 = vadd.f32 %v6294_v61, %v3632_v46  ;;  %v6297_v9 = vunpack.c.h.bf16 %v4313_v15  ;;  %v6307_v46 = vld [vmem:[#allocation8_spill] sm:$0xff] }
 0x534   : > { %3683 = vst.msk [vmem:[%s6126_s15] sm:$0xff] %vm235_vm0, %v3651_v22  ;;  %v3667_v17 = vadd.f32 %v6296_v37, %v3635_v55  ;;  %v6299_v11 = vunpack.c.l.bf16 %v6298_v62  ;;  %v6300_v14 = vunpack.c.h.bf16 %v6295_v12  ;;  %v6302_v32 = vunpack.c.l.bf16 %v6301_v48 }
 0x535   : > { %3720 = vrot.lane.b32.xlu1 %v3659_v43, %s4223_s4  ;;  %3715 = vrot.lane.b32.xlu0 %v3658_v58, %s4218_s20  ;;  %s4228_s20 = smov 56   ;;  %v3666_v38 = vadd.f32 %v6297_v9, %v3634_v50  ;;  %v6303_v15 = vunpack.c.h.bf16 %v6298_v62  ;;  %v6305_v34 = vunpack.c.l.bf16 %v6304_v18  ;;  %v6306_v21 = vunpack.c.h.bf16 %v6301_v48  ;;  %s4239_s4 = smov 92   ;;  %v6310_v50 = vld [vmem:[#allocation9_spill] sm:$0xff] }
 0x536   : > { %v3669_v36 = vadd.f32 %v6299_v11, %v3637_v60  ;;  %v3668_v59 = vadd.f32 %v6300_v14, %v3636_v20  ;;  %v3671_v35 = vadd.f32 %v6302_v32, %v3639_v27  ;;  %v6308_v10 = vunpack.c.l.bf16 %v6307_v46 }
 0x537   : > { %v3670_v25 = vadd.f32 %v6303_v15, %v3638_v40  ;;  %v3673_v13 = vadd.f32 %v6305_v34, %v3641_v26  ;;  %v3672_v29 = vadd.f32 %v6306_v21, %v3640_v54  ;;  %v6309_v3 = vunpack.c.h.bf16 %v6304_v18  ;;  %v6313_v26 = vld [vmem:[#allocation10_spill] sm:$0xff] }
 0x538   : > { %v3675_v42 = vadd.f32 %v6308_v10, %v3643_v5  ;;  %v6311_v60 = vunpack.c.l.bf16 %v6310_v50  ;;  %v6312_v27 = vunpack.c.h.bf16 %v6307_v46  ;;  %v3679_v47 = vadd.f32 %v6313_v26, %v6110_v31  ;;  %v6316_v5 = vld [vmem:[#allocation12_spill] sm:$0xff] }
 0x539   : > { %3731 = vrot.lane.b32.xlu1 %v3661_v24, %s4224_s16  ;;  %3725 = vrot.lane.b32.xlu0 %v3660_v16, %s4225_s17  ;;  %v3674_v55 = vadd.f32 %v6309_v3, %v3642_v52  ;;  %v6314_v6 = vunpack.c.h.bf16 %v6310_v50  ;;  %v3680_v54 = vadd.f32 %v6315_v51, %v6089_v49  ;;  %v6317_v4 = vunpack.c.l.bf16 %v6316_v5 }
 0x53a   : > { %v3677_v20 = vadd.f32 %v6311_v60, %v3645_v23  ;;  %v3676_v40 = vadd.f32 %v6312_v27, %v3644_v56  ;;  %v6318_v52 = vunpack.c.h.bf16 %v6316_v5  ;;  %vm3752_vm0 = vcmask 458144  }
 0x53b   : > { %v3678_v63 = vadd.f32 %v6314_v6, %v6112_v45  ;;  %v3681_v43 = vadd.f32 %v6317_v4, %v6116_v53 }
 0x53c   : > { %v3682_v23 = vadd.f32 %v6318_v52, %v6118_v33 }
 0x53d   : > { %3743 = vrot.lane.b32.xlu1 %v3663_v57, %s4226_s18  ;;  %3737 = vrot.lane.b32.xlu0 %v3662_v0, %s4227_s19 }
 0x541   : > { %3755 = vrot.lane.b32.xlu1 %v3665_v8, %s4228_s20  ;;  %3749 = vrot.lane.b32.xlu0 %v3664_v44, %s4229_s21 }
 0x545   : > { %3767 = vrot.lane.b32.xlu1 %v3667_v17, %s4230_s22  ;;  %3761 = vrot.lane.b32.xlu0 %v3666_v38, %s4231_s23 }
 0x549   : > { %3779 = vrot.lane.b32.xlu1 %v3669_v36, %s4232_s24  ;;  %3773 = vrot.lane.b32.xlu0 %v3668_v59, %s4233_s25 }
 0x54d   : > { %3791 = vrot.lane.b32.xlu1 %v3671_v35, %s4234_s26  ;;  %3785 = vrot.lane.b32.xlu0 %v3670_v25, %s4235_s27 }
 0x551   : > { %3803 = vrot.lane.b32.xlu1 %v3673_v13, %s4236_s28  ;;  %3797 = vrot.lane.b32.xlu0 %v3672_v29, %s4237_s29 }
 0x555   : > { %3815 = vrot.lane.b32.xlu1 %v3675_v42, %s4238_s30  ;;  %3809 = vrot.lane.b32.xlu0 %v3674_v55, %s4239_s4 }
 0x559   : > { %3827 = vrot.lane.b32.xlu1 %v3677_v20, %s4240_s5  ;;  %3821 = vrot.lane.b32.xlu0 %v3676_v40, %s4241_s6 }
 0x55d   : > { %3839 = vrot.lane.b32.xlu1 %v3679_v47, %s4242_s7  ;;  %3833 = vrot.lane.b32.xlu0 %v3678_v63, %s4243_s8 }
 0x561   : > { %3851 = vrot.lane.b32.xlu1 %v3681_v43, %s4244_s9  ;;  %3845 = vrot.lane.b32.xlu0 %v3680_v54, %s4245_s10 }
 0x565   : > { %3857 = vrot.lane.b32.xlu0 %v3682_v23, %s4246_s11 }
 0x59b   : > { %v3691_v49 = vpop.permute.xlu1 %3690  ;;  %v3686_v56 = vpop.permute.xlu0 %3685 }
 0x59c   : > { %3688 = vst.msk [vmem:[%s6126_s15] sm:$0xff] %vm522_vm3, %v3686_v56  ;;  %vm3770_vm3 = vcmask 556544  }
 0x59d   : > { %3693 = vst.msk [vmem:[%s6126_s15] sm:$0xff] %vm651_vm4, %v3691_v49  ;;  %vm3776_vm4 = vcmask 589344  }
 0x59f   : > { %v3701_v31 = vpop.permute.xlu1 %3700  ;;  %v3696_v45 = vpop.permute.xlu0 %3695 }
 0x5a0   : > { %3698 = vst.msk [vmem:[%s6126_s15] sm:$0xff] %vm780_vm5, %v3696_v45  ;;  %vm3782_vm5 = vcmask 622144  }
 0x5a1   : > { %3703 = vst.msk [vmem:[%s6126_s15] sm:$0xff] %vm909_vm6, %v3701_v31  ;;  %vm3788_vm6 = vcmask 654944  }
 0x5a3   : > { %v3711_v1 = vpop.permute.xlu1 %3710  ;;  %v3706_v58 = vpop.permute.xlu0 %3705 }
 0x5a4   : > { %3708 = vst.msk [vmem:[%s6126_s15] sm:$0xff] %vm1038_vm7, %v3706_v58  ;;  %vm3794_vm7 = vcmask 687744  }
 0x5a5   : > { %3713 = vst.msk [vmem:[%s6126_s15] sm:$0xff] %vm1168_vm8, %v3711_v1  ;;  %vm3800_vm8 = vcmask 720544  }
 0x5a7   : > { %v3721_v53 = vpop.permute.xlu1 %3720  ;;  %v3716_v33 = vpop.permute.xlu0 %3715 }
 0x5a8   : > { %3718 = vst.msk [vmem:[%s6126_s15] sm:$0xff] %vm1297_vm9, %v3716_v33  ;;  %vm3806_vm9 = vcmask 753344  }
 0x5a9   : > { %3723 = vst.msk [vmem:[%s6126_s15] sm:$0xff] %vm1426_vm10, %v3721_v53  ;;  %vm3812_vm10 = vcmask 786144  }
 0x5ab   : > { %v3732_v41 = vpop.permute.xlu1 %3731  ;;  %v3726_v7 = vpop.permute.xlu0 %3725 }
 0x5ac   : > { %3729 = vst.msk [vmem:[%s6126_s15] sm:$0xff] %vm3728_vm12, %v3726_v7  ;;  %vm3824_vm12 = vcmask 851744  }
 0x5ad   : > { %3735 = vst.msk [vmem:[%s6126_s15] sm:$0xff] %vm3734_vm13, %v3732_v41  ;;  %vm3830_vm13 = vcmask 884544  }
 0x5af   : > { %v3744_v22 = vpop.permute.xlu1 %3743  ;;  %v3738_v39 = vpop.permute.xlu0 %3737 }
 0x5b0   : > { %3741 = vst.msk [vmem:[%s6126_s15] sm:$0xff] %vm3740_vm14, %v3738_v39  ;;  %vm3836_vm14 = vcmask 917344  }
 0x5b1   : > { %3747 = vst.msk [vmem:[%s6126_s15] sm:$0xff] %vm3746_vm15, %v3744_v22  ;;  %vm3842_vm15 = vcmask 950144  }
 0x5b3   : > { %v3756_v24 = vpop.permute.xlu1 %3755  ;;  %v3750_v30 = vpop.permute.xlu0 %3749 }
 0x5b4   : > { %3753 = vst.msk [vmem:[%s6126_s15] sm:$0xff] %vm3752_vm0, %v3750_v30  ;;  %vm3848_vm0 = vcmask 982944  }
 0x5b5   : > { %3759 = vst.msk [vmem:[%s6126_s15] sm:$0xff] %vm3758_vm1, %v3756_v24  ;;  %vm3854_vm1 = vcmask 1015744  }
 0x5b7   : > { %v3768_v16 = vpop.permute.xlu1 %3767  ;;  %v3762_v19 = vpop.permute.xlu0 %3761 }
 0x5b8   : > { %3765 = vst.msk [vmem:[%s6126_s15] sm:$0xff] %vm3764_vm2, %v3762_v19  ;;  %vm3860_vm2 = vcmask 1048544  }
 0x5b9   : > { %3771 = vst.msk [vmem:[%s6126_s15] sm:$0xff] %vm3770_vm3, %v3768_v16 }
 0x5bb   : > { %v3780_v57 = vpop.permute.xlu1 %3779  ;;  %v3774_v28 = vpop.permute.xlu0 %3773 }
 0x5bc   : > { %3777 = vst.msk [vmem:[%s6126_s15] sm:$0xff] %vm3776_vm4, %v3774_v28 }
 0x5bd   : > { %3783 = vst.msk [vmem:[%s6126_s15] sm:$0xff] %vm3782_vm5, %v3780_v57 }
 0x5bf   : > { %v3792_v0 = vpop.permute.xlu1 %3791  ;;  %v3786_v2 = vpop.permute.xlu0 %3785 }
 0x5c0   : > { %3789 = vst.msk [vmem:[%s6126_s15] sm:$0xff] %vm3788_vm6, %v3786_v2 }
 0x5c1   : > { %3795 = vst.msk [vmem:[%s6126_s15] sm:$0xff] %vm3794_vm7, %v3792_v0 }
 0x5c3   : > { %v3804_v8 = vpop.permute.xlu1 %3803  ;;  %v3798_v61 = vpop.permute.xlu0 %3797 }
 0x5c4   : > { %3801 = vst.msk [vmem:[%s6126_s15] sm:$0xff] %vm3800_vm8, %v3798_v61 }
 0x5c5   : > { %3807 = vst.msk [vmem:[%s6126_s15] sm:$0xff] %vm3806_vm9, %v3804_v8 }
 0x5c7   : > { %v3816_v44 = vpop.permute.xlu1 %3815  ;;  %v3810_v12 = vpop.permute.xlu0 %3809 }
 0x5c8   : > { %3813 = vst.msk [vmem:[%s6126_s15] sm:$0xff] %vm3812_vm10, %v3810_v12 }
 0x5c9   : > { %3819 = vst.msk [vmem:[%s6126_s15] sm:$0xff] %vm3818_vm11, %v3816_v44 }
 0x5cb   : > { %v3828_v37 = vpop.permute.xlu1 %3827  ;;  %v3822_v17 = vpop.permute.xlu0 %3821 }
 0x5cc   : > { %3825 = vst.msk [vmem:[%s6126_s15] sm:$0xff] %vm3824_vm12, %v3822_v17 }
 0x5cd   : > { %3831 = vst.msk [vmem:[%s6126_s15] sm:$0xff] %vm3830_vm13, %v3828_v37 }
 0x5cf   : > { %v3840_v9 = vpop.permute.xlu1 %3839  ;;  %v3834_v38 = vpop.permute.xlu0 %3833 }
 0x5d0   : > { %3837 = vst.msk [vmem:[%s6126_s15] sm:$0xff] %vm3836_vm14, %v3834_v38 }
 0x5d1   : > { %3843 = vst.msk [vmem:[%s6126_s15] sm:$0xff] %vm3842_vm15, %v3840_v9 }
 0x5d3   : > { %v3852_v62 = vpop.permute.xlu1 %3851  ;;  %v3846_v11 = vpop.permute.xlu0 %3845 }
 0x5d4   : > { %3849 = vst.msk [vmem:[%s6126_s15] sm:$0xff] %vm3848_vm0, %v3846_v11 }
 0x5d5   : > { %3855 = vst.msk [vmem:[%s6126_s15] sm:$0xff] %vm3854_vm1, %v3852_v62 }
 0x5d7   : > { %v3858_v36 = vpop.permute.xlu0 %3857 }
 0x5d8   : > { %3861 = vst.msk [vmem:[%s6126_s15] sm:$0xff] %vm3860_vm2, %v3858_v36 }
 0x5d9 PF: > { %s13_s12 = sadd.s32 1, %s4214_s12  }
 0x5da   : > { %p10_p4 = scmp.ge.s32.totalorder %s13_s12, 4  }
 0x5dc   :  { %12 = sbr.rel (!%p10_p4) target bundleno = 1 (0x1), region = 65 }

</bundles_post_ra>
